<compile_context>
chip_gen: v6e
topology: v6e:2x2x1
jax: 0.10.0
libtpu: 0.0.40
codegen_flags: <defaults>
</compile_context>

<pallas_src>
import functools

import jax
import jax.numpy as jnp
from jax.experimental import pallas as pl
from jax.experimental.pallas import tpu as pltpu

NEG_INF = float("-inf")


def _round_up(x, m):
    return ((x + m - 1) // m) * m


def _crp_kernel(x_ref, w_ref, o_ref, cpad_ref, ppad_ref,
                *, H, W, Cp, TH, wL, Wc, pL, Wp):
    """Grid = (batch, block).  One (batch element, conv+pool block) per step.

    x_ref:    (1, H, W, Cp)     input tile (only read at blk == 0)
    w_ref:    (1, 3, 3*Cp, Cp)  this block's conv weights (kh-major; the 3 kw
                                taps stacked along the contraction dim, bf16)
    o_ref:    (1, H, W, Cp)     running output, revisited across the blk axis
    cpad_ref: (H+2, Wc, Cp)     zero-padded `path` (conv input); interior at
                                rows [1, 1+H), cols [wL, wL+W)
    ppad_ref: (H+4, Wp, Cp)     -inf padded conv output (pool input); interior
                                at rows [2, 2+H), cols [pL, pL+W)
    """
    blk = pl.program_id(1)
    n_strips = (H + TH - 1) // TH  # static python int

    # ---- blk == 0: init the scratch borders, ReLU the input into the running
    # output and into the conv `path` buffer (per strip -> bounded live ranges).
    @pl.when(blk == 0)
    def _init():
        # cpad: zero borders (column slabs are sublane-aligned full-width stores)
        cpad_ref[:, 0:wL, :] = jnp.zeros((H + 2, wL, Cp), jnp.float32)
        cpad_ref[:, wL + W:Wc, :] = jnp.zeros((H + 2, Wc - wL - W, Cp),
                                              jnp.float32)
        cpad_ref[0:1, wL:wL + W, :] = jnp.zeros((1, W, Cp), jnp.float32)
        cpad_ref[H + 1:H + 2, wL:wL + W, :] = jnp.zeros((1, W, Cp), jnp.float32)
        # ppad: -inf borders
        ppad_ref[:, 0:pL, :] = jnp.full((H + 4, pL, Cp), NEG_INF, jnp.float32)
        ppad_ref[:, pL + W:Wp, :] = jnp.full((H + 4, Wp - pL - W, Cp),
                                             NEG_INF, jnp.float32)
        ppad_ref[0:2, pL:pL + W, :] = jnp.full((2, W, Cp), NEG_INF, jnp.float32)
        ppad_ref[H + 2:H + 4, pL:pL + W, :] = jnp.full((2, W, Cp), NEG_INF,
                                                       jnp.float32)
        for s in range(n_strips):
            r0 = s * TH
            th = min(TH, H - r0)
            xr = jnp.maximum(x_ref[0, r0:r0 + th], 0.0)
            o_ref[0, r0:r0 + th] = xr
            cpad_ref[1 + r0:1 + r0 + th, wL:wL + W, :] = xr

    # ---- 3x3 conv (stride 1, pad 1, no bias).  Per H-strip: 3 fused MXU
    # matmuls (one per kh) of shape (th*W, 3*Cp) @ (3*Cp, Cp), bf16 inputs /
    # f32 accumulate.  Result lands in the -inf padded pool buffer.
    # TODO(synk): on v7x, drive the MXU result RAM (pltpu.matmul_*) so the
    # 2 remaining VPU accumulation adds happen in the MRB instead.
    for s in range(n_strips):
        r0 = s * TH
        th = min(TH, H - r0)
        acc = None
        for dh in range(3):
            taps = [
                cpad_ref[r0 + dh:r0 + dh + th,
                         wL - 1 + dw:wL - 1 + dw + W, :].astype(jnp.bfloat16)
                for dw in range(3)
            ]
            win = jnp.concatenate(taps, axis=-1).reshape(th * W, 3 * Cp)
            part = jnp.dot(win, w_ref[0, dh],
                           preferred_element_type=jnp.float32)
            acc = part if acc is None else acc + part
        ppad_ref[2 + r0:2 + r0 + th, pL:pL + W, :] = acc.reshape(th, W, Cp)

    # ---- 5x5 max pool (stride 1, pad 2, -inf pad), separable and fused per
    # strip: 1x5 max along W over th+4 rows, then 5x1 max along H.  No
    # intermediate VMEM round trip.
    not_last = blk + 1 < pl.num_programs(1)
    for s in range(n_strips):
        r0 = s * TH
        th = min(TH, H - r0)
        rm = ppad_ref[r0:r0 + th + 4, pL - 2:pL - 2 + W, :]
        for dw in range(1, 5):
            rm = jnp.maximum(
                rm, ppad_ref[r0:r0 + th + 4, pL - 2 + dw:pL - 2 + dw + W, :])
        pooled = rm[0:th]
        for dh in range(1, 5):
            pooled = jnp.maximum(pooled, rm[dh:dh + th])

        # residual accumulate into the (revisited) output block
        o_ref[0, r0:r0 + th] = o_ref[0, r0:r0 + th] + pooled

        # pooled becomes the next block's `path`; skip the store on last block
        @pl.when(not_last)
        def _store_path(pooled=pooled, r0=r0, th=th):
            cpad_ref[1 + r0:1 + r0 + th, wL:wL + W, :] = pooled


def chained_residual_pool_improved(x_nhwc, weights_hwio):
    """x_nhwc: (B, H, W, C) float32; weights_hwio: (n_blocks, 3, 3, C, C)."""
    B, H, W, C = x_nhwc.shape
    n_blocks = weights_hwio.shape[0]

    # Channels padded to a lane multiple (128).  Strip height keeps the f32
    # conv accumulator around <=64 KiB of vregs.
    Cp = max(128, _round_up(C, 128))
    TH = max(1, min(H, 8, (64 * 1024) // (W * Cp * 4)))
    # Scratch interiors start at sublane-aligned column offsets so the big
    # stores (path, conv output, pooled) are unmasked; pad columns live in
    # [0, wL) / [wL+W, Wc) etc.
    wL = 8                                  # conv zero-pad interior start
    Wc = _round_up(wL + W + 1, 8)
    pL = 8                                  # pool -inf-pad interior start
    Wp = _round_up(pL + W + 2, 8)

    x_p = jnp.pad(x_nhwc.astype(jnp.float32),
                  ((0, 0), (0, 0), (0, 0), (0, Cp - C)))
    w_p = jnp.pad(weights_hwio.astype(jnp.float32),
                  ((0, 0), (0, 0), (0, 0), (0, Cp - C), (0, Cp - C)))
    # Fuse the kw taps along the contraction dim: (n_blocks, kh, 3*Cp, Cp);
    # row block dw*Cp+ci multiplies win channel block dw.  bf16 for the MXU.
    w_fused = w_p.reshape(n_blocks, 3, 3 * Cp, Cp).astype(jnp.bfloat16)

    kernel = functools.partial(_crp_kernel, H=H, W=W, Cp=Cp, TH=TH,
                               wL=wL, Wc=Wc, pL=pL, Wp=Wp)

    # VMEM footprint: scratches + double-buffered input/weight/output blocks.
    scratch_bytes = ((H + 2) * Wc * Cp + (H + 4) * Wp * Cp) * 4
    block_bytes = 2 * (H * W * Cp * 4        # x block
                       + H * W * Cp * 4      # out block
                       + 9 * Cp * Cp * 2)    # streamed weight block (bf16)
    vmem_limit = min(max(int((scratch_bytes + block_bytes) * 1.5) + (4 << 20),
                         32 << 20), 120 << 20)

    # TODO(synk): for large RefineNet H/W/Cp (v7x: 64 MiB VMEM), add an H-tile
    # grid axis (compounded 3-row-per-block halo or per-tile recompute) marked
    # "parallel" alongside batch, and tile W when W*Cp strips no longer fit vregs.
    out = pl.pallas_call(
        kernel,
        out_shape=jax.ShapeDtypeStruct((B, H, W, Cp), jnp.float32),
        grid_spec=pltpu.PrefetchScalarGridSpec(
            num_scalar_prefetch=0,
            grid=(B, n_blocks),
            in_specs=[
                pl.BlockSpec((1, H, W, Cp), lambda b, k: (b, 0, 0, 0)),
                # per-block weight streaming (double-buffered by BlockSpec)
                pl.BlockSpec((1, 3, 3 * Cp, Cp), lambda b, k: (k, 0, 0, 0)),
            ],
            out_specs=pl.BlockSpec((1, H, W, Cp), lambda b, k: (b, 0, 0, 0)),
            scratch_shapes=[
                pltpu.VMEM((H + 2, Wc, Cp), jnp.float32),   # conv path (zero pad)
                pltpu.VMEM((H + 4, Wp, Cp), jnp.float32),   # pool input (-inf pad)
            ],
        ),
        compiler_params=pltpu.CompilerParams(
            dimension_semantics=("parallel", "arbitrary"),
            vmem_limit_bytes=vmem_limit),
    )(x_p, w_fused)
    return out[..., :C]


def reference(x_nhwc, weights_hwio):
    """Pure-JAX f32 reference (same NHWC layout)."""
    x = jnp.maximum(x_nhwc, 0.0)
    out = x
    path = x
    for i in range(weights_hwio.shape[0]):
        conv = jax.lax.conv_general_dilated(
            path, weights_hwio[i],
            window_strides=(1, 1), padding="SAME",
            dimension_numbers=("NHWC", "HWIO", "NHWC"),
            precision=jax.lax.Precision.HIGHEST)
        pooled = jax.lax.reduce_window(
            conv, -jnp.inf, jax.lax.max,
            window_dimensions=(1, 5, 5, 1),
            window_strides=(1, 1, 1, 1),
            padding=((0, 0), (2, 2), (2, 2), (0, 0)))
        out = out + pooled
        path = pooled
    return out


if __name__ == "__main__":
    key = jax.random.PRNGKey(0)
    kx, kw = jax.random.split(key)

    # PyTorch module input is NCHW: (batch=2, feats=4, 16, 16)
    B, C, H, W = 2, 4, 16, 16
    x_nchw = jax.random.normal(kx, (B, C, H, W), dtype=jnp.float32)

    # block1..block4 conv weights, stored HWIO: (n_blocks, kh, kw, C_in, C_out);
    # PyTorch OIHW weight w_torch[blk] corresponds to weights[blk].transpose(3,2,0,1).
    weights = 0.1 * jax.random.normal(kw, (4, 3, 3, C, C), dtype=jnp.float32)

    x_nhwc = jnp.transpose(x_nchw, (0, 2, 3, 1))

    out = chained_residual_pool_improved(x_nhwc, weights)
    out = jax.block_until_ready(out)

    ref = reference(x_nhwc, weights)
    max_err = float(jnp.max(jnp.abs(out - ref)))
    assert out.shape == (B, H, W, C) and out.dtype == jnp.float32
    # Kernel uses native bf16 MXU inputs (f32 accumulate); reference is full-f32
    # HIGHEST, so the tolerance is loosened accordingly.
    assert jnp.allclose(out, ref, atol=5e-2, rtol=5e-2), f"max_err={max_err}"

    print("KERNEL_OK")
</pallas_src>

<mosaic_0001>
module attributes {stable_mosaic.version = 11 : i64} {
  func.func @_crp_kernel(%arg0: i32, %arg1: i32, %arg2: memref<1x16x16x128xf32, #tpu.memory_space<vmem>>, %arg3: memref<1x3x384x128xbf16, #tpu.memory_space<vmem>>, %arg4: memref<1x16x16x128xf32, #tpu.memory_space<vmem>>, %arg5: memref<18x32x128xf32, #tpu.memory_space<vmem>>, %arg6: memref<20x32x128xf32, #tpu.memory_space<vmem>>) attributes {dimension_semantics = [#tpu.dimension_semantics<parallel>, #tpu.dimension_semantics<arbitrary>], iteration_bounds = array<i64: 2, 4>, scalar_prefetch = 0 : i64, scratch_operands = 2 : i64, tpu.core_type = #tpu.core_type<tc>, window_params = [{transform_indices = @transform_0, window_bounds = array<i64: 1, 16, 16, 128>}, {transform_indices = @transform_1, window_bounds = array<i64: 1, 3, 384, 128>}, {transform_indices = @transform_2, window_bounds = array<i64: 1, 16, 16, 128>}]} {
    %c0_i32 = arith.constant 0 : i32
    %0 = arith.cmpi eq, %arg1, %c0_i32 : i32
    %1 = arith.extui %0 : i1 to i32
    %c0_i32_0 = arith.constant 0 : i32
    %2 = arith.cmpi ne, %1, %c0_i32_0 : i32
    scf.if %2 {
      %cst_130 = arith.constant 0.000000e+00 : f32
      %131 = vector.broadcast %cst_130 : f32 to vector<18x8x128xf32>
      %c0_131 = arith.constant 0 : index
      %c0_132 = arith.constant 0 : index
      %c0_133 = arith.constant 0 : index
      %132 = vector.load %arg5[%c0_131, %c0_132, %c0_133] : memref<18x32x128xf32, #tpu.memory_space<vmem>>, vector<18x8x128xf32>
      tpu.vector_store %arg5[%c0_131, %c0_132, %c0_133], %131 {strides = array<i32>} : memref<18x32x128xf32, #tpu.memory_space<vmem>>, vector<18x8x128xf32>,
      %cst_134 = arith.constant 0.000000e+00 : f32
      %133 = vector.broadcast %cst_134 : f32 to vector<18x8x128xf32>
      %c0_135 = arith.constant 0 : index
      %c24 = arith.constant 24 : index
      %c0_136 = arith.constant 0 : index
      %134 = vector.load %arg5[%c0_135, %c24, %c0_136] : memref<18x32x128xf32, #tpu.memory_space<vmem>>, vector<18x8x128xf32>
      tpu.vector_store %arg5[%c0_135, %c24, %c0_136], %133 {strides = array<i32>} : memref<18x32x128xf32, #tpu.memory_space<vmem>>, vector<18x8x128xf32>,
      %cst_137 = arith.constant 0.000000e+00 : f32
      %135 = vector.broadcast %cst_137 : f32 to vector<1x16x128xf32>
      %c0_138 = arith.constant 0 : index
      %c8_139 = arith.constant 8 : index
      %c0_140 = arith.constant 0 : index
      %136 = vector.load %arg5[%c0_138, %c8_139, %c0_140] : memref<18x32x128xf32, #tpu.memory_space<vmem>>, vector<1x16x128xf32>
      tpu.vector_store %arg5[%c0_138, %c8_139, %c0_140], %135 {strides = array<i32>} : memref<18x32x128xf32, #tpu.memory_space<vmem>>, vector<1x16x128xf32>,
      %cst_141 = arith.constant 0.000000e+00 : f32
      %137 = vector.broadcast %cst_141 : f32 to vector<1x16x128xf32>
      %c17 = arith.constant 17 : index
      %c8_142 = arith.constant 8 : index
      %c0_143 = arith.constant 0 : index
      %138 = vector.load %arg5[%c17, %c8_142, %c0_143] : memref<18x32x128xf32, #tpu.memory_space<vmem>>, vector<1x16x128xf32>
      tpu.vector_store %arg5[%c17, %c8_142, %c0_143], %137 {strides = array<i32>} : memref<18x32x128xf32, #tpu.memory_space<vmem>>, vector<1x16x128xf32>,
      %cst_144 = arith.constant 0xFF800000 : f32
      %139 = vector.broadcast %cst_144 : f32 to vector<20x8x128xf32>
      %c0_145 = arith.constant 0 : index
      %c0_146 = arith.constant 0 : index
      %c0_147 = arith.constant 0 : index
      %140 = vector.load %arg6[%c0_145, %c0_146, %c0_147] : memref<20x32x128xf32, #tpu.memory_space<vmem>>, vector<20x8x128xf32>
      tpu.vector_store %arg6[%c0_145, %c0_146, %c0_147], %139 {strides = array<i32>} : memref<20x32x128xf32, #tpu.memory_space<vmem>>, vector<20x8x128xf32>,
      %cst_148 = arith.constant 0xFF800000 : f32
      %141 = vector.broadcast %cst_148 : f32 to vector<20x8x128xf32>
      %c0_149 = arith.constant 0 : index
      %c24_150 = arith.constant 24 : index
      %c0_151 = arith.constant 0 : index
      %142 = vector.load %arg6[%c0_149, %c24_150, %c0_151] : memref<20x32x128xf32, #tpu.memory_space<vmem>>, vector<20x8x128xf32>
      tpu.vector_store %arg6[%c0_149, %c24_150, %c0_151], %141 {strides = array<i32>} : memref<20x32x128xf32, #tpu.memory_space<vmem>>, vector<20x8x128xf32>,
      %cst_152 = arith.constant 0xFF800000 : f32
      %143 = vector.broadcast %cst_152 : f32 to vector<2x16x128xf32>
      %c0_153 = arith.constant 0 : index
      %c8_154 = arith.constant 8 : index
      %c0_155 = arith.constant 0 : index
      %144 = vector.load %arg6[%c0_153, %c8_154, %c0_155] : memref<20x32x128xf32, #tpu.memory_space<vmem>>, vector<2x16x128xf32>
      tpu.vector_store %arg6[%c0_153, %c8_154, %c0_155], %143 {strides = array<i32>} : memref<20x32x128xf32, #tpu.memory_space<vmem>>, vector<2x16x128xf32>,
      %cst_156 = arith.constant 0xFF800000 : f32
      %145 = vector.broadcast %cst_156 : f32 to vector<2x16x128xf32>
      %c18 = arith.constant 18 : index
      %c8_157 = arith.constant 8 : index
      %c0_158 = arith.constant 0 : index
      %146 = vector.load %arg6[%c18, %c8_157, %c0_158] : memref<20x32x128xf32, #tpu.memory_space<vmem>>, vector<2x16x128xf32>
      tpu.vector_store %arg6[%c18, %c8_157, %c0_158], %145 {strides = array<i32>} : memref<20x32x128xf32, #tpu.memory_space<vmem>>, vector<2x16x128xf32>,
      %c0_159 = arith.constant 0 : index
      %c0_160 = arith.constant 0 : index
      %c0_161 = arith.constant 0 : index
      %c0_162 = arith.constant 0 : index
      %147 = vector.load %arg2[%c0_159, %c0_160, %c0_161, %c0_162] : memref<1x16x16x128xf32, #tpu.memory_space<vmem>>, vector<1x8x16x128xf32>
      %148 = vector.shape_cast %147 : vector<1x8x16x128xf32> to vector<8x16x128xf32>
      %cst_163 = arith.constant 0.000000e+00 : f32
      %149 = vector.broadcast %cst_163 : f32 to vector<8x16x128xf32>
      %150 = arith.maximumf %148, %149 : vector<8x16x128xf32>
      %c0_164 = arith.constant 0 : index
      %c0_165 = arith.constant 0 : index
      %c0_166 = arith.constant 0 : index
      %c0_167 = arith.constant 0 : index
      %151 = vector.load %arg4[%c0_164, %c0_165, %c0_166, %c0_167] : memref<1x16x16x128xf32, #tpu.memory_space<vmem>>, vector<1x8x16x128xf32>
      %152 = vector.shape_cast %151 : vector<1x8x16x128xf32> to vector<8x16x128xf32>
      %153 = vector.shape_cast %150 : vector<8x16x128xf32> to vector<1x8x16x128xf32>
      tpu.vector_store %arg4[%c0_164, %c0_165, %c0_166, %c0_167], %153 {strides = array<i32>} : memref<1x16x16x128xf32, #tpu.memory_space<vmem>>, vector<1x8x16x128xf32>,
      %c1_168 = arith.constant 1 : index
      %c8_169 = arith.constant 8 : index
      %c0_170 = arith.constant 0 : index
      %154 = vector.load %arg5[%c1_168, %c8_169, %c0_170] : memref<18x32x128xf32, #tpu.memory_space<vmem>>, vector<8x16x128xf32>
      tpu.vector_store %arg5[%c1_168, %c8_169, %c0_170], %150 {strides = array<i32>} : memref<18x32x128xf32, #tpu.memory_space<vmem>>, vector<8x16x128xf32>,
      %c0_171 = arith.constant 0 : index
      %c8_172 = arith.constant 8 : index
      %c0_173 = arith.constant 0 : index
      %c0_174 = arith.constant 0 : index
      %155 = vector.load %arg2[%c0_171, %c8_172, %c0_173, %c0_174] : memref<1x16x16x128xf32, #tpu.memory_space<vmem>>, vector<1x8x16x128xf32>
      %156 = vector.shape_cast %155 : vector<1x8x16x128xf32> to vector<8x16x128xf32>
      %cst_175 = arith.constant 0.000000e+00 : f32
      %157 = vector.broadcast %cst_175 : f32 to vector<8x16x128xf32>
      %158 = arith.maximumf %156, %157 : vector<8x16x128xf32>
      %c0_176 = arith.constant 0 : index
      %c8_177 = arith.constant 8 : index
      %c0_178 = arith.constant 0 : index
      %c0_179 = arith.constant 0 : index
      %159 = vector.load %arg4[%c0_176, %c8_177, %c0_178, %c0_179] : memref<1x16x16x128xf32, #tpu.memory_space<vmem>>, vector<1x8x16x128xf32>
      %160 = vector.shape_cast %159 : vector<1x8x16x128xf32> to vector<8x16x128xf32>
      %161 = vector.shape_cast %158 : vector<8x16x128xf32> to vector<1x8x16x128xf32>
      tpu.vector_store %arg4[%c0_176, %c8_177, %c0_178, %c0_179], %161 {strides = array<i32>} : memref<1x16x16x128xf32, #tpu.memory_space<vmem>>, vector<1x8x16x128xf32>,
      %c9_180 = arith.constant 9 : index
      %c8_181 = arith.constant 8 : index
      %c0_182 = arith.constant 0 : index
      %162 = vector.load %arg5[%c9_180, %c8_181, %c0_182] : memref<18x32x128xf32, #tpu.memory_space<vmem>>, vector<8x16x128xf32>
      tpu.vector_store %arg5[%c9_180, %c8_181, %c0_182], %158 {strides = array<i32>} : memref<18x32x128xf32, #tpu.memory_space<vmem>>, vector<8x16x128xf32>,
    } else {
    }
    %c0 = arith.constant 0 : index
    %c7 = arith.constant 7 : index
    %c0_1 = arith.constant 0 : index
    %3 = vector.load %arg5[%c0, %c7, %c0_1] : memref<18x32x128xf32, #tpu.memory_space<vmem>>, vector<8x16x128xf32>
    %4 = arith.truncf %3 : vector<8x16x128xf32> to vector<8x16x128xbf16>
    %c0_2 = arith.constant 0 : index
    %c8 = arith.constant 8 : index
    %c0_3 = arith.constant 0 : index
    %5 = vector.load %arg5[%c0_2, %c8, %c0_3] : memref<18x32x128xf32, #tpu.memory_space<vmem>>, vector<8x16x128xf32>
    %6 = arith.truncf %5 : vector<8x16x128xf32> to vector<8x16x128xbf16>
    %c0_4 = arith.constant 0 : index
    %c9 = arith.constant 9 : index
    %c0_5 = arith.constant 0 : index
    %7 = vector.load %arg5[%c0_4, %c9, %c0_5] : memref<18x32x128xf32, #tpu.memory_space<vmem>>, vector<8x16x128xf32>
    %8 = arith.truncf %7 : vector<8x16x128xf32> to vector<8x16x128xbf16>
    %9 = tpu.concatenate %4, %6, %8 in 2 : vector<8x16x128xbf16>, vector<8x16x128xbf16>, vector<8x16x128xbf16> -> vector<8x16x384xbf16>
    %10 = vector.shape_cast %9 : vector<8x16x384xbf16> to vector<128x384xbf16>
    %c0_6 = arith.constant 0 : index
    %c0_7 = arith.constant 0 : index
    %c0_8 = arith.constant 0 : index
    %c0_9 = arith.constant 0 : index
    %11 = vector.load %arg3[%c0_6, %c0_7, %c0_8, %c0_9] : memref<1x3x384x128xbf16, #tpu.memory_space<vmem>>, vector<1x1x384x128xbf16>
    %12 = vector.shape_cast %11 : vector<1x1x384x128xbf16> to vector<384x128xbf16>
    %cst = arith.constant dense<0.000000e+00> : vector<128x128xf32>
    %13 = tpu.matmul %10, %12, %cst {dimension_numbers = #tpu.dot_dimension_numbers<[1], [0], [0], [1], [0, 0, 1, 1], [], []>} : vector<128x384xbf16>, vector<384x128xbf16>, vector<128x128xf32> -> vector<128x128xf32>
    %c1 = arith.constant 1 : index
    %c7_10 = arith.constant 7 : index
    %c0_11 = arith.constant 0 : index
    %14 = vector.load %arg5[%c1, %c7_10, %c0_11] : memref<18x32x128xf32, #tpu.memory_space<vmem>>, vector<8x16x128xf32>
    %15 = arith.truncf %14 : vector<8x16x128xf32> to vector<8x16x128xbf16>
    %c1_12 = arith.constant 1 : index
    %c8_13 = arith.constant 8 : index
    %c0_14 = arith.constant 0 : index
    %16 = vector.load %arg5[%c1_12, %c8_13, %c0_14] : memref<18x32x128xf32, #tpu.memory_space<vmem>>, vector<8x16x128xf32>
    %17 = arith.truncf %16 : vector<8x16x128xf32> to vector<8x16x128xbf16>
    %c1_15 = arith.constant 1 : index
    %c9_16 = arith.constant 9 : index
    %c0_17 = arith.constant 0 : index
    %18 = vector.load %arg5[%c1_15, %c9_16, %c0_17] : memref<18x32x128xf32, #tpu.memory_space<vmem>>, vector<8x16x128xf32>
    %19 = arith.truncf %18 : vector<8x16x128xf32> to vector<8x16x128xbf16>
    %20 = tpu.concatenate %15, %17, %19 in 2 : vector<8x16x128xbf16>, vector<8x16x128xbf16>, vector<8x16x128xbf16> -> vector<8x16x384xbf16>
    %21 = vector.shape_cast %20 : vector<8x16x384xbf16> to vector<128x384xbf16>
    %c0_18 = arith.constant 0 : index
    %c1_19 = arith.constant 1 : index
    %c0_20 = arith.constant 0 : index
    %c0_21 = arith.constant 0 : index
    %22 = vector.load %arg3[%c0_18, %c1_19, %c0_20, %c0_21] : memref<1x3x384x128xbf16, #tpu.memory_space<vmem>>, vector<1x1x384x128xbf16>
    %23 = vector.shape_cast %22 : vector<1x1x384x128xbf16> to vector<384x128xbf16>
    %cst_22 = arith.constant dense<0.000000e+00> : vector<128x128xf32>
    %24 = tpu.matmul %21, %23, %cst_22 {dimension_numbers = #tpu.dot_dimension_numbers<[1], [0], [0], [1], [0, 0, 1, 1], [], []>} : vector<128x384xbf16>, vector<384x128xbf16>, vector<128x128xf32> -> vector<128x128xf32>
    %25 = arith.addf %13, %24 : vector<128x128xf32>
    %c2 = arith.constant 2 : index
    %c7_23 = arith.constant 7 : index
    %c0_24 = arith.constant 0 : index
    %26 = vector.load %arg5[%c2, %c7_23, %c0_24] : memref<18x32x128xf32, #tpu.memory_space<vmem>>, vector<8x16x128xf32>
    %27 = arith.truncf %26 : vector<8x16x128xf32> to vector<8x16x128xbf16>
    %c2_25 = arith.constant 2 : index
    %c8_26 = arith.constant 8 : index
    %c0_27 = arith.constant 0 : index
    %28 = vector.load %arg5[%c2_25, %c8_26, %c0_27] : memref<18x32x128xf32, #tpu.memory_space<vmem>>, vector<8x16x128xf32>
    %29 = arith.truncf %28 : vector<8x16x128xf32> to vector<8x16x128xbf16>
    %c2_28 = arith.constant 2 : index
    %c9_29 = arith.constant 9 : index
    %c0_30 = arith.constant 0 : index
    %30 = vector.load %arg5[%c2_28, %c9_29, %c0_30] : memref<18x32x128xf32, #tpu.memory_space<vmem>>, vector<8x16x128xf32>
    %31 = arith.truncf %30 : vector<8x16x128xf32> to vector<8x16x128xbf16>
    %32 = tpu.concatenate %27, %29, %31 in 2 : vector<8x16x128xbf16>, vector<8x16x128xbf16>, vector<8x16x128xbf16> -> vector<8x16x384xbf16>
    %33 = vector.shape_cast %32 : vector<8x16x384xbf16> to vector<128x384xbf16>
    %c0_31 = arith.constant 0 : index
    %c2_32 = arith.constant 2 : index
    %c0_33 = arith.constant 0 : index
    %c0_34 = arith.constant 0 : index
    %34 = vector.load %arg3[%c0_31, %c2_32, %c0_33, %c0_34] : memref<1x3x384x128xbf16, #tpu.memory_space<vmem>>, vector<1x1x384x128xbf16>
    %35 = vector.shape_cast %34 : vector<1x1x384x128xbf16> to vector<384x128xbf16>
    %cst_35 = arith.constant dense<0.000000e+00> : vector<128x128xf32>
    %36 = tpu.matmul %33, %35, %cst_35 {dimension_numbers = #tpu.dot_dimension_numbers<[1], [0], [0], [1], [0, 0, 1, 1], [], []>} : vector<128x384xbf16>, vector<384x128xbf16>, vector<128x128xf32> -> vector<128x128xf32>
    %37 = arith.addf %25, %36 : vector<128x128xf32>
    %38 = vector.shape_cast %37 : vector<128x128xf32> to vector<8x16x128xf32>
    %c2_36 = arith.constant 2 : index
    %c8_37 = arith.constant 8 : index
    %c0_38 = arith.constant 0 : index
    %39 = vector.load %arg6[%c2_36, %c8_37, %c0_38] : memref<20x32x128xf32, #tpu.memory_space<vmem>>, vector<8x16x128xf32>
    tpu.vector_store %arg6[%c2_36, %c8_37, %c0_38], %38 {strides = array<i32>} : memref<20x32x128xf32, #tpu.memory_space<vmem>>, vector<8x16x128xf32>,
    %c8_39 = arith.constant 8 : index
    %c7_40 = arith.constant 7 : index
    %c0_41 = arith.constant 0 : index
    %40 = vector.load %arg5[%c8_39, %c7_40, %c0_41] : memref<18x32x128xf32, #tpu.memory_space<vmem>>, vector<8x16x128xf32>
    %41 = arith.truncf %40 : vector<8x16x128xf32> to vector<8x16x128xbf16>
    %c8_42 = arith.constant 8 : index
    %c8_43 = arith.constant 8 : index
    %c0_44 = arith.constant 0 : index
    %42 = vector.load %arg5[%c8_42, %c8_43, %c0_44] : memref<18x32x128xf32, #tpu.memory_space<vmem>>, vector<8x16x128xf32>
    %43 = arith.truncf %42 : vector<8x16x128xf32> to vector<8x16x128xbf16>
    %c8_45 = arith.constant 8 : index
    %c9_46 = arith.constant 9 : index
    %c0_47 = arith.constant 0 : index
    %44 = vector.load %arg5[%c8_45, %c9_46, %c0_47] : memref<18x32x128xf32, #tpu.memory_space<vmem>>, vector<8x16x128xf32>
    %45 = arith.truncf %44 : vector<8x16x128xf32> to vector<8x16x128xbf16>
    %46 = tpu.concatenate %41, %43, %45 in 2 : vector<8x16x128xbf16>, vector<8x16x128xbf16>, vector<8x16x128xbf16> -> vector<8x16x384xbf16>
    %47 = vector.shape_cast %46 : vector<8x16x384xbf16> to vector<128x384xbf16>
    %c0_48 = arith.constant 0 : index
    %c0_49 = arith.constant 0 : index
    %c0_50 = arith.constant 0 : index
    %c0_51 = arith.constant 0 : index
    %48 = vector.load %arg3[%c0_48, %c0_49, %c0_50, %c0_51] : memref<1x3x384x128xbf16, #tpu.memory_space<vmem>>, vector<1x1x384x128xbf16>
    %49 = vector.shape_cast %48 : vector<1x1x384x128xbf16> to vector<384x128xbf16>
    %cst_52 = arith.constant dense<0.000000e+00> : vector<128x128xf32>
    %50 = tpu.matmul %47, %49, %cst_52 {dimension_numbers = #tpu.dot_dimension_numbers<[1], [0], [0], [1], [0, 0, 1, 1], [], []>} : vector<128x384xbf16>, vector<384x128xbf16>, vector<128x128xf32> -> vector<128x128xf32>
    %c9_53 = arith.constant 9 : index
    %c7_54 = arith.constant 7 : index
    %c0_55 = arith.constant 0 : index
    %51 = vector.load %arg5[%c9_53, %c7_54, %c0_55] : memref<18x32x128xf32, #tpu.memory_space<vmem>>, vector<8x16x128xf32>
    %52 = arith.truncf %51 : vector<8x16x128xf32> to vector<8x16x128xbf16>
    %c9_56 = arith.constant 9 : index
    %c8_57 = arith.constant 8 : index
    %c0_58 = arith.constant 0 : index
    %53 = vector.load %arg5[%c9_56, %c8_57, %c0_58] : memref<18x32x128xf32, #tpu.memory_space<vmem>>, vector<8x16x128xf32>
    %54 = arith.truncf %53 : vector<8x16x128xf32> to vector<8x16x128xbf16>
    %c9_59 = arith.constant 9 : index
    %c9_60 = arith.constant 9 : index
    %c0_61 = arith.constant 0 : index
    %55 = vector.load %arg5[%c9_59, %c9_60, %c0_61] : memref<18x32x128xf32, #tpu.memory_space<vmem>>, vector<8x16x128xf32>
    %56 = arith.truncf %55 : vector<8x16x128xf32> to vector<8x16x128xbf16>
    %57 = tpu.concatenate %52, %54, %56 in 2 : vector<8x16x128xbf16>, vector<8x16x128xbf16>, vector<8x16x128xbf16> -> vector<8x16x384xbf16>
    %58 = vector.shape_cast %57 : vector<8x16x384xbf16> to vector<128x384xbf16>
    %c0_62 = arith.constant 0 : index
    %c1_63 = arith.constant 1 : index
    %c0_64 = arith.constant 0 : index
    %c0_65 = arith.constant 0 : index
    %59 = vector.load %arg3[%c0_62, %c1_63, %c0_64, %c0_65] : memref<1x3x384x128xbf16, #tpu.memory_space<vmem>>, vector<1x1x384x128xbf16>
    %60 = vector.shape_cast %59 : vector<1x1x384x128xbf16> to vector<384x128xbf16>
    %cst_66 = arith.constant dense<0.000000e+00> : vector<128x128xf32>
    %61 = tpu.matmul %58, %60, %cst_66 {dimension_numbers = #tpu.dot_dimension_numbers<[1], [0], [0], [1], [0, 0, 1, 1], [], []>} : vector<128x384xbf16>, vector<384x128xbf16>, vector<128x128xf32> -> vector<128x128xf32>
    %62 = arith.addf %50, %61 : vector<128x128xf32>
    %c10 = arith.constant 10 : index
    %c7_67 = arith.constant 7 : index
    %c0_68 = arith.constant 0 : index
    %63 = vector.load %arg5[%c10, %c7_67, %c0_68] : memref<18x32x128xf32, #tpu.memory_space<vmem>>, vector<8x16x128xf32>
    %64 = arith.truncf %63 : vector<8x16x128xf32> to vector<8x16x128xbf16>
    %c10_69 = arith.constant 10 : index
    %c8_70 = arith.constant 8 : index
    %c0_71 = arith.constant 0 : index
    %65 = vector.load %arg5[%c10_69, %c8_70, %c0_71] : memref<18x32x128xf32, #tpu.memory_space<vmem>>, vector<8x16x128xf32>
    %66 = arith.truncf %65 : vector<8x16x128xf32> to vector<8x16x128xbf16>
    %c10_72 = arith.constant 10 : index
    %c9_73 = arith.constant 9 : index
    %c0_74 = arith.constant 0 : index
    %67 = vector.load %arg5[%c10_72, %c9_73, %c0_74] : memref<18x32x128xf32, #tpu.memory_space<vmem>>, vector<8x16x128xf32>
    %68 = arith.truncf %67 : vector<8x16x128xf32> to vector<8x16x128xbf16>
    %69 = tpu.concatenate %64, %66, %68 in 2 : vector<8x16x128xbf16>, vector<8x16x128xbf16>, vector<8x16x128xbf16> -> vector<8x16x384xbf16>
    %70 = vector.shape_cast %69 : vector<8x16x384xbf16> to vector<128x384xbf16>
    %c0_75 = arith.constant 0 : index
    %c2_76 = arith.constant 2 : index
    %c0_77 = arith.constant 0 : index
    %c0_78 = arith.constant 0 : index
    %71 = vector.load %arg3[%c0_75, %c2_76, %c0_77, %c0_78] : memref<1x3x384x128xbf16, #tpu.memory_space<vmem>>, vector<1x1x384x128xbf16>
    %72 = vector.shape_cast %71 : vector<1x1x384x128xbf16> to vector<384x128xbf16>
    %cst_79 = arith.constant dense<0.000000e+00> : vector<128x128xf32>
    %73 = tpu.matmul %70, %72, %cst_79 {dimension_numbers = #tpu.dot_dimension_numbers<[1], [0], [0], [1], [0, 0, 1, 1], [], []>} : vector<128x384xbf16>, vector<384x128xbf16>, vector<128x128xf32> -> vector<128x128xf32>
    %74 = arith.addf %62, %73 : vector<128x128xf32>
    %75 = vector.shape_cast %74 : vector<128x128xf32> to vector<8x16x128xf32>
    %c10_80 = arith.constant 10 : index
    %c8_81 = arith.constant 8 : index
    %c0_82 = arith.constant 0 : index
    %76 = vector.load %arg6[%c10_80, %c8_81, %c0_82] : memref<20x32x128xf32, #tpu.memory_space<vmem>>, vector<8x16x128xf32>
    tpu.vector_store %arg6[%c10_80, %c8_81, %c0_82], %75 {strides = array<i32>} : memref<20x32x128xf32, #tpu.memory_space<vmem>>, vector<8x16x128xf32>,
    %c1_i32 = arith.constant 1 : i32
    %77 = arith.addi %arg1, %c1_i32 : i32
    %c4_i32 = arith.constant 4 : i32
    %78 = arith.cmpi slt, %77, %c4_i32 : i32
    %c0_83 = arith.constant 0 : index
    %c6 = arith.constant 6 : index
    %c0_84 = arith.constant 0 : index
    %79 = vector.load %arg6[%c0_83, %c6, %c0_84] : memref<20x32x128xf32, #tpu.memory_space<vmem>>, vector<12x16x128xf32>
    %c0_85 = arith.constant 0 : index
    %c7_86 = arith.constant 7 : index
    %c0_87 = arith.constant 0 : index
    %80 = vector.load %arg6[%c0_85, %c7_86, %c0_87] : memref<20x32x128xf32, #tpu.memory_space<vmem>>, vector<12x16x128xf32>
    %81 = arith.maximumf %79, %80 : vector<12x16x128xf32>
    %c0_88 = arith.constant 0 : index
    %c8_89 = arith.constant 8 : index
    %c0_90 = arith.constant 0 : index
    %82 = vector.load %arg6[%c0_88, %c8_89, %c0_90] : memref<20x32x128xf32, #tpu.memory_space<vmem>>, vector<12x16x128xf32>
    %83 = arith.maximumf %81, %82 : vector<12x16x128xf32>
    %c0_91 = arith.constant 0 : index
    %c9_92 = arith.constant 9 : index
    %c0_93 = arith.constant 0 : index
    %84 = vector.load %arg6[%c0_91, %c9_92, %c0_93] : memref<20x32x128xf32, #tpu.memory_space<vmem>>, vector<12x16x128xf32>
    %85 = arith.maximumf %83, %84 : vector<12x16x128xf32>
    %c0_94 = arith.constant 0 : index
    %c10_95 = arith.constant 10 : index
    %c0_96 = arith.constant 0 : index
    %86 = vector.load %arg6[%c0_94, %c10_95, %c0_96] : memref<20x32x128xf32, #tpu.memory_space<vmem>>, vector<12x16x128xf32>
    %87 = arith.maximumf %85, %86 : vector<12x16x128xf32>
    %88 = vector.extract_strided_slice %87 {offsets = [0, 0, 0], sizes = [8, 16, 128], strides = [1, 1, 1]} : vector<12x16x128xf32> to vector<8x16x128xf32>
    %89 = vector.extract_strided_slice %87 {offsets = [1, 0, 0], sizes = [8, 16, 128], strides = [1, 1, 1]} : vector<12x16x128xf32> to vector<8x16x128xf32>
    %90 = arith.maximumf %88, %89 : vector<8x16x128xf32>
    %91 = vector.extract_strided_slice %87 {offsets = [2, 0, 0], sizes = [8, 16, 128], strides = [1, 1, 1]} : vector<12x16x128xf32> to vector<8x16x128xf32>
    %92 = arith.maximumf %90, %91 : vector<8x16x128xf32>
    %93 = vector.extract_strided_slice %87 {offsets = [3, 0, 0], sizes = [8, 16, 128], strides = [1, 1, 1]} : vector<12x16x128xf32> to vector<8x16x128xf32>
    %94 = arith.maximumf %92, %93 : vector<8x16x128xf32>
    %95 = vector.extract_strided_slice %87 {offsets = [4, 0, 0], sizes = [8, 16, 128], strides = [1, 1, 1]} : vector<12x16x128xf32> to vector<8x16x128xf32>
    %96 = arith.maximumf %94, %95 : vector<8x16x128xf32>
    %c0_97 = arith.constant 0 : index
    %c0_98 = arith.constant 0 : index
    %c0_99 = arith.constant 0 : index
    %c0_100 = arith.constant 0 : index
    %97 = vector.load %arg4[%c0_97, %c0_98, %c0_99, %c0_100] : memref<1x16x16x128xf32, #tpu.memory_space<vmem>>, vector<1x8x16x128xf32>
    %98 = vector.shape_cast %97 : vector<1x8x16x128xf32> to vector<8x16x128xf32>
    %99 = arith.addf %98, %96 : vector<8x16x128xf32>
    %c0_101 = arith.constant 0 : index
    %c0_102 = arith.constant 0 : index
    %c0_103 = arith.constant 0 : index
    %c0_104 = arith.constant 0 : index
    %100 = vector.load %arg4[%c0_101, %c0_102, %c0_103, %c0_104] : memref<1x16x16x128xf32, #tpu.memory_space<vmem>>, vector<1x8x16x128xf32>
    %101 = vector.shape_cast %100 : vector<1x8x16x128xf32> to vector<8x16x128xf32>
    %102 = vector.shape_cast %99 : vector<8x16x128xf32> to vector<1x8x16x128xf32>
    tpu.vector_store %arg4[%c0_101, %c0_102, %c0_103, %c0_104], %102 {strides = array<i32>} : memref<1x16x16x128xf32, #tpu.memory_space<vmem>>, vector<1x8x16x128xf32>,
    %103 = arith.extui %78 : i1 to i32
    %c0_i32_105 = arith.constant 0 : i32
    %104 = arith.cmpi ne, %103, %c0_i32_105 : i32
    scf.if %104 {
      %c1_130 = arith.constant 1 : index
      %c8_131 = arith.constant 8 : index
      %c0_132 = arith.constant 0 : index
      %131 = vector.load %arg5[%c1_130, %c8_131, %c0_132] : memref<18x32x128xf32, #tpu.memory_space<vmem>>, vector<8x16x128xf32>
      tpu.vector_store %arg5[%c1_130, %c8_131, %c0_132], %96 {strides = array<i32>} : memref<18x32x128xf32, #tpu.memory_space<vmem>>, vector<8x16x128xf32>,
    } else {
    }
    %c8_106 = arith.constant 8 : index
    %c6_107 = arith.constant 6 : index
    %c0_108 = arith.constant 0 : index
    %105 = vector.load %arg6[%c8_106, %c6_107, %c0_108] : memref<20x32x128xf32, #tpu.memory_space<vmem>>, vector<12x16x128xf32>
    %c8_109 = arith.constant 8 : index
    %c7_110 = arith.constant 7 : index
    %c0_111 = arith.constant 0 : index
    %106 = vector.load %arg6[%c8_109, %c7_110, %c0_111] : memref<20x32x128xf32, #tpu.memory_space<vmem>>, vector<12x16x128xf32>
    %107 = arith.maximumf %105, %106 : vector<12x16x128xf32>
    %c8_112 = arith.constant 8 : index
    %c8_113 = arith.constant 8 : index
    %c0_114 = arith.constant 0 : index
    %108 = vector.load %arg6[%c8_112, %c8_113, %c0_114] : memref<20x32x128xf32, #tpu.memory_space<vmem>>, vector<12x16x128xf32>
    %109 = arith.maximumf %107, %108 : vector<12x16x128xf32>
    %c8_115 = arith.constant 8 : index
    %c9_116 = arith.constant 9 : index
    %c0_117 = arith.constant 0 : index
    %110 = vector.load %arg6[%c8_115, %c9_116, %c0_117] : memref<20x32x128xf32, #tpu.memory_space<vmem>>, vector<12x16x128xf32>
    %111 = arith.maximumf %109, %110 : vector<12x16x128xf32>
    %c8_118 = arith.constant 8 : index
    %c10_119 = arith.constant 10 : index
    %c0_120 = arith.constant 0 : index
    %112 = vector.load %arg6[%c8_118, %c10_119, %c0_120] : memref<20x32x128xf32, #tpu.memory_space<vmem>>, vector<12x16x128xf32>
    %113 = arith.maximumf %111, %112 : vector<12x16x128xf32>
    %114 = vector.extract_strided_slice %113 {offsets = [0, 0, 0], sizes = [8, 16, 128], strides = [1, 1, 1]} : vector<12x16x128xf32> to vector<8x16x128xf32>
    %115 = vector.extract_strided_slice %113 {offsets = [1, 0, 0], sizes = [8, 16, 128], strides = [1, 1, 1]} : vector<12x16x128xf32> to vector<8x16x128xf32>
    %116 = arith.maximumf %114, %115 : vector<8x16x128xf32>
    %117 = vector.extract_strided_slice %113 {offsets = [2, 0, 0], sizes = [8, 16, 128], strides = [1, 1, 1]} : vector<12x16x128xf32> to vector<8x16x128xf32>
    %118 = arith.maximumf %116, %117 : vector<8x16x128xf32>
    %119 = vector.extract_strided_slice %113 {offsets = [3, 0, 0], sizes = [8, 16, 128], strides = [1, 1, 1]} : vector<12x16x128xf32> to vector<8x16x128xf32>
    %120 = arith.maximumf %118, %119 : vector<8x16x128xf32>
    %121 = vector.extract_strided_slice %113 {offsets = [4, 0, 0], sizes = [8, 16, 128], strides = [1, 1, 1]} : vector<12x16x128xf32> to vector<8x16x128xf32>
    %122 = arith.maximumf %120, %121 : vector<8x16x128xf32>
    %c0_121 = arith.constant 0 : index
    %c8_122 = arith.constant 8 : index
    %c0_123 = arith.constant 0 : index
    %c0_124 = arith.constant 0 : index
    %123 = vector.load %arg4[%c0_121, %c8_122, %c0_123, %c0_124] : memref<1x16x16x128xf32, #tpu.memory_space<vmem>>, vector<1x8x16x128xf32>
    %124 = vector.shape_cast %123 : vector<1x8x16x128xf32> to vector<8x16x128xf32>
    %125 = arith.addf %124, %122 : vector<8x16x128xf32>
    %c0_125 = arith.constant 0 : index
    %c8_126 = arith.constant 8 : index
    %c0_127 = arith.constant 0 : index
    %c0_128 = arith.constant 0 : index
    %126 = vector.load %arg4[%c0_125, %c8_126, %c0_127, %c0_128] : memref<1x16x16x128xf32, #tpu.memory_space<vmem>>, vector<1x8x16x128xf32>
    %127 = vector.shape_cast %126 : vector<1x8x16x128xf32> to vector<8x16x128xf32>
    %128 = vector.shape_cast %125 : vector<8x16x128xf32> to vector<1x8x16x128xf32>
    tpu.vector_store %arg4[%c0_125, %c8_126, %c0_127, %c0_128], %128 {strides = array<i32>} : memref<1x16x16x128xf32, #tpu.memory_space<vmem>>, vector<1x8x16x128xf32>,
    %129 = arith.extui %78 : i1 to i32
    %c0_i32_129 = arith.constant 0 : i32
    %130 = arith.cmpi ne, %129, %c0_i32_129 : i32
    scf.if %130 {
      %c9_130 = arith.constant 9 : index
      %c8_131 = arith.constant 8 : index
      %c0_132 = arith.constant 0 : index
      %131 = vector.load %arg5[%c9_130, %c8_131, %c0_132] : memref<18x32x128xf32, #tpu.memory_space<vmem>>, vector<8x16x128xf32>
      tpu.vector_store %arg5[%c9_130, %c8_131, %c0_132], %122 {strides = array<i32>} : memref<18x32x128xf32, #tpu.memory_space<vmem>>, vector<8x16x128xf32>,
    } else {
    }
    return
  }
  func.func @transform_0(%arg0: i32, %arg1: i32) -> (i32, i32, i32, i32) {
    %c0_i32 = arith.constant 0 : i32
    %c0_i32_0 = arith.constant 0 : i32
    %c0_i32_1 = arith.constant 0 : i32
    %c0_i32_2 = arith.constant 0 : i32
    return %arg0, %c0_i32, %c0_i32_0, %c0_i32_1 : i32, i32, i32, i32
  }
  func.func @transform_1(%arg0: i32, %arg1: i32) -> (i32, i32, i32, i32) {
    %c0_i32 = arith.constant 0 : i32
    %c0_i32_0 = arith.constant 0 : i32
    %c0_i32_1 = arith.constant 0 : i32
    %c0_i32_2 = arith.constant 0 : i32
    return %arg1, %c0_i32, %c0_i32_0, %c0_i32_1 : i32, i32, i32, i32
  }
  func.func @transform_2(%arg0: i32, %arg1: i32) -> (i32, i32, i32, i32) {
    %c0_i32 = arith.constant 0 : i32
    %c0_i32_0 = arith.constant 0 : i32
    %c0_i32_1 = arith.constant 0 : i32
    %c0_i32_2 = arith.constant 0 : i32
    return %arg0, %c0_i32, %c0_i32_0, %c0_i32_1 : i32, i32, i32, i32
  }
}

</mosaic_0001>

<bundles_post_ra>
// kernel: tpu_custom_call.1
= control target key start
LH: loop header
LB: loop body
LE: loop exit
PB: predicated region body
PF: predicated region fallthrough
CT: control target
= control target key end

     0   :  { %s7129_s0 = inlined_call_operand.hbm [shape: f32[2,16,16,128], index: 0, kind: input, shape index: {}]   ;;  %s7130_s1 = inlined_call_operand.hbm [shape: bf16[4,3,384,128], index: 1, kind: input, shape index: {}]   ;;  %s7131_s2 = inlined_call_operand.hbm [shape: f32[2,16,16,128], index: 2, kind: output, shape index: {}]  }
   0x1   :  { %7142 = sst [smem:[#allocation22_spill]] %s7129_s0 }
   0x2   :  { %7 = vsyncpa [#allocation5], 0 }
   0x3   :  { %9 = vsyncpa [#allocation5 + $0x1], 0 }
   0x4   :  { %10 = vsyncpa [#allocation8], 0 }
   0x5   :  { %12 = vsyncpa [#allocation8 + $0x1], 0 }
   0x6   :  { %13 = vsyncpa [#allocation6], 0 }
   0x7   :  { %15 = vsyncpa [#allocation6 + $0x1], 0  ;;  %s5644_s9 = smov 0   ;;  %s5646_s10 = smov 0  }
   0x8   :  { %s5648_s11 = smov 0   ;;  %s5650_s12 = smov 0  }
   0x9   :  { %s5652_s13 = smov 0   ;;  %s5654_s14 = smov 0  }
   0xa   :  { %s5656_s15 = smov 0   ;;  %s5658_s16 = smov 0  }
   0xb   :  { %s5660_s17 = smov 0   ;;  %s5662_s18 = smov 0  }
   0xc   :  { %s5664_s19 = smov 0  }
   0xd LB: > { %7143 = sst [smem:[#allocation13_spill]] %s5608_s17  ;;  %s4081_s20 = sadd.s32 4294967295, %s5616_s19   ;;  %s5616_s19 = sphi %s5664_s19, %s21_s19   ;;  %s5612_s18 = sphi %s5662_s18, %s7178_s18   ;;  %s5608_s17 = sphi %s5660_s17, %s7177_s17   ;;  %s5604_s16 = sphi %s5658_s16, %s7176_s16   ;;  %s5600_s15 = sphi %s5656_s15, %s7175_s15   ;;  %s5596_s14 = sphi %s5654_s14, %s7184_s14   ;;  %s5592_s13 = sphi %s5652_s13, %s7183_s13   ;;  %s5588_s12 = sphi %s5650_s12, %s7182_s12   ;;  %s5584_s11 = sphi %s5648_s11, %s7181_s11   ;;  %s5580_s10 = sphi %s5646_s10, %s7180_s10   ;;  %s5576_s9 = sphi %s5644_s9, %s7179_s9  }
   0xe   : > { %7144 = sst [smem:[#allocation14_spill]] %s5612_s18  ;;  %s4082_s21 = sadd.s32 4294967294, %s5616_s19  }
   0xf   : > { %p47_p0 = scmp.ne.s32.totalorder %s5596_s14, %s5592_s13  ;;  %p7132_p1 = scmp.eq.s32.totalorder %s5616_s19, 0 }
  0x10   : > { %p53_p2 = scmp.ne.s32.totalorder %s5592_s13, %s5588_s12  ;;  %p5708_p3 = scmp.eq.s32.totalorder %s4081_s20, 0 }
  0x11   : > { %p5714_p4 = por %p7132_p1, %p47_p0  ;;  %p103_p5 = scmp.eq.s32.totalorder %s4081_s20, 7 }
  0x12   : > { %p5720_p6 = por %p5708_p3, %p53_p2  ;;  %p109_p7 = scmp.eq.s32.totalorder %s4082_s21, 7 }
  0x13   : > { %p5724_p8 = por %p103_p5, %p47_p0  ;;  %p7133_p10 = scmp.lt.s32.totalorder %s5616_s19, 8 }
  0x14   : > { %p5728_p9 = por %p109_p7, %p53_p2  ;;  %s129_s29 = sand.u32 1, %s5596_s14  }
  0x15   : > { %s4500_s30 = sshll.u32 %s5612_s18, 12  ;;  %s4085_s3 = sshll.u32 %s129_s29, 8 }
  0x16   : > { %s7149_s28 = scalar_select %p5728_p9, 1, 0 }
  0x17   : > { %s7150_s0 = sld [smem:[#allocation22_spill]]  ;;  %s133_s7 = scalar_lea.vmem [#allocation4], %s4085_s3 }
  0x18   : > { %s140_s8 = sshll.u32 %s133_s7, 4  ;;  %p5742_p11 = pnand %p7133_p10, %p5714_p4  ;;  %s141_s8 = int_to_ptr.vmem [resolvable:$true] %s140_s8 }
  0x19   : > { %s130_s21 = scalar_lea.sflag [#allocation5], %s129_s29  ;;  %s5449_s23 = scalar_lea.vmem %s141_s8, 4096 }
  0x1a   : > { %p5438_p12 = pneg %p5742_p11  ;;  %p5450_p13 = scmp.ne.s32.totalorder %s141_s8, %s5449_s23 }
  0x1b   : > { %s5618_s22 = smov [#allocation4]  }
  0x1c   : > { %p5452_p0 = pnand %p5450_p13, %p5438_p12  ;;  %s5454_s4 = sshll.u32 %s5618_s22, 4  ;;  %s5455_s4 = int_to_ptr.vmem [resolvable:$false] %s5454_s4 }
  0x1d   : > { %s139_s6 = scalar_lea.hbm %s7150_s0, %s4500_s30  ;;  %s5456_s30 = scalar_lea.vmem %s5455_s4, 8192 }
  0x1e   : > { %p5453_p2 = pneg %p5452_p0  ;;  %p5457_p5 = scmp.lt.s32.totalorder %s141_s8, %s5455_s4 }
  0x1f   : > { %p5458_p7 = scmp.lt.s32.totalorder %s5456_s30, %s5449_s23 }
  0x21   : > { %p5459_p1 = por %p5458_p7, %p5457_p5 }
  0x23   : > { %p5460_p4 = pnand %p5459_p1, %p5453_p2 }
  0x25   : > { %5463 = shalt.err (!%p5460_p4)
}
  0x26   : > { %s5619_s25 = smov 128   ;;  %s5620_s22 = smov 8  }
  0x27   : > { %5186 = dma.hbm_to_vmem [thread:$0]  (!%p5742_p11), %s139_s6, 4096, %s141_s8, %s130_s21, %s5619_s25, %s5619_s25, %s5620_s22  }
  0x28   : > { %p4089_p1 = scmp.ge.s32.totalorder %s5616_s19, 1  ;;  %p169_p12 = scmp.lt.s32.totalorder %s5616_s19, 9 }
  0x29   : > { %s30_s29 = sadd.s32 1, %s5608_s17  ;;  %s66_s3 = sadd.s32 1, %s5584_s11 }
  0x2a   : > { %p5752_p13 = pnand %p4089_p1, %p169_p12  ;;  %p31_p0 = scmp.ge.s32.totalorder %s30_s29, 4 }
  0x2b   : > { %p73_p2 = scmp.ne.s32.totalorder %s5584_s11, %s5580_s10  ;;  %p79_p5 = scmp.ne.s32.totalorder %s5580_s10, %s5576_s9 }
  0x2c   : > { %s7186_s29 = smov (%p31_p0, %s30_s29), 0  ;;  %s7154_s5 = sadd.s32 1, %s5612_s18 }
  0x2d   : > { %7153 = sst [smem:[#allocation15_spill]] %s7186_s29  ;;  %s7188_s5 = smov (!%p31_p0, %s7154_s5), %s5612_s18 }
  0x2e   : > { %s63_s6 = ssub.s32 %s5608_s17, %s7186_s29  ;;  %p7155_p11 = scmp.eq.s32.totalorder %s5616_s19, 0 }
  0x2f   : > { %p35_p4 = scmp.ge.s32.totalorder %s7188_s5, 2  ;;  %p64_p1 = scmp.eq.s32.totalorder %s63_s6, 0 }
  0x30   : > { %p75_p7 = por %p73_p2, %p7155_p11  ;;  %p5773_p12 = por %p79_p5, %p5708_p3 }
  0x31   : > { %s150_s8 = sand.u32 1, %s5584_s11   ;;  %s7190_s5 = smov (%p35_p4, %s7188_s5), 0 }
  0x32   : > { %7157 = sst [smem:[#allocation16_spill]] %s7190_s5  ;;  %s37_s20 = ssub.s32 %s5612_s18, %s7190_s5 }
  0x33   : > { %s5781_s9 = scalar_select %p64_p1, %s5584_s11, %s66_s3  }
  0x34   : > { %p38_p10 = scmp.eq.s32.totalorder %s37_s20, 0  ;;  %s5174_s21 = smul.u32 576, %s150_s8 }
  0x35   : > { %7158 = sst [smem:[#allocation17_spill]] %s5781_s9  ;;  %s5175_s4 = smul.u32 9216, %s5608_s17 }
  0x36   : > { %p7159_p0 = scmp.lt.s32.totalorder %s5616_s19, 8  ;;  %s7161_s24 = sadd.s32 1, %s5596_s14 }
  0x37   : > { %s5795_s25 = scalar_select %p38_p10, %s5596_s14, %s7161_s24  }
  0x38   : > { %p5788_p9 = pnand %p7159_p0, %p75_p7  ;;  %s160_s0 = scalar_lea.hbm %s7130_s1, %s5175_s4 }
  0x39   : > { %s154_s29 = scalar_lea.vmem [#allocation7], %s5174_s21  ;;  %s151_s5 = scalar_lea.sflag [#allocation8], %s150_s8 }
  0x3a   : > { %s161_s3 = sshll.u32 %s154_s29, 4  ;;  %p5466_p3 = pneg %p5788_p9  ;;  %s162_s3 = int_to_ptr.vmem [resolvable:$true] %s161_s3 }
  0x3b   : > { %s5477_s20 = scalar_lea.vmem %s162_s3, 9216  ;;  %s5621_s18 = smov [#allocation7]  }
  0x3c   : > { %p5478_p2 = scmp.ne.s32.totalorder %s162_s3, %s5477_s20  ;;  %s5482_s17 = sshll.u32 %s5621_s18, 4  ;;  %s5483_s17 = int_to_ptr.vmem [resolvable:$false] %s5482_s17 }
  0x3d   : > { %s5484_s9 = scalar_lea.vmem %s5483_s17, 18432  ;;  %p5485_p10 = scmp.lt.s32.totalorder %s162_s3, %s5483_s17 }
  0x3e   : > { %p5480_p5 = pnand %p5478_p2, %p5466_p3  ;;  %p5486_p7 = scmp.lt.s32.totalorder %s5484_s9, %s5477_s20 }
  0x40   : > { %p5481_p11 = pneg %p5480_p5  ;;  %p5487_p4 = por %p5486_p7, %p5485_p10 }
  0x42   : > { %p5488_p1 = pnand %p5487_p4, %p5481_p11 }
  0x44   : > { %5491 = shalt.err (!%p5488_p1)
}
  0x45   : > { %s5622_s4 = smov 64   ;;  %s5623_s29 = smov 4  }
  0x46   : > { %5189 = dma.hbm_to_vmem [thread:$0]  (!%p5788_p9), %s160_s0, 9216, %s162_s3, %s151_s5, %s5622_s4, %s5622_s4, %s5623_s29  }
  0x47   : > { %173 = sbr.rel (%p5752_p13) target bundleno = 806 (0x326), region = 28 }
  0x4c   : > { %s5807_s8 = sand.u32 1, %s5592_s13  }
  0x4d   : > { %s4090_s18 = sshll.u32 %s5807_s8, 8  ;;  %s176_s17 = scalar_lea.sflag [#allocation5], %s5807_s8 }
  0x4e   : > { %s5811_s9 = scalar_lea.vmem [#allocation4], %s4090_s18 }
  0x4f   : > { %5563 = dma.done.wait (%p5720_p6), %s176_s17, 4096  }
  0x50   : > { %5565 = vsyncadd (%p5720_p6), %s176_s17, 4294963200  ;;  %s184_s0 = sand.u32 1, %s5580_s10  }
  0x51   : > { %s5176_s23 = smul.u32 576, %s184_s0  ;;  %s185_s5 = scalar_lea.sflag [#allocation8], %s184_s0 }
  0x53   : > { %s5818_s21 = scalar_lea.vmem [#allocation7], %s5176_s23 }
  0x54   : > { %5567 = dma.done.wait (%p5773_p12), %s185_s5, 9216  }
  0x55   : > { %5569 = vsyncadd (%p5773_p12), %s185_s5, 4294958080  ;;  %s5824_s30 = scalar_lea.vmem [#allocation9], %s4090_s18  ;;  %p4092_p9 = scmp.ne.s32.totalorder %s5600_s15, 0 }
  0x57   : > { %218 = sbr.rel (%p4092_p9) target bundleno = 169 (0xa9), region = 40 }
  0x5c   : > { %v5828_v0 = vld [vmem:[%s5811_s9] sm:$0xff]  ;;  %v5831_v1 = vld [vmem:[%s5811_s9 + $0x8] sm:$0xff]  ;;  %v5834_v2 = vld [vmem:[%s5811_s9 + $0x10] sm:$0xff]  ;;  %v5624_v3 = vmov 0.0   ;;  %v5625_v4 = vmov -inf  }
  0x5d   : > { %219 = vst [vmem:[#allocation2] sm:$0xff] %v5624_v3  ;;  %220 = vst [vmem:[#allocation2 + $0x20] sm:$0xff] %v5624_v3  ;;  %v325_v5 = vmax.f32 %v5828_v0, 0.0  ;;  %v326_v6 = vmax.f32 %v5831_v1, 0.0  ;;  %v327_v7 = vmax.f32 %v5834_v2, 0.0  ;;  %v312_v8 = vld [vmem:[%s5811_s9 + $0x18] sm:$0xff] }
  0x5e   : > { %221 = vst [vmem:[#allocation2 + $0x40] sm:$0xff] %v5624_v3  ;;  %222 = vst [vmem:[#allocation2 + $0x60] sm:$0xff] %v5624_v3  ;;  %v313_v9 = vld [vmem:[%s5811_s9 + $0x20] sm:$0xff]  ;;  %v314_v10 = vld [vmem:[%s5811_s9 + $0x28] sm:$0xff]  ;;  %v328_v11 = vmax.f32 %v312_v8, 0.0 }
  0x5f   : > { %223 = vst [vmem:[#allocation2 + $0x80] sm:$0xff] %v5624_v3  ;;  %224 = vst [vmem:[#allocation2 + $0xa0] sm:$0xff] %v5624_v3  ;;  %v329_v12 = vmax.f32 %v313_v9, 0.0  ;;  %v330_v13 = vmax.f32 %v314_v10, 0.0  ;;  %v315_v14 = vld [vmem:[%s5811_s9 + $0x30] sm:$0xff]  ;;  %v316_v15 = vld [vmem:[%s5811_s9 + $0x38] sm:$0xff] }
  0x60   : > { %225 = vst [vmem:[#allocation2 + $0xc0] sm:$0xff] %v5624_v3  ;;  %226 = vst [vmem:[#allocation2 + $0xe0] sm:$0xff] %v5624_v3  ;;  %v317_v16 = vld [vmem:[%s5811_s9 + $0x40] sm:$0xff]  ;;  %v331_v17 = vmax.f32 %v315_v14, 0.0  ;;  %v332_v18 = vmax.f32 %v316_v15, 0.0  ;;  %v318_v20 = vld [vmem:[%s5811_s9 + $0x48] sm:$0xff] }
  0x61   : > { %227 = vst [vmem:[#allocation2 + $0x100] sm:$0xff] %v5624_v3  ;;  %228 = vst [vmem:[#allocation2 + $0x120] sm:$0xff] %v5624_v3  ;;  %v333_v19 = vmax.f32 %v317_v16, 0.0  ;;  %v319_v21 = vld [vmem:[%s5811_s9 + $0x50] sm:$0xff]  ;;  %v320_v22 = vld [vmem:[%s5811_s9 + $0x58] sm:$0xff]  ;;  %v334_v23 = vmax.f32 %v318_v20, 0.0 }
  0x62   : > { %229 = vst [vmem:[#allocation2 + $0x140] sm:$0xff] %v5624_v3  ;;  %230 = vst [vmem:[#allocation2 + $0x160] sm:$0xff] %v5624_v3  ;;  %v335_v24 = vmax.f32 %v319_v21, 0.0  ;;  %v336_v25 = vmax.f32 %v320_v22, 0.0  ;;  %v321_v26 = vld [vmem:[%s5811_s9 + $0x60] sm:$0xff]  ;;  %v322_v27 = vld [vmem:[%s5811_s9 + $0x68] sm:$0xff] }
  0x63   : > { %231 = vst [vmem:[#allocation2 + $0x180] sm:$0xff] %v5624_v3  ;;  %232 = vst [vmem:[#allocation2 + $0x1a0] sm:$0xff] %v5624_v3  ;;  %v323_v28 = vld [vmem:[%s5811_s9 + $0x70] sm:$0xff]  ;;  %v337_v29 = vmax.f32 %v321_v26, 0.0  ;;  %v338_v30 = vmax.f32 %v322_v27, 0.0  ;;  %v324_v32 = vld [vmem:[%s5811_s9 + $0x78] sm:$0xff] }
  0x64   : > { %233 = vst [vmem:[#allocation2 + $0x1c0] sm:$0xff] %v5624_v3  ;;  %234 = vst [vmem:[#allocation2 + $0x1e0] sm:$0xff] %v5624_v3  ;;  %v339_v31 = vmax.f32 %v323_v28, 0.0  ;;  %v4093_v33 = vld [vmem:[%s5811_s9 + $0x80] sm:$0xff]  ;;  %v4094_v34 = vld [vmem:[%s5811_s9 + $0x88] sm:$0xff]  ;;  %v340_v35 = vmax.f32 %v324_v32, 0.0 }
  0x65   : > { %235 = vst [vmem:[#allocation2 + $0x200] sm:$0xff] %v5624_v3  ;;  %236 = vst [vmem:[#allocation2 + $0x220] sm:$0xff] %v5624_v3  ;;  %v391_v36 = vmax.f32 %v4093_v33, 0.0  ;;  %v392_v37 = vmax.f32 %v4094_v34, 0.0  ;;  %v4095_v38 = vld [vmem:[%s5811_s9 + $0x90] sm:$0xff]  ;;  %v4096_v39 = vld [vmem:[%s5811_s9 + $0x98] sm:$0xff] }
  0x66   : > { %237 = vst [vmem:[#allocation2 + $0x18] sm:$0xff] %v5624_v3  ;;  %238 = vst [vmem:[#allocation2 + $0x38] sm:$0xff] %v5624_v3  ;;  %v4097_v40 = vld [vmem:[%s5811_s9 + $0xa0] sm:$0xff]  ;;  %v393_v41 = vmax.f32 %v4095_v38, 0.0  ;;  %v394_v42 = vmax.f32 %v4096_v39, 0.0  ;;  %v4098_v44 = vld [vmem:[%s5811_s9 + $0xa8] sm:$0xff] }
  0x67   : > { %239 = vst [vmem:[#allocation2 + $0x58] sm:$0xff] %v5624_v3  ;;  %240 = vst [vmem:[#allocation2 + $0x78] sm:$0xff] %v5624_v3  ;;  %v395_v43 = vmax.f32 %v4097_v40, 0.0  ;;  %v4099_v45 = vld [vmem:[%s5811_s9 + $0xb0] sm:$0xff]  ;;  %v4100_v46 = vld [vmem:[%s5811_s9 + $0xb8] sm:$0xff]  ;;  %v396_v47 = vmax.f32 %v4098_v44, 0.0 }
  0x68   : > { %241 = vst [vmem:[#allocation2 + $0x98] sm:$0xff] %v5624_v3  ;;  %242 = vst [vmem:[#allocation2 + $0xb8] sm:$0xff] %v5624_v3  ;;  %v397_v48 = vmax.f32 %v4099_v45, 0.0  ;;  %v398_v49 = vmax.f32 %v4100_v46, 0.0  ;;  %v4101_v50 = vld [vmem:[%s5811_s9 + $0xc0] sm:$0xff]  ;;  %v4102_v51 = vld [vmem:[%s5811_s9 + $0xc8] sm:$0xff] }
  0x69   : > { %243 = vst [vmem:[#allocation2 + $0xd8] sm:$0xff] %v5624_v3  ;;  %244 = vst [vmem:[#allocation2 + $0xf8] sm:$0xff] %v5624_v3  ;;  %v4103_v52 = vld [vmem:[%s5811_s9 + $0xd0] sm:$0xff]  ;;  %v399_v53 = vmax.f32 %v4101_v50, 0.0  ;;  %v400_v54 = vmax.f32 %v4102_v51, 0.0  ;;  %v4104_v56 = vld [vmem:[%s5811_s9 + $0xd8] sm:$0xff] }
  0x6a   : > { %245 = vst [vmem:[#allocation2 + $0x118] sm:$0xff] %v5624_v3  ;;  %246 = vst [vmem:[#allocation2 + $0x138] sm:$0xff] %v5624_v3  ;;  %v401_v55 = vmax.f32 %v4103_v52, 0.0  ;;  %v4105_v57 = vld [vmem:[%s5811_s9 + $0xe0] sm:$0xff]  ;;  %v4106_v58 = vld [vmem:[%s5811_s9 + $0xe8] sm:$0xff]  ;;  %v402_v59 = vmax.f32 %v4104_v56, 0.0 }
  0x6b   : > { %247 = vst [vmem:[#allocation2 + $0x158] sm:$0xff] %v5624_v3  ;;  %248 = vst [vmem:[#allocation2 + $0x178] sm:$0xff] %v5624_v3  ;;  %v403_v60 = vmax.f32 %v4105_v57, 0.0  ;;  %v404_v61 = vmax.f32 %v4106_v58, 0.0  ;;  %v4107_v62 = vld [vmem:[%s5811_s9 + $0xf0] sm:$0xff]  ;;  %v4108_v63 = vld [vmem:[%s5811_s9 + $0xf8] sm:$0xff] }
  0x6c   : > { %249 = vst [vmem:[#allocation2 + $0x198] sm:$0xff] %v5624_v3  ;;  %250 = vst [vmem:[#allocation2 + $0x1b8] sm:$0xff] %v5624_v3  ;;  %v405_v0 = vmax.f32 %v4107_v62, 0.0  ;;  %v406_v1 = vmax.f32 %v4108_v63, 0.0 }
  0x6d   : > { %251 = vst [vmem:[#allocation2 + $0x1d8] sm:$0xff] %v5624_v3  ;;  %252 = vst [vmem:[#allocation2 + $0x1f8] sm:$0xff] %v5624_v3 }
  0x6e   : > { %253 = vst [vmem:[#allocation2 + $0x218] sm:$0xff] %v5624_v3  ;;  %254 = vst [vmem:[#allocation2 + $0x238] sm:$0xff] %v5624_v3 }
  0x6f   : > { %255 = vst [vmem:[#allocation2 + $0x8] sm:$0xff] %v5624_v3  ;;  %256 = vst [vmem:[#allocation2 + $0x10] sm:$0xff] %v5624_v3 }
  0x70   : > { %258 = vst [vmem:[#allocation2 + $0x228] sm:$0xff] %v5624_v3  ;;  %259 = vst [vmem:[#allocation2 + $0x230] sm:$0xff] %v5624_v3 }
  0x71   : > { %260 = vst [vmem:[#allocation3] sm:$0xff] %v5625_v4  ;;  %261 = vst [vmem:[#allocation3 + $0x20] sm:$0xff] %v5625_v4 }
  0x72   : > { %262 = vst [vmem:[#allocation3 + $0x40] sm:$0xff] %v5625_v4  ;;  %263 = vst [vmem:[#allocation3 + $0x60] sm:$0xff] %v5625_v4 }
  0x73   : > { %264 = vst [vmem:[#allocation3 + $0x80] sm:$0xff] %v5625_v4  ;;  %265 = vst [vmem:[#allocation3 + $0xa0] sm:$0xff] %v5625_v4 }
  0x74   : > { %266 = vst [vmem:[#allocation3 + $0xc0] sm:$0xff] %v5625_v4  ;;  %267 = vst [vmem:[#allocation3 + $0xe0] sm:$0xff] %v5625_v4 }
  0x75   : > { %268 = vst [vmem:[#allocation3 + $0x100] sm:$0xff] %v5625_v4  ;;  %269 = vst [vmem:[#allocation3 + $0x120] sm:$0xff] %v5625_v4 }
  0x76   : > { %270 = vst [vmem:[#allocation3 + $0x140] sm:$0xff] %v5625_v4  ;;  %271 = vst [vmem:[#allocation3 + $0x160] sm:$0xff] %v5625_v4 }
  0x77   : > { %272 = vst [vmem:[#allocation3 + $0x180] sm:$0xff] %v5625_v4  ;;  %273 = vst [vmem:[#allocation3 + $0x1a0] sm:$0xff] %v5625_v4 }
  0x78   : > { %274 = vst [vmem:[#allocation3 + $0x1c0] sm:$0xff] %v5625_v4  ;;  %275 = vst [vmem:[#allocation3 + $0x1e0] sm:$0xff] %v5625_v4 }
  0x79   : > { %276 = vst [vmem:[#allocation3 + $0x200] sm:$0xff] %v5625_v4  ;;  %277 = vst [vmem:[#allocation3 + $0x220] sm:$0xff] %v5625_v4 }
  0x7a   : > { %278 = vst [vmem:[#allocation3 + $0x240] sm:$0xff] %v5625_v4  ;;  %279 = vst [vmem:[#allocation3 + $0x260] sm:$0xff] %v5625_v4 }
  0x7b   : > { %280 = vst [vmem:[#allocation3 + $0x18] sm:$0xff] %v5625_v4  ;;  %281 = vst [vmem:[#allocation3 + $0x38] sm:$0xff] %v5625_v4 }
  0x7c   : > { %282 = vst [vmem:[#allocation3 + $0x58] sm:$0xff] %v5625_v4  ;;  %283 = vst [vmem:[#allocation3 + $0x78] sm:$0xff] %v5625_v4 }
  0x7d   : > { %284 = vst [vmem:[#allocation3 + $0x98] sm:$0xff] %v5625_v4  ;;  %285 = vst [vmem:[#allocation3 + $0xb8] sm:$0xff] %v5625_v4 }
  0x7e   : > { %286 = vst [vmem:[#allocation3 + $0xd8] sm:$0xff] %v5625_v4  ;;  %287 = vst [vmem:[#allocation3 + $0xf8] sm:$0xff] %v5625_v4 }
  0x7f   : > { %288 = vst [vmem:[#allocation3 + $0x118] sm:$0xff] %v5625_v4  ;;  %289 = vst [vmem:[#allocation3 + $0x138] sm:$0xff] %v5625_v4 }
  0x80   : > { %290 = vst [vmem:[#allocation3 + $0x158] sm:$0xff] %v5625_v4  ;;  %291 = vst [vmem:[#allocation3 + $0x178] sm:$0xff] %v5625_v4 }
  0x81   : > { %292 = vst [vmem:[#allocation3 + $0x198] sm:$0xff] %v5625_v4  ;;  %293 = vst [vmem:[#allocation3 + $0x1b8] sm:$0xff] %v5625_v4 }
  0x82   : > { %294 = vst [vmem:[#allocation3 + $0x1d8] sm:$0xff] %v5625_v4  ;;  %295 = vst [vmem:[#allocation3 + $0x1f8] sm:$0xff] %v5625_v4 }
  0x83   : > { %296 = vst [vmem:[#allocation3 + $0x218] sm:$0xff] %v5625_v4  ;;  %297 = vst [vmem:[#allocation3 + $0x238] sm:$0xff] %v5625_v4 }
  0x84   : > { %298 = vst [vmem:[#allocation3 + $0x258] sm:$0xff] %v5625_v4  ;;  %299 = vst [vmem:[#allocation3 + $0x278] sm:$0xff] %v5625_v4 }
  0x85   : > { %300 = vst [vmem:[#allocation3 + $0x8] sm:$0xff] %v5625_v4  ;;  %301 = vst [vmem:[#allocation3 + $0x10] sm:$0xff] %v5625_v4 }
  0x86   : > { %302 = vst [vmem:[#allocation3 + $0x28] sm:$0xff] %v5625_v4  ;;  %303 = vst [vmem:[#allocation3 + $0x30] sm:$0xff] %v5625_v4 }
  0x87   : > { %305 = vst [vmem:[#allocation3 + $0x248] sm:$0xff] %v5625_v4  ;;  %306 = vst [vmem:[#allocation3 + $0x250] sm:$0xff] %v5625_v4 }
  0x88   : > { %307 = vst [vmem:[#allocation3 + $0x268] sm:$0xff] %v5625_v4  ;;  %308 = vst [vmem:[#allocation3 + $0x270] sm:$0xff] %v5625_v4 }
  0x89   : > { %341 = vst [vmem:[%s5824_s30] sm:$0xff] %v325_v5  ;;  %358 = vst [vmem:[#allocation2 + $0x28] sm:$0xff] %v325_v5 }
  0x8a   : > { %342 = vst [vmem:[%s5824_s30 + $0x8] sm:$0xff] %v326_v6  ;;  %359 = vst [vmem:[#allocation2 + $0x30] sm:$0xff] %v326_v6 }
  0x8b   : > { %343 = vst [vmem:[%s5824_s30 + $0x10] sm:$0xff] %v327_v7  ;;  %360 = vst [vmem:[#allocation2 + $0x48] sm:$0xff] %v327_v7 }
  0x8c   : > { %344 = vst [vmem:[%s5824_s30 + $0x18] sm:$0xff] %v328_v11  ;;  %361 = vst [vmem:[#allocation2 + $0x50] sm:$0xff] %v328_v11 }
  0x8d   : > { %345 = vst [vmem:[%s5824_s30 + $0x20] sm:$0xff] %v329_v12  ;;  %362 = vst [vmem:[#allocation2 + $0x68] sm:$0xff] %v329_v12 }
  0x8e   : > { %346 = vst [vmem:[%s5824_s30 + $0x28] sm:$0xff] %v330_v13  ;;  %363 = vst [vmem:[#allocation2 + $0x70] sm:$0xff] %v330_v13 }
  0x8f   : > { %347 = vst [vmem:[%s5824_s30 + $0x30] sm:$0xff] %v331_v17  ;;  %364 = vst [vmem:[#allocation2 + $0x88] sm:$0xff] %v331_v17 }
  0x90   : > { %348 = vst [vmem:[%s5824_s30 + $0x38] sm:$0xff] %v332_v18  ;;  %365 = vst [vmem:[#allocation2 + $0x90] sm:$0xff] %v332_v18 }
  0x91   : > { %349 = vst [vmem:[%s5824_s30 + $0x40] sm:$0xff] %v333_v19  ;;  %366 = vst [vmem:[#allocation2 + $0xa8] sm:$0xff] %v333_v19 }
  0x92   : > { %350 = vst [vmem:[%s5824_s30 + $0x48] sm:$0xff] %v334_v23  ;;  %367 = vst [vmem:[#allocation2 + $0xb0] sm:$0xff] %v334_v23 }
  0x93   : > { %351 = vst [vmem:[%s5824_s30 + $0x50] sm:$0xff] %v335_v24  ;;  %368 = vst [vmem:[#allocation2 + $0xc8] sm:$0xff] %v335_v24 }
  0x94   : > { %352 = vst [vmem:[%s5824_s30 + $0x58] sm:$0xff] %v336_v25  ;;  %369 = vst [vmem:[#allocation2 + $0xd0] sm:$0xff] %v336_v25 }
  0x95   : > { %353 = vst [vmem:[%s5824_s30 + $0x60] sm:$0xff] %v337_v29  ;;  %370 = vst [vmem:[#allocation2 + $0xe8] sm:$0xff] %v337_v29 }
  0x96   : > { %354 = vst [vmem:[%s5824_s30 + $0x68] sm:$0xff] %v338_v30  ;;  %371 = vst [vmem:[#allocation2 + $0xf0] sm:$0xff] %v338_v30 }
  0x97   : > { %355 = vst [vmem:[%s5824_s30 + $0x70] sm:$0xff] %v339_v31  ;;  %372 = vst [vmem:[#allocation2 + $0x108] sm:$0xff] %v339_v31 }
  0x98   : > { %356 = vst [vmem:[%s5824_s30 + $0x78] sm:$0xff] %v340_v35  ;;  %373 = vst [vmem:[#allocation2 + $0x110] sm:$0xff] %v340_v35 }
  0x99   : > { %4109 = vst [vmem:[%s5824_s30 + $0x80] sm:$0xff] %v391_v36  ;;  %425 = vst [vmem:[#allocation2 + $0x128] sm:$0xff] %v391_v36 }
  0x9a   : > { %4110 = vst [vmem:[%s5824_s30 + $0x88] sm:$0xff] %v392_v37  ;;  %426 = vst [vmem:[#allocation2 + $0x130] sm:$0xff] %v392_v37 }
  0x9b   : > { %4111 = vst [vmem:[%s5824_s30 + $0x90] sm:$0xff] %v393_v41  ;;  %427 = vst [vmem:[#allocation2 + $0x148] sm:$0xff] %v393_v41 }
  0x9c   : > { %4112 = vst [vmem:[%s5824_s30 + $0x98] sm:$0xff] %v394_v42  ;;  %428 = vst [vmem:[#allocation2 + $0x150] sm:$0xff] %v394_v42 }
  0x9d   : > { %4113 = vst [vmem:[%s5824_s30 + $0xa0] sm:$0xff] %v395_v43  ;;  %429 = vst [vmem:[#allocation2 + $0x168] sm:$0xff] %v395_v43 }
  0x9e   : > { %4114 = vst [vmem:[%s5824_s30 + $0xa8] sm:$0xff] %v396_v47  ;;  %430 = vst [vmem:[#allocation2 + $0x170] sm:$0xff] %v396_v47 }
  0x9f   : > { %4115 = vst [vmem:[%s5824_s30 + $0xb0] sm:$0xff] %v397_v48  ;;  %431 = vst [vmem:[#allocation2 + $0x188] sm:$0xff] %v397_v48 }
  0xa0   : > { %4116 = vst [vmem:[%s5824_s30 + $0xb8] sm:$0xff] %v398_v49  ;;  %432 = vst [vmem:[#allocation2 + $0x190] sm:$0xff] %v398_v49 }
  0xa1   : > { %4117 = vst [vmem:[%s5824_s30 + $0xc0] sm:$0xff] %v399_v53  ;;  %433 = vst [vmem:[#allocation2 + $0x1a8] sm:$0xff] %v399_v53 }
  0xa2   : > { %4118 = vst [vmem:[%s5824_s30 + $0xc8] sm:$0xff] %v400_v54  ;;  %434 = vst [vmem:[#allocation2 + $0x1b0] sm:$0xff] %v400_v54 }
  0xa3   : > { %4119 = vst [vmem:[%s5824_s30 + $0xd0] sm:$0xff] %v401_v55  ;;  %435 = vst [vmem:[#allocation2 + $0x1c8] sm:$0xff] %v401_v55 }
  0xa4   : > { %4120 = vst [vmem:[%s5824_s30 + $0xd8] sm:$0xff] %v402_v59  ;;  %436 = vst [vmem:[#allocation2 + $0x1d0] sm:$0xff] %v402_v59 }
  0xa5   : > { %4121 = vst [vmem:[%s5824_s30 + $0xe0] sm:$0xff] %v403_v60  ;;  %437 = vst [vmem:[#allocation2 + $0x1e8] sm:$0xff] %v403_v60 }
  0xa6   : > { %4122 = vst [vmem:[%s5824_s30 + $0xe8] sm:$0xff] %v404_v61  ;;  %438 = vst [vmem:[#allocation2 + $0x1f0] sm:$0xff] %v404_v61 }
  0xa7   : > { %4123 = vst [vmem:[%s5824_s30 + $0xf0] sm:$0xff] %v405_v0  ;;  %439 = vst [vmem:[#allocation2 + $0x208] sm:$0xff] %v405_v0 }
  0xa8   : > { %4124 = vst [vmem:[%s5824_s30 + $0xf8] sm:$0xff] %v406_v1  ;;  %440 = vst [vmem:[#allocation2 + $0x210] sm:$0xff] %v406_v1 }
  0xa9 PF: > { %v5292_v2 = vld [vmem:[%s5818_s21 + $0x138] sm:$0xff]   ;;  %v5295_v5 = vld [vmem:[%s5818_s21 + $0x130] sm:$0xff]   ;;  %v5298_v8 = vld [vmem:[%s5818_s21 + $0x128] sm:$0xff]   ;;  %s3262_s26 = sadd.s32 1, %s5600_s15 }
  0xaa   : > { %v5293_v3 = vld [vmem:[%s5818_s21 + $0x178] sm:$0xff]   ;;  %4502 = vmatprep.subr.bf16.mxu0 %v5292_v2  ;;  %v5296_v6 = vld [vmem:[%s5818_s21 + $0x170] sm:$0xff]   ;;  %v5299_v9 = vld [vmem:[%s5818_s21 + $0x168] sm:$0xff]   ;;  %p6875_p6 = scmp.ge.s32.totalorder %s3262_s26, 4 }
  0xab   : > { %v5294_v4 = vld [vmem:[%s5818_s21 + $0xf8] sm:$0xff]   ;;  %4982 = vmatprep.subr.bf16.mxu1 %v5293_v3  ;;  %v5297_v7 = vld [vmem:[%s5818_s21 + $0xf0] sm:$0xff]   ;;  %v5300_v10 = vld [vmem:[%s5818_s21 + $0xe8] sm:$0xff]  }
  0xac   : > { %4503 = vmatpush3.bf16.msra.mxu0 %v5294_v4  ;;  %4983 = vmatpush3.bf16.msra.mxu1 %v5293_v3  ;;  %v5301_v11 = vld [vmem:[%s5818_s21 + $0x120] sm:$0xff]   ;;  %v5304_v14 = vld [vmem:[%s5818_s21 + $0x118] sm:$0xff]   ;;  %v5307_v17 = vld [vmem:[%s5818_s21 + $0x110] sm:$0xff]  }
  0xad   : > { %4504 = vmatprep.subr.bf16.mxu0 %v5295_v5  ;;  %4984 = vmatprep.subr.bf16.mxu1 %v5296_v6  ;;  %v5302_v12 = vld [vmem:[%s5818_s21 + $0x160] sm:$0xff]   ;;  %v5305_v15 = vld [vmem:[%s5818_s21 + $0x158] sm:$0xff]   ;;  %v5308_v18 = vld [vmem:[%s5818_s21 + $0x150] sm:$0xff]  }
  0xae   : > { %v5303_v13 = vld [vmem:[%s5818_s21 + $0xe0] sm:$0xff]   ;;  %v5306_v16 = vld [vmem:[%s5818_s21 + $0xd8] sm:$0xff]   ;;  %v5309_v19 = vld [vmem:[%s5818_s21 + $0xd0] sm:$0xff]  }
  0xaf   : > { %v5310_v20 = vld [vmem:[%s5818_s21 + $0x108] sm:$0xff]   ;;  %v587_v24 = vld [vmem:[#allocation2 + $0x30] sm:$0xff]  ;;  %v5313_v26 = vld [vmem:[%s5818_s21 + $0x100] sm:$0xff]  }
  0xb0   : > { %4505 = vmatpush3.bf16.msra.mxu0 %v5297_v7  ;;  %4985 = vmatpush3.bf16.msra.mxu1 %v5296_v6  ;;  %v5311_v21 = vld [vmem:[%s5818_s21 + $0x148] sm:$0xff]   ;;  %v5314_v27 = vld [vmem:[%s5818_s21 + $0x140] sm:$0xff]   ;;  %v611_v29 = vld [vmem:[#allocation2 + $0x31] sm:$0xff] }
  0xb1   : > { %4506 = vmatprep.subr.bf16.mxu0 %v5298_v8  ;;  %4986 = vmatprep.subr.bf16.mxu1 %v5299_v9  ;;  %v5312_v22 = vld [vmem:[%s5818_s21 + $0xc8] sm:$0xff]   ;;  %v5315_v30 = vld [vmem:[%s5818_s21 + $0xc0] sm:$0xff]   ;;  %v613_v35 = vld [vmem:[#allocation2 + $0x51] sm:$0xff] }
  0xb2   : > { %v586_v23 = vld [vmem:[#allocation2 + $0x28] sm:$0xff]  ;;  %v5316_v36 = vld [vmem:[%s5818_s21 + $0x78] sm:$0xff]   ;;  %v589_v42 = vld [vmem:[#allocation2 + $0x50] sm:$0xff] }
  0xb3   : > { %v610_v25 = vld [vmem:[#allocation2 + $0x29] sm:$0xff]  ;;  %v5923_v28 = vpack.c.bf16 %v587_v24, %v586_v23  ;;  %v5318_v37 = vld [vmem:[%s5818_s21 + $0xb8] sm:$0xff]   ;;  %v5324_v63 = vld [vmem:[%s5818_s21 + $0x60] sm:$0xff]  }
  0xb4   : > { %4507 = vmatpush3.bf16.msra.mxu0 %v5300_v10  ;;  %4987 = vmatpush3.bf16.msra.mxu1 %v5299_v9  ;;  %v5926_v31 = vpack.c.bf16 %v611_v29, %v610_v25  ;;  %v562_v32 = vld [vmem:[#allocation2 + $0x27] sm:$0xff]  ;;  %v563_v33 = vld [vmem:[#allocation2 + $0x2f] sm:$0xff]  ;;  %v5317_v40 = vld [vmem:[%s5818_s21 + $0x38] sm:$0xff]  }
  0xb5   : > { %4508 = vmatprep.subr.bf16.mxu0 %v5301_v11  ;;  %4988 = vmatprep.subr.bf16.mxu1 %v5302_v12  ;;  %v612_v34 = vld [vmem:[#allocation2 + $0x49] sm:$0xff]  ;;  %v5932_v38 = vpack.c.bf16 %v563_v33, %v562_v32  ;;  %v615_v44 = vld [vmem:[#allocation2 + $0x71] sm:$0xff]  ;;  %v5325_v1 = vld [vmem:[%s5818_s21 + $0x20] sm:$0xff]  }
  0xb6   : > { %859 = vmatprep.mubr.bf16.mxu0 %v5923_v28  ;;  %4998 = vmatprep.mubr.bf16.mxu1 %v5926_v31  ;;  %v5934_v39 = vpack.c.bf16 %v613_v35, %v612_v34  ;;  %v588_v41 = vld [vmem:[#allocation2 + $0x48] sm:$0xff]  ;;  %v5319_v45 = vld [vmem:[%s5818_s21 + $0x70] sm:$0xff]   ;;  %v5326_v7 = vld [vmem:[%s5818_s21 + $0x58] sm:$0xff]  }
  0xb7   : > { %v614_v43 = vld [vmem:[#allocation2 + $0x69] sm:$0xff]  ;;  %v5938_v46 = vpack.c.bf16 %v589_v42, %v588_v41  ;;  %v617_v52 = vld [vmem:[#allocation2 + $0x91] sm:$0xff]  ;;  %v5333_v23 = vld [vmem:[%s5818_s21 + $0xa0] sm:$0xff]  }
  0xb8   : > { %4509 = vmatpush3.bf16.msra.mxu0 %v5303_v13  ;;  %4989 = vmatpush3.bf16.msra.mxu1 %v5302_v12  ;;  %v5320_v47 = vld [vmem:[%s5818_s21 + $0x30] sm:$0xff]   ;;  %v5941_v48 = vpack.c.bf16 %v615_v44, %v614_v43  ;;  %v564_v49 = vld [vmem:[#allocation2 + $0x47] sm:$0xff]  ;;  %v5327_v13 = vld [vmem:[%s5818_s21 + $0x18] sm:$0xff]  }
  0xb9   : > { %4510 = vmatprep.subr.bf16.mxu0 %v5304_v14  ;;  %4990 = vmatprep.subr.bf16.mxu1 %v5305_v15  ;;  %v565_v50 = vld [vmem:[#allocation2 + $0x4f] sm:$0xff]  ;;  %v566_v2 = vld [vmem:[#allocation2 + $0x67] sm:$0xff]  ;;  %v5337_v44 = vld [vmem:[%s5818_s21 + $0x98] sm:$0xff]  }
  0xba   : > { %v616_v51 = vld [vmem:[#allocation2 + $0x89] sm:$0xff]  ;;  %v5949_v55 = vpack.c.bf16 %v565_v50, %v564_v49  ;;  %v619_v62 = vld [vmem:[#allocation2 + $0xb1] sm:$0xff]  ;;  %v5334_v35 = vld [vmem:[%s5818_s21 + $0x40] sm:$0xff]  }
  0xbb   : > { %v5321_v53 = vld [vmem:[%s5818_s21 + $0x68] sm:$0xff]   ;;  %v5323_v54 = vld [vmem:[%s5818_s21 + $0xb0] sm:$0xff]   ;;  %v5951_v56 = vpack.c.bf16 %v617_v52, %v616_v51 }
  0xbc   : > { %4511 = vmatpush3.bf16.msra.mxu0 %v5306_v16  ;;  %4991 = vmatpush3.bf16.msra.mxu1 %v5305_v15  ;;  %v590_v57 = vld [vmem:[#allocation2 + $0x68] sm:$0xff]  ;;  %v591_v58 = vld [vmem:[#allocation2 + $0x70] sm:$0xff] }
  0xbd   : > { %4512 = vmatprep.subr.bf16.mxu0 %v5307_v17  ;;  %4992 = vmatprep.subr.bf16.mxu1 %v5308_v18  ;;  %v5322_v59 = vld [vmem:[%s5818_s21 + $0x28] sm:$0xff]   ;;  %v5954_v60 = vpack.c.bf16 %v591_v58, %v590_v57  ;;  %v621_v5 = vld [vmem:[#allocation2 + $0xd1] sm:$0xff] }
  0xbe   : > { %v618_v61 = vld [vmem:[#allocation2 + $0xa9] sm:$0xff]  ;;  %v623_v15 = vld [vmem:[#allocation2 + $0xf1] sm:$0xff] }
  0xbf   : > { %v5957_v0 = vpack.c.bf16 %v619_v62, %v618_v61  ;;  %v567_v3 = vld [vmem:[#allocation2 + $0x6f] sm:$0xff]  ;;  %v441_v42 = vld [vmem:[#allocation2 + $0x7] sm:$0xff] }
  0xc0   : > { %4513 = vmatpush3.bf16.msra.mxu0 %v5309_v19  ;;  %4993 = vmatpush3.bf16.msra.mxu1 %v5308_v18  ;;  %v620_v4 = vld [vmem:[#allocation2 + $0xc9] sm:$0xff]  ;;  %v5966_v8 = vpack.c.bf16 %v567_v3, %v566_v2  ;;  %v5343_v3 = vld [vmem:[%s5818_s21 + $0x80] sm:$0xff]  }
  0xc1   : > { %4514 = vmatprep.subr.bf16.mxu0 %v5310_v20  ;;  %4994 = vmatprep.subr.bf16.mxu1 %v5311_v21  ;;  %v5328_v6 = vld [vmem:[%s5818_s21 + $0xa8] sm:$0xff]   ;;  %v5968_v9 = vpack.c.bf16 %v621_v5, %v620_v4  ;;  %v593_v11 = vld [vmem:[#allocation2 + $0x90] sm:$0xff] }
  0xc2   : > { %v592_v10 = vld [vmem:[#allocation2 + $0x88] sm:$0xff]  ;;  %v5329_v16 = vld [vmem:[%s5818_s21 + $0x50] sm:$0xff]  }
  0xc3   : > { %v622_v12 = vld [vmem:[#allocation2 + $0xe9] sm:$0xff]  ;;  %v5971_v14 = vpack.c.bf16 %v593_v11, %v592_v10  ;;  %v5345_v11 = vld [vmem:[%s5818_s21 + $0x218] sm:$0xff]  }
  0xc4   : > { %4515 = vmatpush3.bf16.msra.mxu0 %v5312_v22  ;;  %4995 = vmatpush3.bf16.msra.mxu1 %v5311_v21  ;;  %v5974_v17 = vpack.c.bf16 %v623_v15, %v622_v12  ;;  %v5330_v18 = vld [vmem:[%s5818_s21 + $0x10] sm:$0xff]   ;;  %v568_v19 = vld [vmem:[#allocation2 + $0x87] sm:$0xff] }
  0xc5   : > { %4516 = vmatprep.subr.bf16.mxu0 %v5313_v26  ;;  %4996 = vmatprep.subr.bf16.mxu1 %v5314_v27  ;;  %v569_v20 = vld [vmem:[#allocation2 + $0x8f] sm:$0xff]  ;;  %v572_v57 = vld [vmem:[#allocation2 + $0xc7] sm:$0xff] }
  0xc6   : > { %v624_v21 = vld [vmem:[#allocation2 + $0x109] sm:$0xff]  ;;  %v625_v22 = vld [vmem:[#allocation2 + $0x111] sm:$0xff]  ;;  %v5983_v26 = vpack.c.bf16 %v569_v20, %v568_v19 }
  0xc7   : > { %v5331_v24 = vld [vmem:[%s5818_s21 + $0x48] sm:$0xff]   ;;  %v595_v29 = vld [vmem:[#allocation2 + $0xb0] sm:$0xff] }
  0xc8   : > { %4517 = vmatpush3.bf16.msra.mxu0 %v5315_v30  ;;  %4997 = vmatpush3.bf16.msra.mxu1 %v5314_v27  ;;  %v594_v25 = vld [vmem:[#allocation2 + $0xa8] sm:$0xff]  ;;  %v5985_v27 = vpack.c.bf16 %v625_v22, %v624_v21  ;;  %v466_v32 = vld [vmem:[#allocation2 + $0x10] sm:$0xff] }
  0xc9   : > { %4582 = vmatprep.subr.bf16.mxu1 %v5316_v36  ;;  %5014 = vmatprep.subr.bf16.mxu0 %v5318_v37  ;;  %v465_v30 = vld [vmem:[#allocation2 + $0x8] sm:$0xff]  ;;  %v5988_v34 = vpack.c.bf16 %v595_v29, %v594_v25  ;;  %v597_v49 = vld [vmem:[#allocation2 + $0xd0] sm:$0xff]  ;;  %v5346_v25 = vld [vmem:[%s5818_s21 + $0x1b8] sm:$0xff]  }
  0xca   : > { %v5332_v33 = vld [vmem:[%s5818_s21 + $0x8] sm:$0xff]   ;;  %v481_v36 = vpack.c.bf16 %v466_v32, %v465_v30  ;;  %v5339_v50 = vld [vmem:[%s5818_s21 + $0x90] sm:$0xff]  }
  0xcb   : > { %860 = vmatmul.mubr.bf16.vlgmr.msra.gmra.mxu0 %v5932_v38  ;;  %4999 = vmatmul.mubr.bf16.vlgmr.msra.gmra.mxu1 %v5934_v39  ;;  %v571_v41 = vld [vmem:[#allocation2 + $0xaf] sm:$0xff]  ;;  %v574_v4 = vld [vmem:[#allocation2 + $0xe7] sm:$0xff] }
  0xcc   : > { %4583 = vmatpush3.bf16.msra.mxu1 %v5317_v40  ;;  %5015 = vmatpush3.bf16.msra.mxu0 %v5318_v37  ;;  %v5335_v37 = vld [vmem:[%s5818_s21] sm:$0xff]   ;;  %v442_v43 = vld [vmem:[#allocation2 + $0xf] sm:$0xff] }
  0xcd   : > { %4584 = vmatprep.subr.bf16.mxu1 %v5319_v45  ;;  %867 = vmatprep.mubr.bf16.mxu0 %v5938_v46  ;;  %v570_v40 = vld [vmem:[#allocation2 + $0xa7] sm:$0xff]  ;;  %v5336_v45 = vld [vmem:[%s5818_s21 + $0x238] sm:$0xff]   ;;  %v457_v52 = vpack.c.bf16 %v442_v43, %v441_v42  ;;  %v599_v62 = vld [vmem:[#allocation2 + $0xf0] sm:$0xff] }
  0xce   : > { %5002 = vmatprep.mubr.bf16.mxu1 %v5941_v48  ;;  %5016 = vmatprep.subr.bf16.mxu0 %v5323_v54  ;;  %v5998_v51 = vpack.c.bf16 %v571_v41, %v570_v40  ;;  %v5341_v58 = vld [vmem:[%s5818_s21 + $0x88] sm:$0xff]   ;;  %v601_v10 = vld [vmem:[#allocation2 + $0x110] sm:$0xff] }
  0xcf   : > { %v598_v61 = vld [vmem:[#allocation2 + $0xe8] sm:$0xff]  ;;  %v5350_v15 = vld [vmem:[%s5818_s21 + $0x210] sm:$0xff]  }
  0xd0   : > { %4585 = vmatpush3.bf16.msra.mxu1 %v5320_v47  ;;  %5017 = vmatpush3.bf16.msra.mxu0 %v5323_v54  ;;  %v596_v47 = vld [vmem:[#allocation2 + $0xc8] sm:$0xff]  ;;  %v5338_v54 = vld [vmem:[%s5818_s21 + $0x230] sm:$0xff]   ;;  %v6010_v2 = vpack.c.bf16 %v599_v62, %v598_v61 }
  0xd1   : > { %4586 = vmatprep.subr.bf16.mxu1 %v5321_v53  ;;  %5018 = vmatprep.subr.bf16.mxu0 %v5328_v6  ;;  %v6000_v53 = vpack.c.bf16 %v597_v49, %v596_v47  ;;  %v575_v5 = vld [vmem:[#allocation2 + $0xef] sm:$0xff]  ;;  %v5366_v47 = vld [vmem:[%s5818_s21 + $0x178] sm:$0xff]  }
  0xd2   : > { %v6020_v12 = vpack.c.bf16 %v575_v5, %v574_v4  ;;  %v490_v19 = vld [vmem:[#allocation2 + $0x11] sm:$0xff]  ;;  %v5355_v20 = vld [vmem:[%s5818_s21 + $0x208] sm:$0xff]   ;;  %v5383_v5 = vld [vmem:[%s5818_s21 + $0xc0] sm:$0xff]  }
  0xd3   : > { %868 = vmatmul.mubr.bf16.gmra.mxu0 %v5949_v55  ;;  %5003 = vmatmul.mubr.bf16.gmra.mxu1 %v5951_v56  ;;  %v5347_v29 = vld [vmem:[%s5818_s21 + $0x1f0] sm:$0xff]   ;;  %v5349_v32 = vld [vmem:[%s5818_s21 + $0x1e8] sm:$0xff]   ;;  %v5365_v49 = vld [vmem:[%s5818_s21 + $0xf8] sm:$0xff]  }
  0xd4   : > { %4587 = vmatpush3.bf16.msra.mxu1 %v5322_v59  ;;  %875 = vmatprep.mubr.bf16.mxu0 %v5954_v60  ;;  %v573_v59 = vld [vmem:[#allocation2 + $0xcf] sm:$0xff] }
  0xd5   : > { %4588 = vmatprep.subr.bf16.mxu1 %v5324_v63  ;;  %5006 = vmatprep.mubr.bf16.mxu1 %v5957_v0  ;;  %v5340_v63 = vld [vmem:[%s5818_s21 + $0x228] sm:$0xff]   ;;  %v5348_v30 = vld [vmem:[%s5818_s21 + $0x1b0] sm:$0xff]  }
  0xd6   : > { %5019 = vmatpush3.bf16.msra.mxu0 %v5328_v6  ;;  %v5342_v6 = vld [vmem:[%s5818_s21 + $0x220] sm:$0xff]   ;;  %v5357_v40 = vld [vmem:[%s5818_s21 + $0x1d0] sm:$0xff]   ;;  %v5359_v42 = vld [vmem:[%s5818_s21 + $0x1c8] sm:$0xff]  }
  0xd7   : > { %5020 = vmatprep.subr.bf16.mxu0 %v5333_v23  ;;  %v5358_v41 = vld [vmem:[%s5818_s21 + $0x190] sm:$0xff]   ;;  %v5361_v43 = vld [vmem:[%s5818_s21 + $0x188] sm:$0xff]  }
  0xd8   : > { %4589 = vmatpush3.bf16.msra.mxu1 %v5325_v1  ;;  %v6008_v1 = vpack.c.bf16 %v573_v59, %v572_v57  ;;  %v5370_v57 = vld [vmem:[%s5818_s21 + $0xe8] sm:$0xff]   ;;  %v5387_v62 = vld [vmem:[%s5818_s21 + $0x150] sm:$0xff]  }
  0xd9   : > { %4590 = vmatprep.subr.bf16.mxu1 %v5326_v7  ;;  %v600_v7 = vld [vmem:[#allocation2 + $0x108] sm:$0xff] }
  0xda   : > { %5021 = vmatpush3.bf16.msra.mxu0 %v5333_v23  ;;  %v5360_v23 = vld [vmem:[%s5818_s21 + $0x200] sm:$0xff]   ;;  %v1422_v59 = vld [vmem:[#allocation2 + $0x129] sm:$0xff] }
  0xdb   : > { %876 = vmatmul.mubr.bf16.gmra.mxu0 %v5966_v8  ;;  %5007 = vmatmul.mubr.bf16.gmra.mxu1 %v5968_v9  ;;  %v5379_v61 = vld [vmem:[%s5818_s21 + $0x108] sm:$0xff]  }
  0xdc   : > { %4591 = vmatpush3.bf16.msra.mxu1 %v5327_v13  ;;  %883 = vmatprep.mubr.bf16.mxu0 %v5971_v14  ;;  %v6022_v13 = vpack.c.bf16 %v601_v10, %v600_v7  ;;  %v5384_v7 = vld [vmem:[%s5818_s21 + $0xb8] sm:$0xff]   ;;  %v2000_v10 = vld [vmem:[#allocation2 + $0x148] sm:$0xff] }
  0xdd   : > { %4592 = vmatprep.subr.bf16.mxu1 %v5329_v16  ;;  %5010 = vmatprep.mubr.bf16.mxu1 %v5974_v17  ;;  %v577_v16 = vld [vmem:[#allocation2 + $0x10f] sm:$0xff] }
  0xde   : > { %5022 = vmatprep.subr.bf16.mxu0 %v5337_v44 }
  0xdf   : > { %5023 = vmatpush3.bf16.msra.mxu0 %v5337_v44  ;;  %v5362_v44 = vld [vmem:[%s5818_s21 + $0x1c0] sm:$0xff]  }
  0xe0   : > { %4593 = vmatpush3.bf16.msra.mxu1 %v5330_v18  ;;  %5024 = vmatprep.subr.bf16.mxu0 %v5339_v50  ;;  %v489_v18 = vld [vmem:[#allocation2 + $0x9] sm:$0xff] }
  0xe1   : > { %4594 = vmatprep.subr.bf16.mxu1 %v5331_v24  ;;  %v505_v22 = vpack.c.bf16 %v490_v19, %v489_v18  ;;  %v5364_v24 = vld [vmem:[%s5818_s21 + $0x138] sm:$0xff]   ;;  %v5391_v18 = vld [vmem:[%s5818_s21 + $0x140] sm:$0xff]   ;;  %v2002_v19 = vld [vmem:[#allocation2 + $0x168] sm:$0xff] }
  0xe3   : > { %884 = vmatmul.mubr.bf16.gmra.mxu0 %v5983_v26  ;;  %5011 = vmatmul.mubr.bf16.gmra.mxu1 %v5985_v27 }
  0xe4   : > { %4595 = vmatpush3.bf16.msra.mxu1 %v5332_v33  ;;  %891 = vmatprep.mubr.bf16.mxu0 %v5988_v34  ;;  %v5351_v33 = vld [vmem:[%s5818_s21 + $0x1a8] sm:$0xff]  }
  0xe5   : > { %4596 = vmatprep.subr.bf16.mxu1 %v5334_v35  ;;  %1197 = vmatprep.mubr.bf16.mxu1 %v481_v36  ;;  %v5352_v35 = vld [vmem:[%s5818_s21 + $0x1e0] sm:$0xff]   ;;  %v5354_v36 = vld [vmem:[%s5818_s21 + $0x1d8] sm:$0xff]  }
  0xe6   : > { %5025 = vmatpush3.bf16.msra.mxu0 %v5339_v50  ;;  %v5367_v50 = vld [vmem:[%s5818_s21 + $0x130] sm:$0xff]  }
  0xe7   : > { %5026 = vmatprep.subr.bf16.mxu0 %v5341_v58 }
  0xe8   : > { %4597 = vmatpush3.bf16.msra.mxu1 %v5335_v37  ;;  %v5356_v37 = vld [vmem:[%s5818_s21 + $0x198] sm:$0xff]  }
  0xe9   : > { %5046 = vmatprep.subr.bf16.mxu1 %v5336_v45 }
  0xea   : > { %5027 = vmatpush3.bf16.msra.mxu0 %v5341_v58  ;;  %v5375_v58 = vld [vmem:[%s5818_s21 + $0xd8] sm:$0xff]  }
  0xeb   : > { %892 = vmatmul.mubr.bf16.gmra.mxu0 %v5998_v51  ;;  %1198 = vmatmul.mubr.bf16.vlgmr.msra.gmra.mxu1 %v457_v52  ;;  %v5371_v52 = vld [vmem:[%s5818_s21 + $0x170] sm:$0xff]  }
  0xec   : > { %5047 = vmatpush3.bf16.msra.mxu1 %v5336_v45  ;;  %899 = vmatprep.mubr.bf16.mxu0 %v6000_v53  ;;  %v5363_v45 = vld [vmem:[%s5818_s21 + $0x180] sm:$0xff]  }
  0xed   : > { %1205 = vmatprep.mubr.bf16.mxu1 %v5923_v28  ;;  %5048 = vmatprep.subr.bf16.mxu1 %v5338_v54  ;;  %v5344_v28 = vld [vmem:[%s5818_s21 + $0x1f8] sm:$0xff]  }
  0xee   : > { %5028 = vmatprep.subr.bf16.mxu0 %v5343_v3 }
  0xef   : > { %5029 = vmatpush3.bf16.msra.mxu0 %v5343_v3  ;;  %v1999_v3 = vld [vmem:[#allocation2 + $0x130] sm:$0xff] }
  0xf0   : > { %5049 = vmatpush3.bf16.msra.mxu1 %v5338_v54  ;;  %4662 = vmatprep.subr.bf16.mxu0 %v5344_v28  ;;  %v5376_v54 = vld [vmem:[%s5818_s21 + $0x168] sm:$0xff]  }
  0xf1   : > { %5050 = vmatprep.subr.bf16.mxu1 %v5340_v63  ;;  %v5389_v28 = vld [vmem:[%s5818_s21 + $0x148] sm:$0xff]  }
  0xf3   : > { %900 = vmatmul.mubr.bf16.gmra.mxu0 %v6008_v1  ;;  %1206 = vmatmul.mubr.bf16.gmra.mxu1 %v5932_v38  ;;  %v576_v38 = vld [vmem:[#allocation2 + $0x107] sm:$0xff] }
  0xf4   : > { %907 = vmatprep.mubr.bf16.mxu0 %v6010_v2  ;;  %1213 = vmatprep.mubr.bf16.mxu1 %v5938_v46  ;;  %v6030_v21 = vpack.c.bf16 %v577_v16, %v576_v38  ;;  %v1976_v16 = vld [vmem:[#allocation2 + $0x147] sm:$0xff] }
  0xf5   : > { %5051 = vmatpush3.bf16.msra.mxu1 %v5340_v63  ;;  %v1998_v63 = vld [vmem:[#allocation2 + $0x128] sm:$0xff] }
  0xf6   : > { %5052 = vmatprep.subr.bf16.mxu1 %v5342_v6  ;;  %v6102_v4 = vpack.c.bf16 %v1999_v3, %v1998_v63  ;;  %v2011_v63 = vld [vmem:[#allocation2 + $0x1f0] sm:$0xff] }
  0xf7   : > { %v2030_v3 = vld [vmem:[#allocation2 + $0x1a9] sm:$0xff] }
  0xf9   : > { %5053 = vmatpush3.bf16.msra.mxu1 %v5342_v6  ;;  %v1975_v6 = vld [vmem:[#allocation2 + $0x12f] sm:$0xff] }
  0xfa   : > { %5054 = vmatprep.subr.bf16.mxu1 %v5345_v11 }
  0xfb   : > { %908 = vmatmul.mubr.bf16.gmra.mxu0 %v6020_v12  ;;  %1214 = vmatmul.mubr.bf16.gmra.mxu1 %v5949_v55 }
  0xfc   : > { %915 = vmatprep.mubr.bf16.mxu0 %v6022_v13  ;;  %1221 = vmatprep.mubr.bf16.mxu1 %v5954_v60 }
  0xfd   : > { %5055 = vmatpush3.bf16.msra.mxu1 %v5345_v11  ;;  %v2001_v11 = vld [vmem:[#allocation2 + $0x150] sm:$0xff] }
  0xfe   : > { %5056 = vmatprep.subr.bf16.mxu1 %v5350_v15 }
 0x101   : > { %5057 = vmatpush3.bf16.msra.mxu1 %v5350_v15  ;;  %v5386_v15 = vld [vmem:[%s5818_s21 + $0xb0] sm:$0xff]  }
 0x102   : > { %5058 = vmatprep.subr.bf16.mxu1 %v5355_v20 }
 0x103   : > { %916 = vmatmul.mubr.bf16.gmra.mxu0 %v6030_v21  ;;  %1222 = vmatmul.mubr.bf16.gmra.mxu1 %v5966_v8 }
 0x104   : > { %1229 = vmatprep.mubr.bf16.mxu1 %v5971_v14  ;;  %5030 = vmatprep.mubr.bf16.mxu0 %v505_v22  ;;  %v5392_v22 = vld [vmem:[%s5818_s21 + $0x78] sm:$0xff]  }
 0x105   : > { %5059 = vmatpush3.bf16.msra.mxu1 %v5355_v20  ;;  %v2003_v20 = vld [vmem:[#allocation2 + $0x170] sm:$0xff] }
 0x106   : > { %5060 = vmatprep.subr.bf16.mxu1 %v5360_v23 }
 0x109   : > { %5061 = vmatpush3.bf16.msra.mxu1 %v5360_v23  ;;  %v5388_v23 = vld [vmem:[%s5818_s21 + $0xa8] sm:$0xff]  }
 0x10a   : > { %4742 = vmatprep.subr.bf16.mxu1 %v5364_v24 }
 0x10b   : > { %1230 = vmatmul.mubr.bf16.gmra.mxu1 %v5983_v26  ;;  %5031 = vmatmul.mubr.bf16.vlgmr.msra.gmra.mxu0 %v5926_v31  ;;  %v5353_v31 = vld [vmem:[%s5818_s21 + $0x1a0] sm:$0xff]  }
 0x10c   : > { %4663 = vmatpush3.bf16.msra.mxu0 %v5346_v25  ;;  %1237 = vmatprep.mubr.bf16.mxu1 %v5988_v34  ;;  %v1978_v25 = vld [vmem:[#allocation2 + $0x167] sm:$0xff] }
 0x10d   : > { %4664 = vmatprep.subr.bf16.mxu0 %v5347_v29  ;;  %5034 = vmatprep.mubr.bf16.mxu0 %v5934_v39  ;;  %v5390_v29 = vld [vmem:[%s5818_s21 + $0xa0] sm:$0xff]  }
 0x110   : > { %4665 = vmatpush3.bf16.msra.mxu0 %v5348_v30  ;;  %v2004_v30 = vld [vmem:[#allocation2 + $0x188] sm:$0xff] }
 0x111   : > { %4666 = vmatprep.subr.bf16.mxu0 %v5349_v32  ;;  %v2005_v32 = vld [vmem:[#allocation2 + $0x190] sm:$0xff] }
 0x113   : > { %1238 = vmatmul.mubr.bf16.gmra.mxu1 %v5998_v51  ;;  %5035 = vmatmul.mubr.bf16.gmra.mxu0 %v5941_v48 }
 0x114   : > { %4667 = vmatpush3.bf16.msra.mxu0 %v5351_v33  ;;  %1245 = vmatprep.mubr.bf16.mxu1 %v6000_v53  ;;  %v5393_v33 = vld [vmem:[%s5818_s21 + $0x98] sm:$0xff]  }
 0x115   : > { %4668 = vmatprep.subr.bf16.mxu0 %v5352_v35  ;;  %5038 = vmatprep.mubr.bf16.mxu0 %v5951_v56 }
 0x118   : > { %4669 = vmatpush3.bf16.msra.mxu0 %v5353_v31  ;;  %v6135_v31 = vpack.c.bf16 %v2005_v32, %v2004_v30  ;;  %v5405_v32 = vld [vmem:[%s5818_s21 + $0x50] sm:$0xff]  }
 0x119   : > { %4670 = vmatprep.subr.bf16.mxu0 %v5354_v36  ;;  %v1981_v36 = vld [vmem:[#allocation2 + $0x18f] sm:$0xff] }
 0x11b   : > { %1246 = vmatmul.mubr.bf16.gmra.mxu1 %v6008_v1  ;;  %5039 = vmatmul.mubr.bf16.gmra.mxu0 %v5957_v0 }
 0x11c   : > { %4671 = vmatpush3.bf16.msra.mxu0 %v5356_v37  ;;  %1253 = vmatprep.mubr.bf16.mxu1 %v6010_v2  ;;  %v2006_v37 = vld [vmem:[#allocation2 + $0x1a8] sm:$0xff] }
 0x11d   : > { %4672 = vmatprep.subr.bf16.mxu0 %v5357_v40  ;;  %5042 = vmatprep.mubr.bf16.mxu0 %v5968_v9  ;;  %v2007_v40 = vld [vmem:[#allocation2 + $0x1b0] sm:$0xff] }
 0x120   : > { %4673 = vmatpush3.bf16.msra.mxu0 %v5358_v41  ;;  %v5403_v41 = vld [vmem:[%s5818_s21 + $0x88] sm:$0xff]  }
 0x121   : > { %4674 = vmatprep.subr.bf16.mxu0 %v5359_v42 }
 0x123   : > { %1254 = vmatmul.mubr.bf16.gmra.mxu1 %v6020_v12  ;;  %5043 = vmatmul.mubr.bf16.gmra.mxu0 %v5974_v17 }
 0x124   : > { %4675 = vmatpush3.bf16.msra.mxu0 %v5361_v43  ;;  %1657 = vmatprep.mubr.bf16.mxu0 %v5938_v46  ;;  %v5368_v46 = vld [vmem:[%s5818_s21 + $0xf0] sm:$0xff]   ;;  %v6145_v43 = vpack.c.bf16 %v2007_v40, %v2006_v37 }
 0x125   : > { %4676 = vmatprep.subr.bf16.mxu0 %v5362_v44  ;;  %5062 = vmatprep.mubr.bf16.mxu1 %v5934_v39  ;;  %v5369_v39 = vld [vmem:[%s5818_s21 + $0x128] sm:$0xff]   ;;  %v2037_v40 = vld [vmem:[#allocation2 + $0x211] sm:$0xff] }
 0x126   : > { %v1982_v44 = vld [vmem:[#allocation2 + $0x1a7] sm:$0xff] }
 0x127   : > { %v2036_v37 = vld [vmem:[#allocation2 + $0x209] sm:$0xff] }
 0x128   : > { %4677 = vmatpush3.bf16.msra.mxu0 %v5363_v45  ;;  %v1983_v45 = vld [vmem:[#allocation2 + $0x1af] sm:$0xff] }
 0x129   : > { %5078 = vmatprep.subr.bf16.mxu0 %v5366_v47 }
 0x12b   : > { %1658 = vmatmul.mubr.bf16.vlgmr.msra.gmra.mxu0 %v5949_v55  ;;  %5063 = vmatmul.mubr.bf16.vlgmr.msra.gmra.mxu1 %v5941_v48  ;;  %v5372_v48 = vld [vmem:[%s5818_s21 + $0x120] sm:$0xff]  }
 0x12c   : > { %4743 = vmatpush3.bf16.msra.mxu1 %v5365_v49  ;;  %5079 = vmatpush3.bf16.msra.mxu0 %v5366_v47  ;;  %v5381_v55 = vld [vmem:[%s5818_s21 + $0x160] sm:$0xff]   ;;  %v2024_v47 = vld [vmem:[#allocation2 + $0x149] sm:$0xff]  ;;  %v2025_v49 = vld [vmem:[#allocation2 + $0x151] sm:$0xff] }
 0x12d   : > { %4744 = vmatprep.subr.bf16.mxu1 %v5367_v50  ;;  %1665 = vmatprep.mubr.bf16.mxu0 %v5954_v60  ;;  %v5373_v60 = vld [vmem:[%s5818_s21 + $0xe0] sm:$0xff]   ;;  %v2008_v50 = vld [vmem:[#allocation2 + $0x1c8] sm:$0xff] }
 0x12e   : > { %5066 = vmatprep.mubr.bf16.mxu1 %v5951_v56  ;;  %5080 = vmatprep.subr.bf16.mxu0 %v5371_v52  ;;  %v5374_v56 = vld [vmem:[%s5818_s21 + $0x118] sm:$0xff]  }
 0x130   : > { %4745 = vmatpush3.bf16.msra.mxu1 %v5368_v46  ;;  %5081 = vmatpush3.bf16.msra.mxu0 %v5371_v52  ;;  %v2009_v52 = vld [vmem:[#allocation2 + $0x1d0] sm:$0xff] }
 0x131   : > { %4746 = vmatprep.subr.bf16.mxu1 %v5369_v39  ;;  %5082 = vmatprep.subr.bf16.mxu0 %v5376_v54  ;;  %v2026_v46 = vld [vmem:[#allocation2 + $0x169] sm:$0xff]  ;;  %v2027_v39 = vld [vmem:[#allocation2 + $0x171] sm:$0xff] }
 0x133   : > { %1666 = vmatmul.mubr.bf16.gmra.mxu0 %v5966_v8  ;;  %5067 = vmatmul.mubr.bf16.gmra.mxu1 %v5957_v0  ;;  %v5377_v8 = vld [vmem:[%s5818_s21 + $0x110] sm:$0xff]   ;;  %v5385_v0 = vld [vmem:[%s5818_s21 + $0x158] sm:$0xff]  }
 0x134   : > { %4747 = vmatpush3.bf16.msra.mxu1 %v5370_v57  ;;  %1673 = vmatprep.mubr.bf16.mxu0 %v5971_v14  ;;  %v5378_v14 = vld [vmem:[%s5818_s21 + $0xd0] sm:$0xff]   ;;  %v6153_v57 = vpack.c.bf16 %v1983_v45, %v1982_v44 }
 0x135   : > { %4748 = vmatprep.subr.bf16.mxu1 %v5372_v48  ;;  %5070 = vmatprep.mubr.bf16.mxu1 %v5968_v9  ;;  %v1423_v9 = vld [vmem:[#allocation2 + $0x131] sm:$0xff]  ;;  %v6155_v48 = vpack.c.bf16 %v2025_v49, %v2024_v47  ;;  %v1901_v45 = vld [vmem:[#allocation2 + $0x109] sm:$0xff] }
 0x136   : > { %5083 = vmatpush3.bf16.msra.mxu0 %v5376_v54  ;;  %v5412_v54 = vld [vmem:[%s5818_s21 + $0x1f8] sm:$0xff]   ;;  %v1878_v44 = vld [vmem:[#allocation2 + $0x110] sm:$0xff] }
 0x137   : > { %5084 = vmatprep.subr.bf16.mxu0 %v5381_v55  ;;  %v1902_v47 = vld [vmem:[#allocation2 + $0x111] sm:$0xff] }
 0x138   : > { %4749 = vmatpush3.bf16.msra.mxu1 %v5373_v60  ;;  %v6158_v60 = vpack.c.bf16 %v2009_v52, %v2008_v50  ;;  %v6203_v50 = vpack.c.bf16 %v2037_v40, %v2036_v37  ;;  %v5409_v52 = vld [vmem:[%s5818_s21 + $0x8] sm:$0xff]   ;;  %v5422_v37 = vld [vmem:[%s5818_s21 + $0x1d8] sm:$0xff]  }
 0x139   : > { %4750 = vmatprep.subr.bf16.mxu1 %v5374_v56  ;;  %v5395_v56 = vld [vmem:[%s5818_s21 + $0x70] sm:$0xff]  }
 0x13a   : > { %5085 = vmatpush3.bf16.msra.mxu0 %v5381_v55  ;;  %v5394_v55 = vld [vmem:[%s5818_s21 + $0x38] sm:$0xff]  }
 0x13b   : > { %1674 = vmatmul.mubr.bf16.gmra.mxu0 %v5983_v26  ;;  %5071 = vmatmul.mubr.bf16.gmra.mxu1 %v5974_v17  ;;  %v6098_v26 = vpack.c.bf16 %v1423_v9, %v1422_v59  ;;  %v5380_v17 = vld [vmem:[%s5818_s21 + $0xc8] sm:$0xff]   ;;  %v2029_v9 = vld [vmem:[#allocation2 + $0x191] sm:$0xff] }
 0x13c   : > { %4751 = vmatpush3.bf16.msra.mxu1 %v5375_v58  ;;  %1681 = vmatprep.mubr.bf16.mxu0 %v5988_v34  ;;  %v5382_v34 = vld [vmem:[%s5818_s21 + $0x100] sm:$0xff]   ;;  %v6161_v58 = vpack.c.bf16 %v2027_v39, %v2026_v46  ;;  %v2028_v59 = vld [vmem:[#allocation2 + $0x189] sm:$0xff] }
 0x13d   : > { %4752 = vmatprep.subr.bf16.mxu1 %v5377_v8  ;;  %5074 = vmatprep.mubr.bf16.mxu1 %v5985_v27  ;;  %v1974_v27 = vld [vmem:[#allocation2 + $0x127] sm:$0xff]  ;;  %v5396_v8 = vld [vmem:[%s5818_s21 + $0x30] sm:$0xff]  }
 0x13e   : > { %5086 = vmatprep.subr.bf16.mxu0 %v5385_v0  ;;  %v6111_v38 = vpack.c.bf16 %v1975_v6, %v1974_v27  ;;  %v5399_v27 = vld [vmem:[%s5818_s21 + $0x28] sm:$0xff]   ;;  %v5410_v39 = vld [vmem:[%s5818_s21 + $0x40] sm:$0xff]  }
 0x13f   : > { %5087 = vmatpush3.bf16.msra.mxu0 %v5385_v0  ;;  %v1984_v0 = vld [vmem:[#allocation2 + $0x1c7] sm:$0xff] }
 0x140   : > { %4753 = vmatpush3.bf16.msra.mxu1 %v5378_v14  ;;  %5088 = vmatprep.subr.bf16.mxu0 %v5387_v62  ;;  %v1985_v14 = vld [vmem:[#allocation2 + $0x1cf] sm:$0xff] }
 0x141   : > { %4754 = vmatprep.subr.bf16.mxu1 %v5379_v61  ;;  %v5397_v61 = vld [vmem:[%s5818_s21 + $0x68] sm:$0xff]  }
 0x143   : > { %1682 = vmatmul.mubr.bf16.gmra.mxu0 %v5998_v51  ;;  %5075 = vmatmul.mubr.bf16.gmra.mxu1 %v6098_v26  ;;  %v6113_v51 = vpack.c.bf16 %v2001_v11, %v2000_v10  ;;  %v5401_v10 = vld [vmem:[%s5818_s21 + $0x20] sm:$0xff]  }
 0x144   : > { %4755 = vmatpush3.bf16.msra.mxu1 %v5380_v17  ;;  %1689 = vmatprep.mubr.bf16.mxu0 %v6000_v53  ;;  %v1977_v53 = vld [vmem:[#allocation2 + $0x14f] sm:$0xff]  ;;  %v1986_v11 = vld [vmem:[#allocation2 + $0x1e7] sm:$0xff] }
 0x145   : > { %4756 = vmatprep.subr.bf16.mxu1 %v5382_v34  ;;  %2270 = vmatprep.mubr.bf16.mxu1 %v6102_v4  ;;  %v6123_v24 = vpack.c.bf16 %v1977_v53, %v1976_v16  ;;  %v2031_v17 = vld [vmem:[#allocation2 + $0x1b1] sm:$0xff]  ;;  %v6169_v34 = vpack.c.bf16 %v1985_v14, %v1984_v0  ;;  %v2032_v16 = vld [vmem:[#allocation2 + $0x1c9] sm:$0xff] }
 0x146   : > { %5089 = vmatpush3.bf16.msra.mxu0 %v5387_v62  ;;  %v2010_v62 = vld [vmem:[#allocation2 + $0x1e8] sm:$0xff]  ;;  %v2033_v53 = vld [vmem:[#allocation2 + $0x1d1] sm:$0xff] }
 0x147   : > { %5090 = vmatprep.subr.bf16.mxu0 %v5389_v28  ;;  %v6174_v6 = vpack.c.bf16 %v2011_v63, %v2010_v62  ;;  %v5414_v0 = vld [vmem:[%s5818_s21 + $0x238] sm:$0xff]  }
 0x148   : > { %4757 = vmatpush3.bf16.msra.mxu1 %v5383_v5  ;;  %v6171_v5 = vpack.c.bf16 %v2029_v9, %v2028_v59  ;;  %v5413_v59 = vld [vmem:[%s5818_s21 + $0x1b8] sm:$0xff]   ;;  %v5415_v9 = vld [vmem:[%s5818_s21 + $0x1f0] sm:$0xff]  }
 0x149   : > { %5110 = vmatprep.subr.bf16.mxu1 %v5384_v7 }
 0x14a   : > { %5091 = vmatpush3.bf16.msra.mxu0 %v5389_v28  ;;  %v5400_v28 = vld [vmem:[%s5818_s21 + $0x60] sm:$0xff]  }
 0x14b   : > { %1690 = vmatmul.mubr.bf16.gmra.mxu0 %v6008_v1  ;;  %2271 = vmatmul.mubr.bf16.vlgmr.msra.gmra.mxu1 %v6111_v38  ;;  %v6125_v1 = vpack.c.bf16 %v2003_v20, %v2002_v19  ;;  %v2012_v19 = vld [vmem:[#allocation2 + $0x208] sm:$0xff]  ;;  %v2013_v20 = vld [vmem:[#allocation2 + $0x210] sm:$0xff] }
 0x14c   : > { %5111 = vmatpush3.bf16.msra.mxu1 %v5384_v7  ;;  %1697 = vmatprep.mubr.bf16.mxu0 %v6010_v2  ;;  %v1979_v2 = vld [vmem:[#allocation2 + $0x16f] sm:$0xff]  ;;  %v6177_v7 = vpack.c.bf16 %v2031_v17, %v2030_v3  ;;  %v6190_v30 = vpack.c.bf16 %v2013_v20, %v2012_v19  ;;  %v5420_v20 = vld [vmem:[%s5818_s21 + $0x1e0] sm:$0xff]  }
 0x14d   : > { %2278 = vmatprep.mubr.bf16.mxu1 %v6113_v51  ;;  %5112 = vmatprep.subr.bf16.mxu1 %v5386_v15  ;;  %v6133_v35 = vpack.c.bf16 %v1979_v2, %v1978_v25  ;;  %v5404_v2 = vld [vmem:[%s5818_s21 + $0x18] sm:$0xff]   ;;  %v5416_v3 = vld [vmem:[%s5818_s21 + $0x1b0] sm:$0xff]  }
 0x14e   : > { %5092 = vmatprep.subr.bf16.mxu0 %v5391_v18 }
 0x14f   : > { %5093 = vmatpush3.bf16.msra.mxu0 %v5391_v18  ;;  %v5402_v18 = vld [vmem:[%s5818_s21 + $0x58] sm:$0xff]  }
 0x150   : > { %5113 = vmatpush3.bf16.msra.mxu1 %v5386_v15  ;;  %4822 = vmatprep.subr.bf16.mxu0 %v5392_v22  ;;  %v1987_v15 = vld [vmem:[#allocation2 + $0x1ef] sm:$0xff] }
 0x151   : > { %5114 = vmatprep.subr.bf16.mxu1 %v5388_v23  ;;  %v2034_v22 = vld [vmem:[#allocation2 + $0x1e9] sm:$0xff]  ;;  %v6185_v25 = vpack.c.bf16 %v1987_v15, %v1986_v11 }
 0x153   : > { %1698 = vmatmul.mubr.bf16.gmra.mxu0 %v6020_v12  ;;  %2279 = vmatmul.mubr.bf16.gmra.mxu1 %v6123_v24  ;;  %v5398_v12 = vld [vmem:[%s5818_s21 + $0x90] sm:$0xff]  }
 0x154   : > { %1705 = vmatprep.mubr.bf16.mxu0 %v6022_v13  ;;  %2286 = vmatprep.mubr.bf16.mxu1 %v6125_v1  ;;  %v1980_v13 = vld [vmem:[#allocation2 + $0x187] sm:$0xff] }
 0x155   : > { %5115 = vmatpush3.bf16.msra.mxu1 %v5388_v23  ;;  %v6143_v42 = vpack.c.bf16 %v1981_v36, %v1980_v13  ;;  %v2035_v23 = vld [vmem:[#allocation2 + $0x1f1] sm:$0xff]  ;;  %v1988_v13 = vld [vmem:[#allocation2 + $0x207] sm:$0xff] }
 0x156   : > { %5116 = vmatprep.subr.bf16.mxu1 %v5390_v29  ;;  %v1989_v36 = vld [vmem:[#allocation2 + $0x20f] sm:$0xff] }
 0x157   : > { %v6201_v49 = vpack.c.bf16 %v1989_v36, %v1988_v13 }
 0x159   : > { %5117 = vmatpush3.bf16.msra.mxu1 %v5390_v29  ;;  %v6187_v29 = vpack.c.bf16 %v2033_v53, %v2032_v16  ;;  %v5418_v53 = vld [vmem:[%s5818_s21 + $0x1a8] sm:$0xff]  }
 0x15a   : > { %5118 = vmatprep.subr.bf16.mxu1 %v5393_v33 }
 0x15b   : > { %1706 = vmatmul.mubr.bf16.gmra.mxu0 %v6030_v21  ;;  %2287 = vmatmul.mubr.bf16.gmra.mxu1 %v6133_v35  ;;  %v5408_v21 = vld [vmem:[%s5818_s21 + $0x80] sm:$0xff]  }
 0x15c   : > { %1713 = vmatprep.mubr.bf16.mxu0 %v6102_v4  ;;  %2294 = vmatprep.mubr.bf16.mxu1 %v6135_v31 }
 0x15d   : > { %5119 = vmatpush3.bf16.msra.mxu1 %v5393_v33  ;;  %v6193_v33 = vpack.c.bf16 %v2035_v23, %v2034_v22 }
 0x15e   : > { %5120 = vmatprep.subr.bf16.mxu1 %v5398_v12 }
 0x161   : > { %5121 = vmatpush3.bf16.msra.mxu1 %v5398_v12  ;;  %v5406_v12 = vld [vmem:[%s5818_s21 + $0x10] sm:$0xff]  }
 0x162   : > { %5122 = vmatprep.subr.bf16.mxu1 %v5403_v41 }
 0x163   : > { %1714 = vmatmul.mubr.bf16.gmra.mxu0 %v6111_v38  ;;  %2295 = vmatmul.mubr.bf16.gmra.mxu1 %v6143_v42 }
 0x164   : > { %2302 = vmatprep.mubr.bf16.mxu1 %v6145_v43  ;;  %5094 = vmatprep.mubr.bf16.mxu0 %v6098_v26 }
 0x165   : > { %5123 = vmatpush3.bf16.msra.mxu1 %v5403_v41  ;;  %v5407_v41 = vld [vmem:[%s5818_s21 + $0x48] sm:$0xff]  }
 0x166   : > { %5124 = vmatprep.subr.bf16.mxu1 %v5408_v21 }
 0x169   : > { %5125 = vmatpush3.bf16.msra.mxu1 %v5408_v21  ;;  %v1877_v21 = vld [vmem:[#allocation2 + $0x108] sm:$0xff] }
 0x16a   : > { %4902 = vmatprep.subr.bf16.mxu1 %v5412_v54  ;;  %v1893_v46 = vpack.c.bf16 %v1878_v44, %v1877_v21  ;;  %v1917_v54 = vpack.c.bf16 %v1902_v47, %v1901_v45  ;;  %v5423_v44 = vld [vmem:[%s5818_s21 + $0x198] sm:$0xff]  }
 0x16b   : > { %2303 = vmatmul.mubr.bf16.gmra.mxu1 %v6153_v57  ;;  %5095 = vmatmul.mubr.bf16.vlgmr.msra.gmra.mxu0 %v6155_v48 }
 0x16c   : > { %4823 = vmatpush3.bf16.msra.mxu0 %v5394_v55  ;;  %2310 = vmatprep.mubr.bf16.mxu1 %v6158_v60  ;;  %v5411_v55 = vld [vmem:[%s5818_s21] sm:$0xff]  }
 0x16d   : > { %4824 = vmatprep.subr.bf16.mxu0 %v5395_v56  ;;  %5098 = vmatprep.mubr.bf16.mxu0 %v6161_v58  ;;  %v1853_v56 = vld [vmem:[#allocation2 + $0x107] sm:$0xff] }
 0x170   : > { %4825 = vmatpush3.bf16.msra.mxu0 %v5396_v8  ;;  %v1854_v8 = vld [vmem:[#allocation2 + $0x10f] sm:$0xff] }
 0x171   : > { %4826 = vmatprep.subr.bf16.mxu0 %v5397_v61  ;;  %v1869_v14 = vpack.c.bf16 %v1854_v8, %v1853_v56  ;;  %v5419_v61 = vld [vmem:[%s5818_s21 + $0x230] sm:$0xff]  }
 0x172   : > { %v5426_v8 = vld [vmem:[%s5818_s21 + $0x190] sm:$0xff]  }
 0x173   : > { %2311 = vmatmul.mubr.bf16.gmra.mxu1 %v6169_v34  ;;  %5099 = vmatmul.mubr.bf16.gmra.mxu0 %v6171_v5 }
 0x174   : > { %4827 = vmatpush3.bf16.msra.mxu0 %v5399_v27  ;;  %2318 = vmatprep.mubr.bf16.mxu1 %v6174_v6 }
 0x175   : > { %4828 = vmatprep.subr.bf16.mxu0 %v5400_v28  ;;  %5102 = vmatprep.mubr.bf16.mxu0 %v6177_v7  ;;  %v5417_v28 = vld [vmem:[%s5818_s21 + $0x1e8] sm:$0xff]  }
 0x178   : > { %4829 = vmatpush3.bf16.msra.mxu0 %v5401_v10  ;;  %v5424_v10 = vld [vmem:[%s5818_s21 + $0x228] sm:$0xff]  }
 0x179   : > { %4830 = vmatprep.subr.bf16.mxu0 %v5402_v18 }
 0x17b   : > { %2319 = vmatmul.mubr.bf16.gmra.mxu1 %v6185_v25  ;;  %5103 = vmatmul.mubr.bf16.gmra.mxu0 %v6187_v29 }
 0x17c   : > { %4831 = vmatpush3.bf16.msra.mxu0 %v5404_v2  ;;  %2326 = vmatprep.mubr.bf16.mxu1 %v6190_v30  ;;  %v5429_v2 = vld [vmem:[%s5818_s21 + $0x220] sm:$0xff]  }
 0x17d   : > { %4832 = vmatprep.subr.bf16.mxu0 %v5405_v32  ;;  %5106 = vmatprep.mubr.bf16.mxu0 %v6193_v33 }
 0x180   : > { %4833 = vmatpush3.bf16.msra.mxu0 %v5406_v12  ;;  %v5421_v12 = vld [vmem:[%s5818_s21 + $0x1a0] sm:$0xff]  }
 0x181   : > { %4834 = vmatprep.subr.bf16.mxu0 %v5407_v41 }
 0x183   : > { %2327 = vmatmul.mubr.bf16.gmra.mxu1 %v6201_v49  ;;  %5107 = vmatmul.mubr.bf16.gmra.mxu0 %v6203_v50 }
 0x184   : > { %4835 = vmatpush3.bf16.msra.mxu0 %v5409_v52  ;;  %2608 = vmatprep.mubr.bf16.mxu0 %v1893_v46  ;;  %v5425_v52 = vld [vmem:[%s5818_s21 + $0x1d0] sm:$0xff]  }
 0x185   : > { %4836 = vmatprep.subr.bf16.mxu0 %v5410_v39  ;;  %5126 = vmatprep.mubr.bf16.mxu1 %v1917_v54  ;;  %v5432_v39 = vld [vmem:[%s5818_s21 + $0x218] sm:$0xff]  }
 0x188   : > { %4837 = vmatpush3.bf16.msra.mxu0 %v5411_v55 }
 0x189   : > { %5142 = vmatprep.subr.bf16.mxu0 %v5414_v0 }
 0x18b   : > { %v4518_v62 = vpop.f32.mrf.mxu0  ;;  %v5000_v63 = vpop.f32.mrf.mxu1  ;;  %2609 = vmatmul.mubr.bf16.vlgmr.msra.gmra.mxu0 %v1869_v14  ;;  %5127 = vmatmul.mubr.bf16.vlgmr.msra.gmra.mxu1 %v6098_v26 }
 0x18c   : > { %4903 = vmatpush3.bf16.msra.mxu1 %v5413_v59  ;;  %5143 = vmatpush3.bf16.msra.mxu0 %v5414_v0  ;;  %v5433_v0 = vld [vmem:[%s5818_s21 + $0x210] sm:$0xff]  }
 0x18d   : > { %v4519_v17 = vpop.f32.mrf.mxu0  ;;  %v958_v27 = vpop.f32.mrf.mxu1  ;;  %4904 = vmatprep.subr.bf16.mxu1 %v5415_v9  ;;  %2616 = vmatprep.mubr.bf16.mxu0 %v6102_v4  ;;  %v5427_v9 = vld [vmem:[%s5818_s21 + $0x1c8] sm:$0xff]  }
 0x18e   : > { %v4520_v11 = vadd.f32 %v4519_v17, %v4518_v62  ;;  %5130 = vmatprep.mubr.bf16.mxu1 %v6155_v48  ;;  %5144 = vmatprep.subr.bf16.mxu0 %v5419_v61  ;;  %v5428_v17 = vld [vmem:[%s5818_s21 + $0x188] sm:$0xff]  }
 0x18f   : > { %v4521_v15 = vpop.f32.mrf.mxu0  ;;  %v5001_v16 = vpop.f32.mrf.mxu1 }
 0x190   : > { %v6220_v26 = vadd.f32 %v4520_v11, %v958_v27  ;;  %4905 = vmatpush3.bf16.msra.mxu1 %v5416_v3  ;;  %5145 = vmatpush3.bf16.msra.mxu0 %v5419_v61 }
 0x191   : > { %v4522_v18 = vpop.f32.mrf.mxu0  ;;  %v961_v19 = vpop.f32.mrf.mxu1  ;;  %4906 = vmatprep.subr.bf16.mxu1 %v5417_v28  ;;  %5146 = vmatprep.subr.bf16.mxu0 %v5424_v10 }
 0x192   : > { %v4523_v4 = vadd.f32 %v4522_v18, %v4521_v15 }
 0x193   : > { %v4524_v22 = vpop.f32.mrf.mxu0  ;;  %v6224_v23 = vpop.f32.mrf.mxu1  ;;  %2617 = vmatmul.mubr.bf16.gmra.mxu0 %v6111_v38  ;;  %5131 = vmatmul.mubr.bf16.gmra.mxu1 %v6161_v58 }
 0x194   : > { %v6229_v32 = vadd.f32 %v4523_v4, %v961_v19  ;;  %4907 = vmatpush3.bf16.msra.mxu1 %v5418_v53  ;;  %2624 = vmatprep.mubr.bf16.mxu0 %v6113_v51  ;;  %v5434_v53 = vld [vmem:[%s5818_s21 + $0x208] sm:$0xff]   ;;  %v5431_v19 = vld [vmem:[%s5818_s21 + $0x180] sm:$0xff]  }
 0x195   : > { %v4525_v13 = vpop.f32.mrf.mxu0  ;;  %v974_v36 = vpop.f32.mrf.mxu1  ;;  %4908 = vmatprep.subr.bf16.mxu1 %v5420_v20  ;;  %5134 = vmatprep.mubr.bf16.mxu1 %v6171_v5 }
 0x196   : > { %v4526_v40 = vadd.f32 %v4525_v13, %v4524_v22  ;;  %5147 = vmatpush3.bf16.msra.mxu0 %v5424_v10  ;;  %v5430_v10 = vld [vmem:[%s5818_s21 + $0x1c0] sm:$0xff]  }
 0x197   : > { %v4527_v38 = vpop.f32.mrf.mxu0  ;;  %v6235_v41 = vpop.f32.mrf.mxu1  ;;  %5148 = vmatprep.subr.bf16.mxu0 %v5429_v2 }
 0x198   : > { %v6237_v21 = vadd.f32 %v5000_v63, %v4526_v40  ;;  %4909 = vmatpush3.bf16.msra.mxu1 %v5421_v12  ;;  %v5435_v40 = vld [vmem:[%s5818_s21 + $0x200] sm:$0xff]  }
 0x199   : > { %v4528_v45 = vpop.f32.mrf.mxu0  ;;  %v977_v47 = vpop.f32.mrf.mxu1  ;;  %4910 = vmatprep.subr.bf16.mxu1 %v5422_v37 }
 0x19a   : > { %v4529_v46 = vadd.f32 %v4528_v45, %v4527_v38  ;;  %5149 = vmatpush3.bf16.msra.mxu0 %v5429_v2 }
 0x19b   : > { %v4530_v54 = vpop.f32.mrf.mxu0  ;;  %v6242_v55 = vpop.f32.mrf.mxu1  ;;  %2625 = vmatmul.mubr.bf16.gmra.mxu0 %v6123_v24  ;;  %5135 = vmatmul.mubr.bf16.gmra.mxu1 %v6177_v7 }
 0x19c   : > { %v6246_v56 = vadd.f32 %v5001_v16, %v4529_v46  ;;  %4911 = vmatpush3.bf16.msra.mxu1 %v5423_v44  ;;  %2632 = vmatprep.mubr.bf16.mxu0 %v6125_v1 }
 0x19d   : > { %v4531_v14 = vpop.f32.mrf.mxu0  ;;  %v990_v59 = vpop.f32.mrf.mxu1  ;;  %4912 = vmatprep.subr.bf16.mxu1 %v5425_v52  ;;  %5138 = vmatprep.mubr.bf16.mxu1 %v6187_v29 }
 0x19e   : > { %v4532_v61 = vadd.f32 %v4531_v14, %v4530_v54  ;;  %5150 = vmatprep.subr.bf16.mxu0 %v5432_v39 }
 0x19f   : > { %v4533_v62 = vpop.f32.mrf.mxu0  ;;  %v6253_v63 = vpop.f32.mrf.mxu1  ;;  %5151 = vmatpush3.bf16.msra.mxu0 %v5432_v39 }
 0x1a0   : > { %v6255_v3 = vadd.f32 %v4532_v61, %v974_v36  ;;  %4913 = vmatpush3.bf16.msra.mxu1 %v5426_v8  ;;  %5152 = vmatprep.subr.bf16.mxu0 %v5433_v0 }
 0x1a1   : > { %v4534_v27 = vpop.f32.mrf.mxu0  ;;  %v993_v28 = vpop.f32.mrf.mxu1  ;;  %4914 = vmatprep.subr.bf16.mxu1 %v5427_v9 }
 0x1a2   : > { %v4535_v11 = vadd.f32 %v4534_v27, %v4533_v62 }
 0x1a3   : > { %v4536_v15 = vpop.f32.mrf.mxu0  ;;  %v6259_v16 = vpop.f32.mrf.mxu1  ;;  %2633 = vmatmul.mubr.bf16.gmra.mxu0 %v6133_v35  ;;  %5139 = vmatmul.mubr.bf16.gmra.mxu1 %v6193_v33 }
 0x1a4   : > { %v6264_v18 = vadd.f32 %v4535_v11, %v977_v47  ;;  %4915 = vmatpush3.bf16.msra.mxu1 %v5428_v17  ;;  %2640 = vmatprep.mubr.bf16.mxu0 %v6135_v31 }
 0x1a5   : > { %v4537_v20 = vpop.f32.mrf.mxu0  ;;  %v6268_v4 = vpop.f32.mrf.mxu1  ;;  %4916 = vmatprep.subr.bf16.mxu1 %v5430_v10  ;;  %3067 = vmatprep.mubr.bf16.mxu1 %v6113_v51 }
 0x1a6   : > { %v4538_v22 = vadd.f32 %v4537_v20, %v4536_v15  ;;  %5153 = vmatpush3.bf16.msra.mxu0 %v5433_v0 }
 0x1a7   : > { %v4539_v2 = vpop.f32.mrf.mxu0  ;;  %v6271_v12 = vpop.f32.mrf.mxu1  ;;  %5154 = vmatprep.subr.bf16.mxu0 %v5434_v53 }
 0x1a8   : > { %v6274_v13 = vadd.f32 %v6224_v23, %v4538_v22  ;;  %4917 = vmatpush3.bf16.msra.mxu1 %v5431_v19 }
 0x1a9   : > { %v4540_v36 = vpop.f32.mrf.mxu0  ;;  %v6276_v37 = vpop.f32.mrf.mxu1 }
 0x1aa   : > { %v4541_v38 = vadd.f32 %v4540_v36, %v4539_v2  ;;  %5155 = vmatpush3.bf16.msra.mxu0 %v5434_v53 }
 0x1ab   : > { %v4542_v44 = vpop.f32.mrf.mxu0  ;;  %v4598_v45 = vpop.f32.mrf.mxu1  ;;  %2641 = vmatmul.mubr.bf16.gmra.mxu0 %v6143_v42  ;;  %3068 = vmatmul.mubr.bf16.vlgmr.msra.gmra.mxu1 %v6123_v24 }
 0x1ac   : > { %v6282_v51 = vadd.f32 %v6235_v41, %v4541_v38  ;;  %2648 = vmatprep.mubr.bf16.mxu0 %v6145_v43  ;;  %3075 = vmatprep.mubr.bf16.mxu1 %v6125_v1 }
 0x1ad   : > { %v4543_v23 = vpop.f32.mrf.mxu0  ;;  %v4599_v47 = vpop.f32.mrf.mxu1  ;;  %5156 = vmatprep.subr.bf16.mxu0 %v5435_v40 }
 0x1ae   : > { %v4544_v52 = vadd.f32 %v4543_v23, %v4542_v44  ;;  %v4600_v46 = vadd.f32 %v4599_v47, %v4598_v45  ;;  %5157 = vmatpush3.bf16.msra.mxu0 %v5435_v40 }
 0x1af   : > { %v4545_v39 = vpop.f32.mrf.mxu0  ;;  %v4601_v54 = vpop.f32.mrf.mxu1 }
 0x1b0   : > { %v6286_v8 = vadd.f32 %v4544_v52, %v990_v59  ;;  %v6289_v0 = vadd.f32 %v4600_v46, %v6220_v26 }
 0x1b1   : > { %v4546_v24 = vpop.f32.mrf.mxu0  ;;  %v4602_v41 = vpop.f32.mrf.mxu1 }
 0x1b2   : > { %v4547_v14 = vadd.f32 %v4546_v24, %v4545_v39  ;;  %v4603_v9 = vadd.f32 %v4602_v41, %v4601_v54 }
 0x1b3   : > { %v4548_v61 = vpop.f32.mrf.mxu0  ;;  %v4604_v62 = vpop.f32.mrf.mxu1  ;;  %2649 = vmatmul.mubr.bf16.gmra.mxu0 %v6153_v57  ;;  %3076 = vmatmul.mubr.bf16.gmra.mxu1 %v6133_v35 }
 0x1b4   : > { %v6293_v1 = vadd.f32 %v4547_v14, %v993_v28  ;;  %2656 = vmatprep.mubr.bf16.mxu0 %v6158_v60  ;;  %3083 = vmatprep.mubr.bf16.mxu1 %v6135_v31  ;;  %v6298_v59 = vadd.f32 %v4603_v9, %v6229_v32 }
 0x1b5   : > { %v4549_v26 = vpop.f32.mrf.mxu0  ;;  %v4605_v17 = vpop.f32.mrf.mxu1 }
 0x1b6   : > { %v4550_v27 = vadd.f32 %v4549_v26, %v4548_v61  ;;  %v4606_v10 = vadd.f32 %v4605_v17, %v4604_v62 }
 0x1b7   : > { %v4551_v11 = vpop.f32.mrf.mxu0  ;;  %v4607_v15 = vpop.f32.mrf.mxu1 }
 0x1b8   : > { %v6301_v53 = vadd.f32 %v6242_v55, %v4550_v27  ;;  %v6304_v35 = vadd.f32 %v4606_v10, %v6237_v21 }
 0x1b9   : > { %v4552_v28 = vpop.f32.mrf.mxu0  ;;  %v4608_v19 = vpop.f32.mrf.mxu1 }
 0x1ba   : > { %v4553_v20 = vadd.f32 %v4552_v28, %v4551_v11  ;;  %v4609_v22 = vadd.f32 %v4608_v19, %v4607_v15 }
 0x1bb   : > { %v4554_v31 = vpop.f32.mrf.mxu0  ;;  %v4610_v2 = vpop.f32.mrf.mxu1  ;;  %2657 = vmatmul.mubr.bf16.gmra.mxu0 %v6169_v34  ;;  %3084 = vmatmul.mubr.bf16.gmra.mxu1 %v6143_v42 }
 0x1bc   : > { %v6309_v32 = vadd.f32 %v6253_v63, %v4553_v20  ;;  %2664 = vmatprep.mubr.bf16.mxu0 %v6174_v6  ;;  %3091 = vmatprep.mubr.bf16.mxu1 %v6145_v43  ;;  %v6314_v21 = vadd.f32 %v4609_v22, %v6246_v56  ;;  %v2809_v20 = vld [vmem:[#allocation2 + $0x228] sm:$0xff]  ;;  %v2810_v22 = vld [vmem:[#allocation2 + $0x230] sm:$0xff] }
 0x1bd   : > { %v4555_v55 = vpop.f32.mrf.mxu0  ;;  %v4611_v36 = vpop.f32.mrf.mxu1 }
 0x1be   : > { %v4556_v40 = vadd.f32 %v4555_v55, %v4554_v31  ;;  %v4612_v38 = vadd.f32 %v4611_v36, %v4610_v2 }
 0x1bf   : > { %v4557_v44 = vpop.f32.mrf.mxu0  ;;  %v4613_v45 = vpop.f32.mrf.mxu1 }
 0x1c0   : > { %v6317_v23 = vadd.f32 %v4556_v40, %v6268_v4  ;;  %v6320_v42 = vadd.f32 %v4612_v38, %v6255_v3  ;;  %v2785_v38 = vld [vmem:[#allocation2 + $0x227] sm:$0xff] }
 0x1c1   : > { %v4558_v63 = vpop.f32.mrf.mxu0  ;;  %v4614_v47 = vpop.f32.mrf.mxu1 }
 0x1c2   : > { %v4559_v52 = vadd.f32 %v4558_v63, %v4557_v44  ;;  %v4615_v46 = vadd.f32 %v4614_v47, %v4613_v45  ;;  %v2833_v45 = vld [vmem:[#allocation2 + $0x229] sm:$0xff]  ;;  %v2834_v63 = vld [vmem:[#allocation2 + $0x231] sm:$0xff] }
 0x1c3   : > { %v4560_v43 = vpop.f32.mrf.mxu0  ;;  %v4616_v39 = vpop.f32.mrf.mxu1  ;;  %2665 = vmatmul.mubr.bf16.gmra.mxu0 %v6185_v25  ;;  %3092 = vmatmul.mubr.bf16.gmra.mxu1 %v6153_v57 }
 0x1c4   : > { %v6325_v56 = vadd.f32 %v4559_v52, %v6276_v37  ;;  %3099 = vmatprep.mubr.bf16.mxu1 %v6158_v60  ;;  %5158 = vmatprep.mubr.bf16.mxu0 %v6155_v48  ;;  %v6330_v3 = vadd.f32 %v4615_v46, %v6264_v18 }
 0x1c5   : > { %v4561_v4 = vpop.f32.mrf.mxu0  ;;  %v4617_v54 = vpop.f32.mrf.mxu1 }
 0x1c6   : > { %v4562_v24 = vadd.f32 %v4561_v4, %v4560_v43  ;;  %v4618_v41 = vadd.f32 %v4617_v54, %v4616_v39  ;;  %v2842_v4 = vpack.c.bf16 %v2834_v63, %v2833_v45  ;;  %v3288_v45 = vld [vmem:[#allocation3 + $0x7] sm:$0xff] }
 0x1c7   : > { %v4563_v14 = vpop.f32.mrf.mxu0  ;;  %v4619_v9 = vpop.f32.mrf.mxu1  ;;  %v3266_v63 = vld [vmem:[#allocation3 + $0x26] sm:$0xff] }
 0x1c8   : > { %v6333_v61 = vadd.f32 %v6259_v16, %v4562_v24  ;;  %v6336_v57 = vadd.f32 %v4618_v41, %v6274_v13 }
 0x1c9   : > { %v4564_v37 = vpop.f32.mrf.mxu0  ;;  %v4620_v62 = vpop.f32.mrf.mxu1 }
 0x1ca   : > { %v4565_v60 = vadd.f32 %v4564_v37, %v4563_v14  ;;  %v4621_v26 = vadd.f32 %v4620_v62, %v4619_v9 }
 0x1cb   : > { %v4622_v48 = vpop.f32.mrf.mxu1  ;;  %v6338_v17 = vpop.f32.mrf.mxu0  ;;  %3100 = vmatmul.mubr.bf16.gmra.mxu1 %v6169_v34  ;;  %5159 = vmatmul.mubr.bf16.vlgmr.msra.gmra.mxu0 %v6161_v58 }
 0x1cc   : > { %v6343_v18 = vadd.f32 %v6271_v12, %v4565_v60  ;;  %3107 = vmatprep.mubr.bf16.mxu1 %v6174_v6  ;;  %5162 = vmatprep.mubr.bf16.mxu0 %v6171_v5  ;;  %v6348_v16 = vadd.f32 %v4621_v26, %v6282_v51 }
 0x1cd   : > { %v4623_v13 = vpop.f32.mrf.mxu1  ;;  %v6350_v27 = vpop.f32.mrf.mxu0 }
 0x1ce   : > { %v4624_v10 = vadd.f32 %v4623_v13, %v4622_v48 }
 0x1cf   : > { %v4625_v11 = vpop.f32.mrf.mxu1  ;;  %v6352_v15 = vpop.f32.mrf.mxu0 }
 0x1d0   : > { %v6355_v34 = vadd.f32 %v4624_v10, %v6286_v8 }
 0x1d1   : > { %v4626_v58 = vpop.f32.mrf.mxu1  ;;  %v6357_v12 = vpop.f32.mrf.mxu0 }
 0x1d2   : > { %v4627_v28 = vadd.f32 %v4626_v58, %v4625_v11 }
 0x1d3   : > { %v4628_v6 = vpop.f32.mrf.mxu1  ;;  %v6359_v19 = vpop.f32.mrf.mxu0  ;;  %3108 = vmatmul.mubr.bf16.gmra.mxu1 %v6185_v25  ;;  %5163 = vmatmul.mubr.bf16.gmra.mxu0 %v6177_v7  ;;  %v2818_v7 = vpack.c.bf16 %v2810_v22, %v2809_v20 }
 0x1d4   : > { %3115 = vmatprep.mubr.bf16.mxu1 %v6190_v30  ;;  %5166 = vmatprep.mubr.bf16.mxu0 %v6187_v29  ;;  %v6366_v5 = vadd.f32 %v4627_v28, %v6293_v1 }
 0x1d5   : > { %v4629_v51 = vpop.f32.mrf.mxu1  ;;  %v6368_v8 = vpop.f32.mrf.mxu0 }
 0x1d6   : > { %v4630_v31 = vadd.f32 %v4629_v51, %v4628_v6 }
 0x1d7   : > { %v4631_v2 = vpop.f32.mrf.mxu1  ;;  %v6370_v55 = vpop.f32.mrf.mxu0 }
 0x1d8   : > { %v6373_v25 = vadd.f32 %v4630_v31, %v6301_v53  ;;  %v2786_v53 = vld [vmem:[#allocation2 + $0x22f] sm:$0xff] }
 0x1d9   : > { %v4632_v36 = vpop.f32.mrf.mxu1  ;;  %v6375_v30 = vpop.f32.mrf.mxu0 }
 0x1da   : > { %v4633_v29 = vadd.f32 %v4632_v36, %v4631_v2 }
 0x1db   : > { %v4634_v40 = vpop.f32.mrf.mxu1  ;;  %v6377_v1 = vpop.f32.mrf.mxu0  ;;  %3116 = vmatmul.mubr.bf16.gmra.mxu1 %v6201_v49  ;;  %5167 = vmatmul.mubr.bf16.gmra.mxu0 %v6193_v33  ;;  %v2794_v49 = vpack.c.bf16 %v2786_v53, %v2785_v38  ;;  %v3264_v53 = vld [vmem:[#allocation3 + $0x6] sm:$0xff] }
 0x1dc   : > { %v6382_v44 = vadd.f32 %v4633_v29, %v6309_v32  ;;  %3123 = vmatprep.mubr.bf16.mxu1 %v2818_v7  ;;  %5170 = vmatprep.mubr.bf16.mxu0 %v6203_v50 }
 0x1dd   : > { %v4635_v47 = vpop.f32.mrf.mxu1  ;;  %v6385_v52 = vpop.f32.mrf.mxu0 }
 0x1de   : > { %v4636_v46 = vadd.f32 %v4635_v47, %v4634_v40  ;;  %v3290_v47 = vld [vmem:[#allocation3 + $0x27] sm:$0xff] }
 0x1df   : > { %v4637_v43 = vpop.f32.mrf.mxu1  ;;  %v6387_v39 = vpop.f32.mrf.mxu0 }
 0x1e0   : > { %v6390_v33 = vadd.f32 %v4636_v46, %v6317_v23 }
 0x1e1   : > { %v4638_v32 = vpop.f32.mrf.mxu1  ;;  %v6392_v54 = vpop.f32.mrf.mxu0 }
 0x1e2   : > { %v4639_v24 = vadd.f32 %v4638_v32, %v4637_v43  ;;  %v1300_v43 = vadd.f32 %v6357_v12, %v6298_v59  ;;  %v3289_v32 = vld [vmem:[#allocation3 + $0xf] sm:$0xff]  ;;  %v1305_v59 = vadd.f32 %v6338_v17, %v6304_v35  ;;  %v1308_v35 = vadd.f32 %v6352_v15, %v6314_v21 }
 0x1e3   : > { %v4640_v50 = vpop.f32.mrf.mxu1  ;;  %v5044_v41 = vpop.f32.mrf.mxu0  ;;  %3124 = vmatmul.mubr.bf16.gmra.mxu1 %v2794_v49  ;;  %5171 = vmatmul.mubr.bf16.gmra.mxu0 %v2842_v4  ;;  %v3265_v4 = vld [vmem:[#allocation3 + $0xe] sm:$0xff] }
 0x1e4   : > { %v6395_v14 = vadd.f32 %v4639_v24, %v6325_v56  ;;  %v3312_v24 = vmax.f32 %v3264_v53, %v3288_v45 }
 0x1e5   : > { %v4641_v9 = vpop.f32.mrf.mxu1  ;;  %v6397_v37 = vpop.f32.mrf.mxu0 }
 0x1e6   : > { %v4642_v62 = vadd.f32 %v4641_v9, %v4640_v50 }
 0x1e7   : > { %v4643_v60 = vpop.f32.mrf.mxu1  ;;  %v5045_v26 = vpop.f32.mrf.mxu0 }
 0x1e8   : > { %v1256_v23 = vadd.f32 %v4642_v62, %v6333_v61  ;;  %v1297_v61 = vadd.f32 %v6350_v27, %v6289_v0  ;;  %v3267_v0 = vld [vmem:[#allocation3 + $0x2e] sm:$0xff]  ;;  %v3314_v62 = vmax.f32 %v3266_v63, %v3290_v47 }
 0x1e9   : > { %v4644_v48 = vpop.f32.mrf.mxu1  ;;  %v6400_v13 = vpop.f32.mrf.mxu0  ;;  %v3291_v27 = vld [vmem:[#allocation3 + $0x2f] sm:$0xff] }
 0x1ea   : > { %v6402_v10 = vadd.f32 %v5044_v41, %v1256_v23  ;;  %v4645_v11 = vadd.f32 %v4644_v48, %v4643_v60  ;;  %v3336_v60 = vld [vmem:[#allocation3 + $0x8] sm:$0xff]  ;;  %v3313_v23 = vmax.f32 %v3265_v4, %v3289_v32  ;;  %v3315_v12 = vmax.f32 %v3267_v0, %v3291_v27  ;;  %v3387_v32 = vld [vmem:[#allocation3 + $0x31] sm:$0xff] }
 0x1eb   : > { %v4678_v58 = vpop.f32.mrf.mxu0  ;;  %v5064_v28 = vpop.f32.mrf.mxu1  ;;  %v3338_v48 = vld [vmem:[#allocation3 + $0x28] sm:$0xff] }
 0x1ec   : > { %v1259_v6 = vadd.f32 %v4645_v11, %v6343_v18  ;;  %v3386_v47 = vld [vmem:[#allocation3 + $0x29] sm:$0xff] }
 0x1ed   : > { %v4679_v56 = vpop.f32.mrf.mxu0  ;;  %v1756_v51 = vpop.f32.mrf.mxu1 }
 0x1ee   : > { %v6405_v20 = vadd.f32 %v5045_v26, %v1259_v6  ;;  %v4680_v22 = vadd.f32 %v4679_v56, %v4678_v58  ;;  %v3337_v6 = vld [vmem:[#allocation3 + $0x10] sm:$0xff] }
 0x1ef   : > { %v4681_v31 = vpop.f32.mrf.mxu0  ;;  %v5065_v2 = vpop.f32.mrf.mxu1  ;;  %v3361_v63 = vmax.f32 %v3313_v23, %v3337_v6 }
 0x1f0   : > { %v1757_v7 = vadd.f32 %v4680_v22, %v1756_v51  ;;  %v3339_v51 = vld [vmem:[#allocation3 + $0x30] sm:$0xff]  ;;  %v3360_v22 = vmax.f32 %v3312_v24, %v3336_v60 }
 0x1f1   : > { %v4682_v36 = vpop.f32.mrf.mxu0  ;;  %v1759_v29 = vpop.f32.mrf.mxu1  ;;  %v3432_v60 = vld [vmem:[#allocation3 + $0xa] sm:$0xff] }
 0x1f2   : > { %v1819_v40 = vadd.f32 %v1757_v7, %v1297_v61  ;;  %v4683_v38 = vadd.f32 %v4682_v36, %v4681_v31  ;;  %v3362_v7 = vmax.f32 %v3314_v62, %v3338_v48  ;;  %v3384_v36 = vld [vmem:[#allocation3 + $0x9] sm:$0xff] }
 0x1f3   : > { %v4684_v18 = vpop.f32.mrf.mxu0  ;;  %v6409_v46 = vpop.f32.mrf.mxu1  ;;  %v3408_v0 = vmax.f32 %v3360_v22, %v3384_v36 }
 0x1f4   : > { %1836 = vst [vmem:[#allocation3 + $0x48] sm:$0xff] %v1819_v40  ;;  %v1760_v49 = vadd.f32 %v4683_v38, %v1759_v29  ;;  %v3410_v62 = vmax.f32 %v3362_v7, %v3386_v47  ;;  %v3435_v7 = vld [vmem:[#allocation3 + $0x32] sm:$0xff] }
 0x1f5   : > { %v4685_v50 = vpop.f32.mrf.mxu0  ;;  %v1772_v41 = vpop.f32.mrf.mxu1  ;;  %v3456_v36 = vmax.f32 %v3408_v0, %v3432_v60 }
 0x1f6   : > { %v1820_v9 = vadd.f32 %v1760_v49, %v1300_v43  ;;  %v4686_v26 = vadd.f32 %v4685_v50, %v4684_v18  ;;  %v3385_v49 = vld [vmem:[#allocation3 + $0x11] sm:$0xff] }
 0x1f7   : > { %v4687_v11 = vpop.f32.mrf.mxu0  ;;  %v6413_v58 = vpop.f32.mrf.mxu1  ;;  %v3409_v21 = vmax.f32 %v3361_v63, %v3385_v49 }
 0x1f8   : > { %1837 = vst [vmem:[#allocation3 + $0x50] sm:$0xff] %v1820_v9  ;;  %v1765_v56 = vadd.f32 %v5064_v28, %v4686_v26  ;;  %v3363_v28 = vmax.f32 %v3315_v12, %v3339_v51  ;;  %v3434_v26 = vld [vmem:[#allocation3 + $0x2a] sm:$0xff] }
 0x1f9   : > { %v4688_v31 = vpop.f32.mrf.mxu0  ;;  %v1775_v61 = vpop.f32.mrf.mxu1  ;;  %v3458_v47 = vmax.f32 %v3410_v62, %v3434_v26 }
 0x1fa   : > { %v1821_v29 = vadd.f32 %v1765_v56, %v1305_v59  ;;  %v4689_v38 = vadd.f32 %v4688_v31, %v4687_v11  ;;  %v3411_v51 = vmax.f32 %v3363_v28, %v3387_v32  ;;  %v3433_v31 = vld [vmem:[#allocation3 + $0x12] sm:$0xff] }
 0x1fb   : > { %v3268_v53 = vld [vmem:[#allocation3 + $0x46] sm:$0xff]  ;;  %v4690_v18 = vpop.f32.mrf.mxu0  ;;  %v6417_v43 = vpop.f32.mrf.mxu1  ;;  %v3480_v26 = vmax.f32 %v3456_v36, %v3458_v47 }
 0x1fc   : > { %v3292_v45 = vld [vmem:[#allocation3 + $0x47] sm:$0xff]  ;;  %1838 = vst [vmem:[#allocation3 + $0x68] sm:$0xff] %v1821_v29  ;;  %v1768_v4 = vadd.f32 %v5065_v2, %v4689_v38  ;;  %v1313_v2 = vadd.f32 %v6368_v8, %v6320_v42 }
 0x1fd   : > { %v3316_v17 = vmax.f32 %v3268_v53, %v3292_v45  ;;  %v4691_v27 = vpop.f32.mrf.mxu0  ;;  %v6421_v24 = vpop.f32.mrf.mxu1 }
 0x1fe   : > { %v1822_v23 = vadd.f32 %v1768_v4, %v1308_v35  ;;  %v4692_v48 = vadd.f32 %v4691_v27, %v4690_v18  ;;  %v6433_v4 = vmax.f32 %v3411_v51, %v3435_v7 }
 0x1ff   : > { %v3364_v50 = vmax.f32 %v3316_v17, %v1819_v40  ;;  %v3269_v11 = vld [vmem:[#allocation3 + $0x4e] sm:$0xff]  ;;  %v4693_v15 = vpop.f32.mrf.mxu0  ;;  %v6423_v12 = vpop.f32.mrf.mxu1 }
 0x200   : > { %v3293_v59 = vld [vmem:[#allocation3 + $0x4f] sm:$0xff]  ;;  %1839 = vst [vmem:[#allocation3 + $0x70] sm:$0xff] %v1822_v23  ;;  %v1773_v22 = vadd.f32 %v4692_v48, %v1772_v41  ;;  %v3457_v41 = vmax.f32 %v3409_v21, %v3433_v31 }
 0x201   : > { %v3388_v6 = vld [vmem:[#allocation3 + $0x49] sm:$0xff]  ;;  %v3317_v56 = vmax.f32 %v3269_v11, %v3293_v59  ;;  %v4694_v38 = vpop.f32.mrf.mxu0  ;;  %v6427_v53 = vpop.f32.mrf.mxu1  ;;  %v3389_v8 = vld [vmem:[#allocation3 + $0x51] sm:$0xff] }
 0x202   : > { %v3412_v40 = vmax.f32 %v3364_v50, %v3388_v6  ;;  %v6429_v63 = vadd.f32 %v1773_v22, %v1313_v2  ;;  %v4695_v18 = vadd.f32 %v4694_v38, %v4693_v15  ;;  %v3436_v28 = vld [vmem:[#allocation3 + $0x4a] sm:$0xff]  ;;  %v3437_v51 = vld [vmem:[#allocation3 + $0x52] sm:$0xff] }
 0x203   : > { %v3365_v45 = vmax.f32 %v3317_v56, %v1820_v9  ;;  %v3270_v35 = vld [vmem:[#allocation3 + $0x66] sm:$0xff]  ;;  %v4696_v49 = vpop.f32.mrf.mxu0  ;;  %v6431_v42 = vpop.f32.mrf.mxu1  ;;  %v1316_v9 = vadd.f32 %v6375_v30, %v6330_v3  ;;  %v3481_v3 = vmax.f32 %v3457_v41, %v6433_v4 }
 0x204   : > { %v3294_v17 = vld [vmem:[#allocation3 + $0x67] sm:$0xff]  ;;  %1840 = vst [vmem:[#allocation3 + $0x88] sm:$0xff] %v6429_v63  ;;  %v6438_v27 = vmax.f32 %v3412_v40, %v3436_v28  ;;  %v1776_v50 = vadd.f32 %v4695_v18, %v1775_v61  ;;  %v1321_v61 = vadd.f32 %v6359_v19, %v6336_v57 }
 0x205   : > { %v3318_v32 = vmax.f32 %v3270_v35, %v3294_v17  ;;  %v3413_v0 = vmax.f32 %v3365_v45, %v3389_v8  ;;  %v4697_v62 = vpop.f32.mrf.mxu0  ;;  %v6440_v60 = vpop.f32.mrf.mxu1 }
 0x206   : > { %v4698_v11 = vadd.f32 %v4697_v62, %v4696_v49  ;;  %v1824_v15 = vadd.f32 %v1776_v50, %v1316_v9  ;;  %v6454_v45 = vmax.f32 %v3480_v26, %v6438_v27  ;;  %v1324_v9 = vadd.f32 %v6370_v55, %v6348_v16 }
 0x207   : > { %v3366_v48 = vmax.f32 %v3318_v32, %v1821_v29  ;;  %v3271_v59 = vld [vmem:[#allocation3 + $0x6e] sm:$0xff]  ;;  %v4699_v2 = vpop.f32.mrf.mxu0  ;;  %v6442_v56 = vpop.f32.mrf.mxu1  ;;  %v6447_v40 = vmax.f32 %v3413_v0, %v3437_v51  ;;  %v3482_v29 = vmax.f32 %v3458_v47, %v6438_v27  ;;  %v1329_v16 = vadd.f32 %v6385_v52, %v6355_v34 }
 0x208   : > { %v3295_v6 = vld [vmem:[#allocation3 + $0x6f] sm:$0xff]  ;;  %1841 = vst [vmem:[#allocation3 + $0x90] sm:$0xff] %v1824_v15  ;;  %v1781_v7 = vadd.f32 %v6409_v46, %v4698_v11 }
 0x209   : > { %v3390_v21 = vld [vmem:[#allocation3 + $0x69] sm:$0xff]  ;;  %v3319_v30 = vmax.f32 %v3271_v59, %v3295_v6  ;;  %v4700_v36 = vpop.f32.mrf.mxu0  ;;  %v6451_v38 = vpop.f32.mrf.mxu1  ;;  %v3391_v49 = vld [vmem:[#allocation3 + $0x71] sm:$0xff]  ;;  %v3483_v0 = vmax.f32 %v6433_v4, %v6447_v40  ;;  %v6474_v11 = vmax.f32 %v3481_v3, %v6447_v40 }
 0x20a   : > { %v3414_v22 = vmax.f32 %v3366_v48, %v3390_v21  ;;  %v3438_v31 = vld [vmem:[#allocation3 + $0x6a] sm:$0xff]  ;;  %v4701_v17 = vadd.f32 %v4700_v36, %v4699_v2  ;;  %v6458_v8 = vadd.f32 %v1781_v7, %v1321_v61  ;;  %v3439_v50 = vld [vmem:[#allocation3 + $0x72] sm:$0xff] }
 0x20b   : > { %v3367_v18 = vmax.f32 %v3319_v30, %v1822_v23  ;;  %v3272_v57 = vld [vmem:[#allocation3 + $0x86] sm:$0xff]  ;;  %v4702_v47 = vpop.f32.mrf.mxu0  ;;  %v4758_v28 = vpop.f32.mrf.mxu1 }
 0x20c   : > { %v6456_v35 = vmax.f32 %v3414_v22, %v3438_v31  ;;  %v3296_v19 = vld [vmem:[#allocation3 + $0x87] sm:$0xff]  ;;  %1842 = vst [vmem:[#allocation3 + $0xa8] sm:$0xff] %v6458_v8  ;;  %v1784_v26 = vadd.f32 %v6413_v58, %v4701_v17 }
 0x20d   : > { %v3415_v41 = vmax.f32 %v3367_v18, %v3391_v49  ;;  %v3320_v62 = vmax.f32 %v3272_v57, %v3296_v19  ;;  %v4703_v48 = vpop.f32.mrf.mxu0 }
 0x20e   : > { %v3484_v46 = vmax.f32 %v6438_v27, %v6456_v35  ;;  %v6463_v32 = vmax.f32 %v3482_v29, %v6456_v35  ;;  %v3512_v23 = vmax.f32 %v6454_v45, %v6456_v35  ;;  %v4759_v27 = vpop.f32.mrf.mxu1  ;;  %v4704_v6 = vadd.f32 %v4703_v48, %v4702_v47 }
 0x20f   : > { %v6476_v59 = vmax.f32 %v3415_v41, %v3439_v50  ;;  %v6478_v21 = vadd.f32 %v4759_v27, %v4758_v28  ;;  %v3368_v55 = vmax.f32 %v3320_v62, %v6429_v63  ;;  %v6483_v4 = vadd.f32 %v1784_v26, %v1324_v9  ;;  %v4705_v2 = vpop.f32.mrf.mxu0  ;;  %v3273_v22 = vld [vmem:[#allocation3 + $0x8e] sm:$0xff]  ;;  %v3544_v26 = vld [vmem:[%s5824_s30] sm:$0xff] }
 0x210   : > { %v4761_v51 = vpop.f32.mrf.mxu1  ;;  %v3297_v61 = vld [vmem:[#allocation3 + $0x8f] sm:$0xff]  ;;  %v1789_v34 = vadd.f32 %v4704_v6, %v6421_v24  ;;  %v1332_v24 = vadd.f32 %v6392_v54, %v6366_v5 }
 0x211   : > { %v3485_v58 = vmax.f32 %v6447_v40, %v6476_v59  ;;  %v6488_v3 = vmax.f32 %v3483_v0, %v6476_v59  ;;  %v3513_v30 = vmax.f32 %v6474_v11, %v6476_v59  ;;  %v3392_v29 = vld [vmem:[#allocation3 + $0x89] sm:$0xff]  ;;  %v3321_v52 = vmax.f32 %v3273_v22, %v3297_v61  ;;  %1843 = vst [vmem:[#allocation3 + $0xb0] sm:$0xff] %v6483_v4  ;;  %v4706_v31 = vpop.f32.mrf.mxu0  ;;  %v3393_v47 = vld [vmem:[#allocation3 + $0x91] sm:$0xff] }
 0x212   : > { %v3416_v63 = vmax.f32 %v3368_v55, %v3392_v29  ;;  %v4762_v7 = vpop.f32.mrf.mxu1  ;;  %v3440_v36 = vld [vmem:[#allocation3 + $0x8a] sm:$0xff]  ;;  %v6494_v45 = vadd.f32 %v1789_v34, %v1329_v16  ;;  %v4707_v40 = vadd.f32 %v4706_v31, %v4705_v2  ;;  %v3441_v48 = vld [vmem:[#allocation3 + $0x92] sm:$0xff] }
 0x213   : > { %v6496_v18 = vadd.f32 %v4762_v7, %v4761_v51  ;;  %v3369_v17 = vmax.f32 %v3321_v52, %v1824_v15  ;;  %v4708_v57 = vpop.f32.mrf.mxu0  ;;  %v3274_v28 = vld [vmem:[#allocation3 + $0xa6] sm:$0xff] }
 0x214   : > { %v6498_v49 = vmax.f32 %v3416_v63, %v3440_v36  ;;  %v4764_v19 = vpop.f32.mrf.mxu1  ;;  %v3298_v41 = vld [vmem:[#allocation3 + $0xa7] sm:$0xff]  ;;  %1844 = vst [vmem:[#allocation3 + $0xc8] sm:$0xff] %v6494_v45  ;;  %v1792_v9 = vadd.f32 %v4707_v40, %v6427_v53 }
 0x215   : > { %v3417_v0 = vmax.f32 %v3369_v17, %v3393_v47  ;;  %v4709_v5 = vpop.f32.mrf.mxu0  ;;  %v3322_v11 = vmax.f32 %v3274_v28, %v3298_v41 }
 0x216   : > { %v3486_v50 = vmax.f32 %v6456_v35, %v6498_v49  ;;  %v6507_v15 = vmax.f32 %v3484_v46, %v6498_v49  ;;  %v3514_v62 = vmax.f32 %v6463_v32, %v6498_v49  ;;  %v4765_v54 = vpop.f32.mrf.mxu1  ;;  %v6513_v27 = vmax.f32 %v3512_v23, %v6498_v49  ;;  %v3545_v35 = vld [vmem:[%s5824_s30 + $0x8] sm:$0xff] }
 0x217   : > { %v6515_v6 = vadd.f32 %v1792_v9, %v1332_v24  ;;  %v4710_v53 = vadd.f32 %v4709_v5, %v4708_v57  ;;  %v6517_v16 = vmax.f32 %v3417_v0, %v3441_v48  ;;  %v6520_v55 = vadd.f32 %v4765_v54, %v4764_v19  ;;  %v4711_v46 = vpop.f32.mrf.mxu0 }
 0x218   : > { %v4767_v2 = vpop.f32.mrf.mxu1  ;;  %v1337_v32 = vadd.f32 %v6377_v1, %v6373_v25  ;;  %v3560_v51 = vadd.f32 %v3544_v26, %v6513_v27  ;;  %v3370_v23 = vmax.f32 %v3322_v11, %v6458_v8  ;;  %v3275_v22 = vld [vmem:[#allocation3 + $0xae] sm:$0xff]  ;;  %v1340_v9 = vadd.f32 %v6387_v39, %v6382_v44 }
 0x219   : > { %v3299_v61 = vld [vmem:[#allocation3 + $0xaf] sm:$0xff]  ;;  %1845 = vst [vmem:[#allocation3 + $0xd0] sm:$0xff] %v6515_v6  ;;  %v1797_v34 = vadd.f32 %v6417_v43, %v4710_v53  ;;  %v3487_v52 = vmax.f32 %v6476_v59, %v6517_v16  ;;  %v6531_v63 = vmax.f32 %v3485_v58, %v6517_v16  ;;  %v3515_v25 = vmax.f32 %v6488_v3, %v6517_v16  ;;  %v4712_v8 = vpop.f32.mrf.mxu0 }
 0x21a   : > { %v3394_v29 = vld [vmem:[#allocation3 + $0xa9] sm:$0xff]  ;;  %v6536_v1 = vmax.f32 %v3513_v30, %v6517_v16  ;;  %v4768_v31 = vpop.f32.mrf.mxu1  ;;  %3576 = vst [vmem:[%s5824_s30] sm:$0xff] %v3560_v51  ;;  %v3323_v7 = vmax.f32 %v3275_v22, %v3299_v61  ;;  %v4713_v43 = vadd.f32 %v4712_v8, %v4711_v46  ;;  %v3395_v0 = vld [vmem:[#allocation3 + $0xb1] sm:$0xff] }
 0x21b   : > { %v3418_v36 = vmax.f32 %v3370_v23, %v3394_v29  ;;  %v6539_v40 = vadd.f32 %v1797_v34, %v1337_v32  ;;  %v3442_v17 = vld [vmem:[#allocation3 + $0xaa] sm:$0xff]  ;;  %v6542_v19 = vadd.f32 %v4768_v31, %v4767_v2  ;;  %v4714_v3 = vpop.f32.mrf.mxu0  ;;  %v3443_v48 = vld [vmem:[#allocation3 + $0xb2] sm:$0xff] }
 0x21c   : > { %v3561_v59 = vadd.f32 %v3545_v35, %v6536_v1  ;;  %v3276_v58 = vld [vmem:[#allocation3 + $0xc6] sm:$0xff]  ;;  %v4770_v24 = vpop.f32.mrf.mxu1  ;;  %v3371_v30 = vmax.f32 %v3323_v7, %v6483_v4  ;;  %v1800_v41 = vadd.f32 %v6423_v12, %v4713_v43  ;;  %v3546_v12 = vld [vmem:[%s5824_s30 + $0x10] sm:$0xff] }
 0x21d   : > { %v3300_v57 = vld [vmem:[#allocation3 + $0xc7] sm:$0xff]  ;;  %v6545_v47 = vmax.f32 %v3418_v36, %v3442_v17  ;;  %1846 = vst [vmem:[#allocation3 + $0xe8] sm:$0xff] %v6539_v40  ;;  %v4715_v26 = vpop.f32.mrf.mxu0 }
 0x21e   : > { %v3324_v28 = vmax.f32 %v3276_v58, %v3300_v57  ;;  %3577 = vst [vmem:[%s5824_s30 + $0x8] sm:$0xff] %v3561_v59  ;;  %v4771_v5 = vpop.f32.mrf.mxu1  ;;  %v3419_v54 = vmax.f32 %v3371_v30, %v3395_v0  ;;  %v6564_v32 = vadd.f32 %v1800_v41, %v1340_v9  ;;  %v4716_v51 = vadd.f32 %v4715_v26, %v4714_v3  ;;  %v3548_v30 = vld [vmem:[%s5824_s30 + $0x20] sm:$0xff] }
 0x21f   : > { %v3488_v11 = vmax.f32 %v6498_v49, %v6545_v47  ;;  %v6555_v4 = vmax.f32 %v3486_v50, %v6545_v47  ;;  %v3516_v53 = vmax.f32 %v6507_v15, %v6545_v47  ;;  %v6561_v35 = vmax.f32 %v3514_v62, %v6545_v47  ;;  %v4717_v49 = vpop.f32.mrf.mxu0  ;;  %v3547_v62 = vld [vmem:[%s5824_s30 + $0x18] sm:$0xff] }
 0x220   : > { %v3372_v44 = vmax.f32 %v3324_v28, %v6494_v45  ;;  %v3277_v39 = vld [vmem:[#allocation3 + $0xce] sm:$0xff]  ;;  %v4773_v23 = vpop.f32.mrf.mxu1  ;;  %v6566_v50 = vmax.f32 %v3419_v54, %v3443_v48  ;;  %v6568_v61 = vadd.f32 %v4771_v5, %v4770_v24  ;;  %v1345_v15 = vadd.f32 %v6397_v37, %v6390_v33  ;;  %1847 = vst [vmem:[#allocation3 + $0xf0] sm:$0xff] %v6564_v32 }
 0x221   : > { %v3301_v46 = vld [vmem:[#allocation3 + $0xcf] sm:$0xff]  ;;  %v3562_v45 = vadd.f32 %v3546_v12, %v6561_v35  ;;  %v1805_v34 = vadd.f32 %v4716_v51, %v6440_v60  ;;  %v4718_v8 = vpop.f32.mrf.mxu0 }
 0x222   : > { %v3396_v2 = vld [vmem:[#allocation3 + $0xc9] sm:$0xff]  ;;  %v3325_v22 = vmax.f32 %v3277_v39, %v3301_v46  ;;  %v4774_v31 = vpop.f32.mrf.mxu1  ;;  %v3489_v7 = vmax.f32 %v6517_v16, %v6566_v50  ;;  %v6579_v36 = vmax.f32 %v3487_v52, %v6566_v50  ;;  %v3517_v33 = vmax.f32 %v6531_v63, %v6566_v50  ;;  %v3397_v24 = vld [vmem:[#allocation3 + $0xd1] sm:$0xff] }
 0x223   : > { %v3420_v29 = vmax.f32 %v3372_v44, %v3396_v2  ;;  %v6584_v37 = vmax.f32 %v3515_v25, %v6566_v50  ;;  %v3444_v43 = vld [vmem:[#allocation3 + $0xca] sm:$0xff]  ;;  %3578 = vst [vmem:[%s5824_s30 + $0x10] sm:$0xff] %v3562_v45  ;;  %v6590_v57 = vadd.f32 %v1805_v34, %v1345_v15  ;;  %v4719_v16 = vadd.f32 %v4718_v8, %v4717_v49  ;;  %v4720_v52 = vpop.f32.mrf.mxu0  ;;  %v3445_v5 = vld [vmem:[#allocation3 + $0xd2] sm:$0xff] }
 0x224   : > { %v3373_v59 = vmax.f32 %v3325_v22, %v6515_v6  ;;  %v3278_v17 = vld [vmem:[#allocation3 + $0xe6] sm:$0xff]  ;;  %v4776_v3 = vpop.f32.mrf.mxu1  ;;  %v1348_v63 = vadd.f32 %v6400_v13, %v6395_v14  ;;  %v6596_v6 = vadd.f32 %v4774_v31, %v4773_v23 }
 0x225   : > { %v6588_v60 = vmax.f32 %v3420_v29, %v3444_v43  ;;  %v3302_v58 = vld [vmem:[#allocation3 + $0xe7] sm:$0xff]  ;;  %v3563_v25 = vadd.f32 %v3547_v62, %v6584_v37  ;;  %1848 = vst [vmem:[#allocation3 + $0x108] sm:$0xff] %v6590_v57  ;;  %v1808_v26 = vadd.f32 %v4719_v16, %v6451_v38  ;;  %v4721_v14 = vpop.f32.mrf.mxu0 }
 0x226   : > { %v3326_v28 = vmax.f32 %v3278_v17, %v3302_v58  ;;  %v3421_v41 = vmax.f32 %v3373_v59, %v3397_v24  ;;  %v4777_v13 = vpop.f32.mrf.mxu1  ;;  %v4722_v12 = vadd.f32 %v4721_v14, %v4720_v52  ;;  %v3550_v17 = vld [vmem:[%s5824_s30 + $0x30] sm:$0xff] }
 0x227   : > { %v3518_v9 = vmax.f32 %v6555_v4, %v6588_v60  ;;  %v6601_v0 = vmax.f32 %v3516_v53, %v6588_v60  ;;  %3579 = vst [vmem:[%s5824_s30 + $0x18] sm:$0xff] %v3563_v25  ;;  %v6608_v48 = vmax.f32 %v3488_v11, %v6588_v60  ;;  %v6610_v44 = vadd.f32 %v4777_v13, %v4776_v3  ;;  %v3549_v53 = vld [vmem:[%s5824_s30 + $0x28] sm:$0xff]  ;;  %v4723_v38 = vpop.f32.mrf.mxu0  ;;  %v3399_v52 = vld [vmem:[#allocation3 + $0xf1] sm:$0xff] }
 0x228   : > { %v3374_v54 = vmax.f32 %v3326_v28, %v6539_v40  ;;  %v6612_v4 = vmax.f32 %v3421_v41, %v3445_v5  ;;  %v6616_v46 = vadd.f32 %v1808_v26, %v1348_v63  ;;  %v4779_v2 = vpop.f32.mrf.mxu1  ;;  %v3490_v51 = vmax.f32 %v6545_v47, %v6588_v60  ;;  %v3279_v40 = vld [vmem:[#allocation3 + $0xee] sm:$0xff]  ;;  %v3551_v5 = vld [vmem:[%s5824_s30 + $0x38] sm:$0xff] }
 0x229   : > { %v3564_v39 = vadd.f32 %v3548_v30, %v6601_v0  ;;  %v3303_v49 = vld [vmem:[#allocation3 + $0xef] sm:$0xff]  ;;  %v1813_v23 = vadd.f32 %v6431_v42, %v4722_v12  ;;  %v4724_v29 = vpop.f32.mrf.mxu0 }
 0x22a   : > { %v3398_v11 = vld [vmem:[#allocation3 + $0xe9] sm:$0xff]  ;;  %v3519_v22 = vmax.f32 %v6579_v36, %v6612_v4  ;;  %v6624_v15 = vmax.f32 %v3517_v33, %v6612_v4  ;;  %v3327_v62 = vmax.f32 %v3279_v40, %v3303_v49  ;;  %1849 = vst [vmem:[#allocation3 + $0x110] sm:$0xff] %v6616_v46  ;;  %v4780_v34 = vpop.f32.mrf.mxu1  ;;  %v6629_v8 = vmax.f32 %v3489_v7, %v6612_v4  ;;  %v3447_v26 = vld [vmem:[#allocation3 + $0xf2] sm:$0xff] }
 0x22b   : > { %3580 = vst [vmem:[%s5824_s30 + $0x20] sm:$0xff] %v3564_v39  ;;  %v3422_v45 = vmax.f32 %v3374_v54, %v3398_v11  ;;  %v3446_v47 = vld [vmem:[#allocation3 + $0xea] sm:$0xff]  ;;  %v6632_v42 = vadd.f32 %v1813_v23, %v6402_v10  ;;  %v4725_v31 = vadd.f32 %v4724_v29, %v4723_v38  ;;  %v3491_v36 = vmax.f32 %v6566_v50, %v6612_v4  ;;  %v5096_v7 = vpop.f32.mrf.mxu0 }
 0x22c   : > { %v3565_v33 = vadd.f32 %v3549_v53, %v6624_v15  ;;  %v3375_v43 = vmax.f32 %v3327_v62, %v6564_v32  ;;  %v6641_v58 = vadd.f32 %v4780_v34, %v4779_v2  ;;  %v4782_v16 = vpop.f32.mrf.mxu1  ;;  %v3280_v3 = vld [vmem:[#allocation3 + $0x106] sm:$0xff]  ;;  %v6646_v50 = vadd.f32 %v5096_v7, %v6520_v55 }
 0x22d   : > { %v6638_v59 = vmax.f32 %v3422_v45, %v3446_v47  ;;  %v3304_v10 = vld [vmem:[#allocation3 + $0x107] sm:$0xff]  ;;  %1850 = vst [vmem:[#allocation3 + $0x128] sm:$0xff] %v6632_v42  ;;  %v1816_v63 = vadd.f32 %v6442_v56, %v4725_v31  ;;  %v2369_v41 = vpop.f32.mrf.mxu0 }
 0x22e   : > { %3581 = vst [vmem:[%s5824_s30 + $0x28] sm:$0xff] %v3565_v33  ;;  %v3423_v32 = vmax.f32 %v3375_v43, %v3399_v52  ;;  %v3328_v24 = vmax.f32 %v3280_v3, %v3304_v10  ;;  %v4783_v28 = vpop.f32.mrf.mxu1 }
 0x22f   : > { %v6650_v25 = vmax.f32 %v3518_v9, %v6638_v59  ;;  %v3520_v30 = vmax.f32 %v6608_v48, %v6638_v59  ;;  %v6655_v14 = vadd.f32 %v1816_v63, %v6405_v20  ;;  %v6658_v56 = vmax.f32 %v3490_v51, %v6638_v59  ;;  %v5097_v20 = vpop.f32.mrf.mxu0 }
 0x230   : > { %v6660_v55 = vadd.f32 %v4783_v28, %v4782_v16  ;;  %v6663_v9 = vadd.f32 %v6478_v21, %v2369_v41  ;;  %v6665_v13 = vmax.f32 %v3423_v32, %v3447_v26  ;;  %v3376_v48 = vmax.f32 %v3328_v24, %v6590_v57  ;;  %v4785_v12 = vpop.f32.mrf.mxu1 }
 0x231   : > { %v3566_v54 = vadd.f32 %v3550_v17, %v6650_v25  ;;  %v3492_v53 = vmax.f32 %v6588_v60, %v6638_v59  ;;  %v3281_v39 = vld [vmem:[#allocation3 + $0x10e] sm:$0xff]  ;;  %1851 = vst [vmem:[#allocation3 + $0x130] sm:$0xff] %v6655_v14  ;;  %v6674_v21 = vadd.f32 %v5097_v20, %v6542_v19  ;;  %v2372_v11 = vpop.f32.mrf.mxu0 }
 0x232   : > { %v3305_v38 = vld [vmem:[#allocation3 + $0x10f] sm:$0xff]  ;;  %v6678_v51 = vmax.f32 %v3519_v22, %v6665_v13  ;;  %v3521_v49 = vmax.f32 %v6629_v8, %v6665_v13  ;;  %v4786_v60 = vpop.f32.mrf.mxu1  ;;  %v6684_v62 = vmax.f32 %v3491_v36, %v6665_v13  ;;  %v6689_v45 = vadd.f32 %v6496_v18, %v2372_v11  ;;  %v3552_v36 = vld [vmem:[%s5824_s30 + $0x40] sm:$0xff] }
 0x233   : > { %v3400_v2 = vld [vmem:[#allocation3 + $0x109] sm:$0xff]  ;;  %3582 = vst [vmem:[%s5824_s30 + $0x30] sm:$0xff] %v3566_v54  ;;  %v3329_v40 = vmax.f32 %v3281_v39, %v3305_v38  ;;  %v6686_v19 = vadd.f32 %v4786_v60, %v4785_v12  ;;  %v3493_v22 = vmax.f32 %v6612_v4, %v6665_v13  ;;  %v5100_v43 = vpop.f32.mrf.mxu0  ;;  %v3401_v17 = vld [vmem:[#allocation3 + $0x111] sm:$0xff] }
 0x234   : > { %v3424_v57 = vmax.f32 %v3376_v48, %v3400_v2  ;;  %v3448_v23 = vld [vmem:[#allocation3 + $0x10a] sm:$0xff]  ;;  %v3567_v29 = vadd.f32 %v3551_v5, %v6678_v51  ;;  %v4788_v33 = vpop.f32.mrf.mxu1  ;;  %v6697_v7 = vadd.f32 %v5100_v43, %v6610_v44  ;;  %v3449_v63 = vld [vmem:[#allocation3 + $0x112] sm:$0xff] }
 0x235   : > { %v3377_v34 = vmax.f32 %v3329_v40, %v6616_v46  ;;  %v3282_v8 = vld [vmem:[#allocation3 + $0x126] sm:$0xff]  ;;  %v2385_v46 = vpop.f32.mrf.mxu0 }
 0x236   : > { %v3472_v47 = vmax.f32 %v3424_v57, %v3448_v23  ;;  %v3306_v31 = vld [vmem:[#allocation3 + $0x127] sm:$0xff]  ;;  %3583 = vst [vmem:[%s5824_s30 + $0x38] sm:$0xff] %v3567_v29  ;;  %v4789_v3 = vpop.f32.mrf.mxu1  ;;  %v6706_v28 = vadd.f32 %v6568_v61, %v2385_v46 }
 0x237   : > { %v3330_v16 = vmax.f32 %v3282_v8, %v3306_v31  ;;  %v3425_v18 = vmax.f32 %v3377_v34, %v3401_v17  ;;  %v4790_v24 = vadd.f32 %v4789_v3, %v4788_v33  ;;  %v5101_v48 = vpop.f32.mrf.mxu0  ;;  %v3553_v12 = vld [vmem:[%s5824_s30 + $0x48] sm:$0xff]  ;;  %v3554_v34 = vld [vmem:[%s5824_s30 + $0x50] sm:$0xff] }
 0x238   : > { %v6700_v52 = vmax.f32 %v3520_v30, %v3472_v47  ;;  %v3522_v4 = vmax.f32 %v6658_v56, %v3472_v47  ;;  %v3494_v10 = vmax.f32 %v6638_v59, %v3472_v47  ;;  %v6708_v44 = vmax.f32 %v3492_v53, %v3472_v47  ;;  %v3283_v26 = vld [vmem:[#allocation3 + $0x12e] sm:$0xff]  ;;  %v4791_v54 = vpop.f32.mrf.mxu1 }
 0x239   : > { %v3378_v32 = vmax.f32 %v3330_v16, %v6632_v42  ;;  %v3473_v41 = vmax.f32 %v3425_v18, %v3449_v63  ;;  %v3307_v56 = vld [vmem:[#allocation3 + $0x12f] sm:$0xff]  ;;  %v6713_v42 = vadd.f32 %v5101_v48, %v6641_v58  ;;  %v2388_v2 = vpop.f32.mrf.mxu0 }
 0x23a   : > { %7162 = vst [vmem:[#allocation18_spill] sm:$0xff] %v6700_v52  ;;  %v3568_v30 = vadd.f32 %v3552_v36, %v6700_v52  ;;  %v3402_v5 = vld [vmem:[#allocation3 + $0x129] sm:$0xff]  ;;  %v3331_v59 = vmax.f32 %v3283_v26, %v3307_v56  ;;  %v4792_v38 = vpop.f32.mrf.mxu1  ;;  %v6726_v58 = vadd.f32 %v6596_v6, %v2388_v2  ;;  %v3403_v29 = vld [vmem:[#allocation3 + $0x131] sm:$0xff] }
 0x23b   : > { %v3426_v20 = vmax.f32 %v3378_v32, %v3402_v5  ;;  %v6715_v39 = vmax.f32 %v3521_v49, %v3473_v41  ;;  %v3450_v61 = vld [vmem:[#allocation3 + $0x12a] sm:$0xff]  ;;  %v3523_v53 = vmax.f32 %v6684_v62, %v3473_v41  ;;  %v3495_v40 = vmax.f32 %v6665_v13, %v3473_v41  ;;  %v5104_v47 = vpop.f32.mrf.mxu0  ;;  %v3451_v6 = vld [vmem:[#allocation3 + $0x132] sm:$0xff] }
 0x23c   : > { %3584 = vst [vmem:[%s5824_s30 + $0x40] sm:$0xff] %v3568_v30  ;;  %v6720_v57 = vmax.f32 %v3493_v22, %v3473_v41  ;;  %v3379_v60 = vmax.f32 %v3331_v59, %v6655_v14  ;;  %v4793_v23 = vadd.f32 %v4792_v38, %v4791_v54  ;;  %v4794_v62 = vpop.f32.mrf.mxu1  ;;  %v6733_v22 = vadd.f32 %v5104_v47, %v4790_v24 }
 0x23d   : > { %7163 = vst [vmem:[#allocation19_spill] sm:$0xff] %v6715_v39  ;;  %v6723_v11 = vmax.f32 %v3426_v20, %v3450_v61  ;;  %v3569_v49 = vadd.f32 %v3553_v12, %v6715_v39  ;;  %v2401_v33 = vpop.f32.mrf.mxu0 }
 0x23e   : > { %v3427_v8 = vmax.f32 %v3379_v60, %v3403_v29  ;;  %v4795_v31 = vpop.f32.mrf.mxu1  ;;  %v6745_v18 = vadd.f32 %v6660_v55, %v2401_v33 }
 0x23f   : > { %v6731_v13 = vmax.f32 %v3522_v4, %v6723_v11  ;;  %v6736_v14 = vmax.f32 %v3494_v10, %v6723_v11  ;;  %3585 = vst [vmem:[%s5824_s30 + $0x48] sm:$0xff] %v3569_v49  ;;  %v4796_v16 = vadd.f32 %v4795_v31, %v4794_v62  ;;  %v3555_v4 = vld [vmem:[%s5824_s30 + $0x58] sm:$0xff]  ;;  %v5105_v46 = vpop.f32.mrf.mxu0 }
 0x240   : > { %v6741_v17 = vmax.f32 %v3427_v8, %v3451_v6  ;;  %v4797_v3 = vpop.f32.mrf.mxu1  ;;  %v6752_v63 = vadd.f32 %v5105_v46, %v4793_v23 }
 0x241   : > { %7164 = vst [vmem:[#allocation20_spill] sm:$0xff] %v6731_v13  ;;  %v3570_v36 = vadd.f32 %v3554_v34, %v6731_v13  ;;  %v2404_v30 = vpop.f32.mrf.mxu0 }
 0x242   : > { %v6749_v10 = vmax.f32 %v3523_v53, %v6741_v17  ;;  %v6755_v32 = vmax.f32 %v3495_v40, %v6741_v17  ;;  %v4798_v41 = vpop.f32.mrf.mxu1  ;;  %v6761_v56 = vadd.f32 %v6686_v19, %v2404_v30 }
 0x243   : > { %3586 = vst [vmem:[%s5824_s30 + $0x50] sm:$0xff] %v3570_v36  ;;  %v4799_v26 = vadd.f32 %v4798_v41, %v4797_v3  ;;  %v5108_v54 = vpop.f32.mrf.mxu0 }
 0x244   : > { %7165 = vst [vmem:[#allocation21_spill] sm:$0xff] %v6749_v10  ;;  %v3571_v55 = vadd.f32 %v3555_v4, %v6749_v10  ;;  %v4800_v5 = vpop.f32.mrf.mxu1 }
 0x245   : > { %v2417_v12 = vpop.f32.mrf.mxu0 }
 0x246   : > { %3587 = vst [vmem:[%s5824_s30 + $0x58] sm:$0xff] %v3571_v55  ;;  %v4801_v48 = vpop.f32.mrf.mxu1  ;;  %v6764_v20 = vadd.f32 %v4796_v16, %v2417_v12 }
 0x247   : > { %v4802_v59 = vadd.f32 %v4801_v48, %v4800_v5  ;;  %v5109_v53 = vpop.f32.mrf.mxu0 }
 0x248   : > { %v4803_v61 = vpop.f32.mrf.mxu1 }
 0x249   : > { %v6766_v38 = vadd.f32 %v5108_v54, %v4802_v59  ;;  %v2420_v40 = vpop.f32.mrf.mxu0 }
 0x24a   : > { %v4804_v2 = vpop.f32.mrf.mxu1  ;;  %v6768_v23 = vadd.f32 %v4799_v26, %v2420_v40 }
 0x24b   : > { %v4805_v60 = vadd.f32 %v4804_v2, %v4803_v61  ;;  %v4838_v49 = vpop.f32.mrf.mxu0 }
 0x24c   : > { %v5128_v19 = vpop.f32.mrf.mxu1 }
 0x24d   : > { %v6770_v29 = vadd.f32 %v5109_v53, %v4805_v60  ;;  %v4839_v34 = vpop.f32.mrf.mxu0 }
 0x24e   : > { %v2707_v62 = vpop.f32.mrf.mxu1  ;;  %v4840_v47 = vadd.f32 %v4839_v34, %v4838_v49 }
 0x24f   : > { %v4841_v8 = vpop.f32.mrf.mxu0 }
 0x250   : > { %v5129_v6 = vpop.f32.mrf.mxu1  ;;  %v2611_v31 = vadd.f32 %v4840_v47, %v6663_v9 }
 0x251   : > { %v4842_v33 = vpop.f32.mrf.mxu0 }
 0x252   : > { %v2710_v36 = vpop.f32.mrf.mxu1  ;;  %v6773_v16 = vadd.f32 %v2707_v62, %v2611_v31  ;;  %v4843_v4 = vadd.f32 %v4842_v33, %v4841_v8 }
 0x253   : > { %v4844_v3 = vpop.f32.mrf.mxu0 }
 0x254   : > { %v5132_v46 = vpop.f32.mrf.mxu1  ;;  %v2614_v41 = vadd.f32 %v4843_v4, %v6689_v45 }
 0x255   : > { %v4845_v30 = vpop.f32.mrf.mxu0 }
 0x256   : > { %v2723_v55 = vpop.f32.mrf.mxu1  ;;  %v6776_v26 = vadd.f32 %v2710_v36, %v2614_v41  ;;  %v4846_v5 = vadd.f32 %v4845_v30, %v4844_v3 }
 0x257   : > { %v4847_v54 = vpop.f32.mrf.mxu0 }
 0x258   : > { %v5133_v48 = vpop.f32.mrf.mxu1  ;;  %v2619_v12 = vadd.f32 %v4846_v5, %v6646_v50 }
 0x259   : > { %v4848_v59 = vpop.f32.mrf.mxu0 }
 0x25a   : > { %v2726_v9 = vpop.f32.mrf.mxu1  ;;  %v4849_v61 = vadd.f32 %v4848_v59, %v4847_v54  ;;  %v6779_v53 = vadd.f32 %v5128_v19, %v2619_v12 }
 0x25b   : > { %v4850_v2 = vpop.f32.mrf.mxu0 }
 0x25c   : > { %v5136_v40 = vpop.f32.mrf.mxu1  ;;  %v2622_v60 = vadd.f32 %v4849_v61, %v6674_v21 }
 0x25d   : > { %v4851_v49 = vpop.f32.mrf.mxu0 }
 0x25e   : > { %v2739_v45 = vpop.f32.mrf.mxu1  ;;  %v4852_v34 = vadd.f32 %v4851_v49, %v4850_v2  ;;  %v6782_v62 = vadd.f32 %v5129_v6, %v2622_v60 }
 0x25f   : > { %v4853_v47 = vpop.f32.mrf.mxu0 }
 0x260   : > { %v5137_v8 = vpop.f32.mrf.mxu1  ;;  %v2627_v31 = vadd.f32 %v4852_v34, %v6706_v28 }
 0x261   : > { %v4854_v33 = vpop.f32.mrf.mxu0 }
 0x262   : > { %v2742_v50 = vpop.f32.mrf.mxu1  ;;  %v4855_v36 = vadd.f32 %v4854_v33, %v4853_v47  ;;  %v6785_v4 = vadd.f32 %v2723_v55, %v2627_v31 }
 0x263   : > { %v4856_v19 = vpop.f32.mrf.mxu0 }
 0x264   : > { %v6787_v3 = vpop.f32.mrf.mxu1  ;;  %v2630_v41 = vadd.f32 %v4855_v36, %v6726_v58 }
 0x265   : > { %v4857_v21 = vpop.f32.mrf.mxu0 }
 0x266   : > { %v2755_v30 = vpop.f32.mrf.mxu1  ;;  %v4858_v5 = vadd.f32 %v4857_v21, %v4856_v19  ;;  %v6790_v54 = vadd.f32 %v2726_v9, %v2630_v41 }
 0x267   : > { %v4859_v6 = vpop.f32.mrf.mxu0 }
 0x268   : > { %v6792_v12 = vpop.f32.mrf.mxu1  ;;  %v2635_v28 = vadd.f32 %v4858_v5, %v6697_v7 }
 0x269   : > { %v4860_v59 = vpop.f32.mrf.mxu0 }
 0x26a   : > { %v2758_v61 = vpop.f32.mrf.mxu1  ;;  %v4861_v2 = vadd.f32 %v4860_v59, %v4859_v6  ;;  %v6795_v55 = vadd.f32 %v5132_v46, %v2635_v28 }
 0x26b   : > { %v4862_v60 = vpop.f32.mrf.mxu0 }
 0x26c   : > { %v4918_v49 = vpop.f32.mrf.mxu1  ;;  %v2638_v34 = vadd.f32 %v4861_v2, %v6713_v42 }
 0x26d   : > { %v4863_v58 = vpop.f32.mrf.mxu0 }
 0x26e   : > { %v4919_v47 = vpop.f32.mrf.mxu1  ;;  %v4864_v31 = vadd.f32 %v4863_v58, %v4862_v60  ;;  %v6798_v33 = vadd.f32 %v5133_v48, %v2638_v34 }
 0x26f   : > { %v4865_v9 = vpop.f32.mrf.mxu0 }
 0x270   : > { %v4921_v36 = vpop.f32.mrf.mxu1  ;;  %v2643_v19 = vadd.f32 %v4864_v31, %v6745_v18 }
 0x271   : > { %v4866_v41 = vpop.f32.mrf.mxu0 }
 0x272   : > { %v4922_v7 = vpop.f32.mrf.mxu1  ;;  %v4867_v21 = vadd.f32 %v4866_v41, %v4865_v9  ;;  %v6801_v5 = vadd.f32 %v2739_v45, %v2643_v19 }
 0x273   : > { %v4868_v46 = vpop.f32.mrf.mxu0 }
 0x274   : > { %v4924_v6 = vpop.f32.mrf.mxu1  ;;  %v2646_v28 = vadd.f32 %v4867_v21, %v6761_v56 }
 0x275   : > { %v4869_v59 = vpop.f32.mrf.mxu0 }
 0x276   : > { %v4925_v42 = vpop.f32.mrf.mxu1  ;;  %v4870_v2 = vadd.f32 %v4869_v59, %v4868_v46  ;;  %v6804_v24 = vadd.f32 %v2742_v50, %v2646_v28 }
 0x277   : > { %v4871_v48 = vpop.f32.mrf.mxu0 }
 0x278   : > { %v4927_v60 = vpop.f32.mrf.mxu1  ;;  %v2651_v34 = vadd.f32 %v4870_v2, %v6733_v22 }
 0x279   : > { %v4872_v58 = vpop.f32.mrf.mxu0 }
 0x27a   : > { %v4928_v18 = vpop.f32.mrf.mxu1  ;;  %v4873_v31 = vadd.f32 %v4872_v58, %v4871_v48  ;;  %v6807_v43 = vadd.f32 %v5136_v40, %v2651_v34 }
 0x27b   : > { %v4874_v45 = vpop.f32.mrf.mxu0 }
 0x27c   : > { %v4930_v9 = vpop.f32.mrf.mxu1  ;;  %v2654_v19 = vadd.f32 %v4873_v31, %v6752_v63 }
 0x27d   : > { %v4875_v41 = vpop.f32.mrf.mxu0 }
 0x27e   : > { %v4931_v56 = vpop.f32.mrf.mxu1  ;;  %v4876_v21 = vadd.f32 %v4875_v41, %v4874_v45  ;;  %v6810_v10 = vadd.f32 %v5137_v8, %v2654_v19 }
 0x27f   : > { %v4877_v50 = vpop.f32.mrf.mxu0 }
 0x280   : > { %v6812_v46 = vpop.f32.mrf.mxu1  ;;  %v2659_v28 = vadd.f32 %v4876_v21, %v6764_v20  ;;  %v4926_v21 = vadd.f32 %v4925_v42, %v4924_v6 }
 0x281   : > { %v4878_v22 = vpop.f32.mrf.mxu0 }
 0x282   : > { %v4934_v59 = vpop.f32.mrf.mxu1  ;;  %v4879_v2 = vadd.f32 %v4878_v22, %v4877_v50  ;;  %v6815_v48 = vadd.f32 %v2755_v30, %v2659_v28 }
 0x283   : > { %v4880_v40 = vpop.f32.mrf.mxu0 }
 0x284   : > { %v4936_v34 = vpop.f32.mrf.mxu1  ;;  %v2662_v58 = vadd.f32 %v4879_v2, %v6768_v23  ;;  %v4920_v23 = vadd.f32 %v4919_v47, %v4918_v49 }
 0x285   : > { %v4881_v63 = vpop.f32.mrf.mxu0 }
 0x286   : > { %v4937_v31 = vpop.f32.mrf.mxu1  ;;  %v4882_v13 = vadd.f32 %v4881_v63, %v4880_v40  ;;  %v6818_v45 = vadd.f32 %v2758_v61, %v2662_v58  ;;  %v4929_v63 = vadd.f32 %v4928_v18, %v4927_v60 }
 0x287   : > { %v4883_v8 = vpop.f32.mrf.mxu0 }
 0x288   : > { %v4939_v19 = vpop.f32.mrf.mxu1  ;;  %v2667_v41 = vadd.f32 %v4882_v13, %v6766_v38 }
 0x289   : > { %v4884_v39 = vpop.f32.mrf.mxu0 }
 0x28a   : > { %v4940_v20 = vpop.f32.mrf.mxu1  ;;  %v6822_v50 = vadd.f32 %v6787_v3, %v2667_v41  ;;  %v4885_v30 = vadd.f32 %v4884_v39, %v4883_v8  ;;  %v4923_v39 = vadd.f32 %v4922_v7, %v4921_v36  ;;  %v4938_v8 = vadd.f32 %v4937_v31, %v4936_v34 }
 0x28b   : > { %v5160_v22 = vpop.f32.mrf.mxu0 }
 0x28c   : > { %v6824_v28 = vpop.f32.mrf.mxu1  ;;  %v2670_v2 = vadd.f32 %v4885_v30, %v6770_v29  ;;  %v3175_v40 = vadd.f32 %v5160_v22, %v4926_v21  ;;  %v4941_v22 = vadd.f32 %v4940_v20, %v4939_v19 }
 0x28d   : > { %v3166_v58 = vpop.f32.mrf.mxu0 }
 0x28e   : > { %v4943_v61 = vpop.f32.mrf.mxu1  ;;  %v6828_v52 = vadd.f32 %v6792_v12, %v2670_v2  ;;  %v3231_v13 = vadd.f32 %v3175_v40, %v6779_v53  ;;  %v3167_v38 = vadd.f32 %v4920_v23, %v3166_v58  ;;  %v4932_v53 = vadd.f32 %v4931_v56, %v4930_v9 }
 0x28f   : > { %v5161_v3 = vpop.f32.mrf.mxu0  ;;  %v4935_v56 = vadd.f32 %v4934_v59, %v6812_v46  ;;  %v4944_v59 = vadd.f32 %v4943_v61, %v6824_v28 }
 0x290   : > { %v6831_v6 = vpop.f32.mrf.mxu1  ;;  %3248 = vst [vmem:[#allocation3 + $0x168] sm:$0xff] %v3231_v13  ;;  %v3229_v42 = vadd.f32 %v3167_v38, %v6773_v16  ;;  %v3178_v49 = vadd.f32 %v5161_v3, %v4929_v63 }
 0x291   : > { %v3169_v29 = vpop.f32.mrf.mxu0 }
 0x292   : > { %v6834_v47 = vpop.f32.mrf.mxu1  ;;  %3246 = vst [vmem:[#allocation3 + $0x148] sm:$0xff] %v3229_v42  ;;  %v3232_v60 = vadd.f32 %v3178_v49, %v6782_v62  ;;  %v3170_v12 = vadd.f32 %v4923_v39, %v3169_v29 }
 0x293   : > { %v5164_v41 = vpop.f32.mrf.mxu0 }
 0x294   : > { %v4948_v18 = vpop.f32.mrf.mxu1  ;;  %3249 = vst [vmem:[#allocation3 + $0x170] sm:$0xff] %v3232_v60  ;;  %v3230_v21 = vadd.f32 %v3170_v12, %v6776_v26  ;;  %v3191_v30 = vadd.f32 %v5164_v41, %v4938_v8 }
 0x295   : > { %v3182_v7 = vpop.f32.mrf.mxu0 }
 0x296   : > { %v4949_v36 = vpop.f32.mrf.mxu1  ;;  %3247 = vst [vmem:[#allocation3 + $0x150] sm:$0xff] %v3230_v21  ;;  %v3235_v16 = vadd.f32 %v3191_v30, %v6795_v55  ;;  %v3183_v23 = vadd.f32 %v4932_v53, %v3182_v7 }
 0x297   : > { %v3286_v2 = vld [vmem:[#allocation3 + $0x166] sm:$0xff]  ;;  %v5165_v40 = vpop.f32.mrf.mxu0  ;;  %v4950_v39 = vadd.f32 %v4949_v36, %v4948_v18 }
 0x298   : > { %v3310_v34 = vld [vmem:[#allocation3 + $0x167] sm:$0xff]  ;;  %v4951_v31 = vpop.f32.mrf.mxu1  ;;  %3252 = vst [vmem:[#allocation3 + $0x1a8] sm:$0xff] %v3235_v16  ;;  %v3233_v58 = vadd.f32 %v3183_v23, %v6785_v4  ;;  %v3194_v9 = vadd.f32 %v5165_v40, %v4941_v22 }
 0x299   : > { %v3334_v62 = vmax.f32 %v3286_v2, %v3310_v34  ;;  %v3284_v26 = vld [vmem:[#allocation3 + $0x146] sm:$0xff]  ;;  %v3185_v3 = vpop.f32.mrf.mxu0 }
 0x29a   : > { %v3308_v63 = vld [vmem:[#allocation3 + $0x147] sm:$0xff]  ;;  %v4952_v38 = vpop.f32.mrf.mxu1  ;;  %3250 = vst [vmem:[#allocation3 + $0x188] sm:$0xff] %v3233_v58  ;;  %v3236_v55 = vadd.f32 %v3194_v9, %v6798_v33  ;;  %v3186_v12 = vadd.f32 %v4935_v56, %v3185_v3 }
 0x29b   : > { %v3382_v19 = vmax.f32 %v3334_v62, %v3231_v13  ;;  %v3332_v20 = vmax.f32 %v3284_v26, %v3308_v63  ;;  %v3287_v49 = vld [vmem:[#allocation3 + $0x16e] sm:$0xff]  ;;  %v5168_v53 = vpop.f32.mrf.mxu0  ;;  %v4953_v16 = vadd.f32 %v4952_v38, %v4951_v31  ;;  %v3556_v3 = vld [vmem:[%s5824_s30 + $0x60] sm:$0xff] }
 0x29c   : > { %v3311_v29 = vld [vmem:[#allocation3 + $0x16f] sm:$0xff]  ;;  %v4954_v41 = vpop.f32.mrf.mxu1  ;;  %3253 = vst [vmem:[#allocation3 + $0x1b0] sm:$0xff] %v3236_v55  ;;  %v3207_v46 = vadd.f32 %v5168_v53, %v4950_v39  ;;  %v3234_v18 = vadd.f32 %v3186_v12, %v6790_v54 }
 0x29d   : > { %v3406_v8 = vld [vmem:[#allocation3 + $0x169] sm:$0xff]  ;;  %v3380_v4 = vmax.f32 %v3332_v20, %v3229_v42  ;;  %v3335_v30 = vmax.f32 %v3287_v49, %v3311_v29  ;;  %v3198_v33 = vpop.f32.mrf.mxu0  ;;  %v3407_v61 = vld [vmem:[#allocation3 + $0x171] sm:$0xff]  ;;  %v7166_v49 = vmax.f32 %v6708_v44, %v6723_v11 }
 0x29e   : > { %v3285_v7 = vld [vmem:[#allocation3 + $0x14e] sm:$0xff]  ;;  %v4955_v36 = vpop.f32.mrf.mxu1  ;;  %v3430_v2 = vmax.f32 %v3382_v19, %v3406_v8  ;;  %3251 = vst [vmem:[#allocation3 + $0x190] sm:$0xff] %v3234_v18  ;;  %v3239_v42 = vadd.f32 %v3207_v46, %v6807_v43  ;;  %v3199_v58 = vadd.f32 %v4944_v59, %v3198_v33 }
 0x29f   : > { %v3309_v22 = vld [vmem:[#allocation3 + $0x14f] sm:$0xff]  ;;  %v3383_v23 = vmax.f32 %v3335_v30, %v3232_v60  ;;  %v5169_v28 = vpop.f32.mrf.mxu0  ;;  %v4947_v60 = vadd.f32 %v6834_v47, %v6831_v6  ;;  %v4956_v44 = vadd.f32 %v4955_v36, %v4954_v41 }
 0x2a0   : > { %v3404_v13 = vld [vmem:[#allocation3 + $0x149] sm:$0xff]  ;;  %v3333_v34 = vmax.f32 %v3285_v7, %v3309_v22  ;;  %v4957_v9 = vpop.f32.mrf.mxu1  ;;  %v3210_v31 = vadd.f32 %v5169_v28, %v4953_v16  ;;  %v3405_v38 = vld [vmem:[#allocation3 + $0x151] sm:$0xff]  ;;  %3256 = vst [vmem:[#allocation3 + $0x1e8] sm:$0xff] %v3239_v42  ;;  %v3237_v19 = vadd.f32 %v3199_v58, %v6801_v5  ;;  %v7167_v16 = vmax.f32 %v6720_v57, %v6741_v17 }
 0x2a1   : > { %v3428_v40 = vmax.f32 %v3380_v4, %v3404_v13  ;;  %v3452_v62 = vld [vmem:[#allocation3 + $0x14a] sm:$0xff]  ;;  %v3431_v54 = vmax.f32 %v3383_v23, %v3407_v61  ;;  %v3201_v43 = vpop.f32.mrf.mxu0  ;;  %v3453_v8 = vld [vmem:[#allocation3 + $0x152] sm:$0xff] }
 0x2a2   : > { %v3381_v56 = vmax.f32 %v3333_v34, %v3230_v21  ;;  %v3454_v63 = vld [vmem:[#allocation3 + $0x16a] sm:$0xff]  ;;  %v4958_v20 = vpop.f32.mrf.mxu1  ;;  %3254 = vst [vmem:[#allocation3 + $0x1c8] sm:$0xff] %v3237_v19  ;;  %v3240_v6 = vadd.f32 %v3210_v31, %v6810_v10  ;;  %v3202_v47 = vadd.f32 %v4947_v60, %v3201_v43  ;;  %v3455_v4 = vld [vmem:[#allocation3 + $0x172] sm:$0xff] }
 0x2a3   : > { %v3476_v26 = vmax.f32 %v3428_v40, %v3452_v62  ;;  %v3478_v39 = vmax.f32 %v3430_v2, %v3454_v63  ;;  %v3558_v12 = vld [vmem:[%s5824_s30 + $0x70] sm:$0xff]  ;;  %v5172_v5 = vpop.f32.mrf.mxu0  ;;  %v3479_v59 = vmax.f32 %v3431_v54, %v3455_v4  ;;  %v3557_v7 = vld [vmem:[%s5824_s30 + $0x68] sm:$0xff]  ;;  %v3559_v2 = vld [vmem:[%s5824_s30 + $0x78] sm:$0xff]  ;;  %v4959_v62 = vadd.f32 %v4958_v20, %v4957_v9 }
 0x2a4   : > { %v3429_v55 = vmax.f32 %v3381_v56, %v3405_v38  ;;  %v4960_v53 = vpop.f32.mrf.mxu1  ;;  %3257 = vst [vmem:[#allocation3 + $0x1f0] sm:$0xff] %v3240_v6  ;;  %v3238_v11 = vadd.f32 %v3202_v47, %v6804_v24 }
 0x2a5   : > { %v3526_v21 = vmax.f32 %v6736_v14, %v3476_v26  ;;  %v6853_v29 = vmax.f32 %v7166_v49, %v3476_v26  ;;  %v3214_v13 = vpop.f32.mrf.mxu0 }
 0x2a6   : > { %v3477_v30 = vmax.f32 %v3429_v55, %v3453_v8  ;;  %v4961_v22 = vpop.f32.mrf.mxu1  ;;  %3255 = vst [vmem:[#allocation3 + $0x1d0] sm:$0xff] %v3238_v11  ;;  %v3215_v34 = vadd.f32 %v4956_v44, %v3214_v13 }
 0x2a7   : > { %v3542_v46 = vmax.f32 %v3526_v21, %v3478_v39  ;;  %v3572_v14 = vadd.f32 %v3556_v3, %v6853_v29  ;;  %v4962_v23 = vadd.f32 %v4961_v22, %v4960_v53  ;;  %v5173_v36 = vpop.f32.mrf.mxu0 }
 0x2a8   : > { %v3527_v10 = vmax.f32 %v6755_v32, %v3477_v30  ;;  %v3541_v18 = vmax.f32 %v7167_v16, %v3477_v30  ;;  %v4963_v41 = vpop.f32.mrf.mxu1  ;;  %v3241_v32 = vadd.f32 %v3215_v34, %v6815_v48 }
 0x2a9   : > { %v3574_v33 = vadd.f32 %v3558_v12, %v3542_v46  ;;  %3588 = vst [vmem:[%s5824_s30 + $0x60] sm:$0xff] %v3572_v14  ;;  %v3223_v42 = vadd.f32 %v5172_v5, %v4962_v23  ;;  %v3217_v57 = vpop.f32.mrf.mxu0 }
 0x2aa   : > { %v3543_v40 = vmax.f32 %v3527_v10, %v3479_v59  ;;  %v3573_v24 = vadd.f32 %v3557_v7, %v3541_v18  ;;  %v4964_v58 = vpop.f32.mrf.mxu1  ;;  %v3218_v56 = vadd.f32 %v4959_v62, %v3217_v57  ;;  %3258 = vst [vmem:[#allocation3 + $0x208] sm:$0xff] %v3241_v32 }
 0x2ab   : > { %3590 = vst [vmem:[%s5824_s30 + $0x70] sm:$0xff] %v3574_v33  ;;  %v3243_v28 = vadd.f32 %v3223_v42, %v6822_v50  ;;  %v4965_v61 = vadd.f32 %v4964_v58, %v4963_v41 }
 0x2ac   : > { %v3575_v17 = vadd.f32 %v3559_v2, %v3543_v40  ;;  %3589 = vst [vmem:[%s5824_s30 + $0x68] sm:$0xff] %v3573_v24  ;;  %v3242_v31 = vadd.f32 %v3218_v56, %v6818_v45 }
 0x2ad   : > { %3260 = vst [vmem:[#allocation3 + $0x228] sm:$0xff] %v3243_v28  ;;  %v3226_v26 = vadd.f32 %v5173_v36, %v4965_v61  ;;  %3594 = sbr.rel (%p6875_p6) target bundleno = 698 (0x2ba), region = 44 }
 0x2ae   : > { %3591 = vst [vmem:[%s5824_s30 + $0x78] sm:$0xff] %v3575_v17  ;;  %3259 = vst [vmem:[#allocation3 + $0x210] sm:$0xff] %v3242_v31 }
 0x2af   : > { %v3244_v54 = vadd.f32 %v3226_v26, %v6828_v52 }
 0x2b1   : > { %3261 = vst [vmem:[#allocation3 + $0x230] sm:$0xff] %v3244_v54 }
 0x2b2   : > { %3595 = vst [vmem:[#allocation2 + $0x28] sm:$0xff] %v6513_v27  ;;  %3596 = vst [vmem:[#allocation2 + $0x30] sm:$0xff] %v6536_v1  ;;  %v7169_v52 = vld [vmem:[#allocation18_spill] sm:$0xff]  ;;  %v7170_v48 = vld [vmem:[#allocation19_spill] sm:$0xff] }
 0x2b3   : > { %3597 = vst [vmem:[#allocation2 + $0x48] sm:$0xff] %v6561_v35  ;;  %3598 = vst [vmem:[#allocation2 + $0x50] sm:$0xff] %v6584_v37  ;;  %v7171_v45 = vld [vmem:[#allocation20_spill] sm:$0xff]  ;;  %v7172_v27 = vld [vmem:[#allocation21_spill] sm:$0xff] }
 0x2b4   : > { %3599 = vst [vmem:[#allocation2 + $0x68] sm:$0xff] %v6601_v0  ;;  %3600 = vst [vmem:[#allocation2 + $0x70] sm:$0xff] %v6624_v15 }
 0x2b5   : > { %3601 = vst [vmem:[#allocation2 + $0x88] sm:$0xff] %v6650_v25  ;;  %3602 = vst [vmem:[#allocation2 + $0x90] sm:$0xff] %v6678_v51 }
 0x2b6   : > { %3603 = vst [vmem:[#allocation2 + $0xa8] sm:$0xff] %v7169_v52  ;;  %3604 = vst [vmem:[#allocation2 + $0xb0] sm:$0xff] %v7170_v48 }
 0x2b7   : > { %3605 = vst [vmem:[#allocation2 + $0xc8] sm:$0xff] %v7171_v45  ;;  %3606 = vst [vmem:[#allocation2 + $0xd0] sm:$0xff] %v7172_v27 }
 0x2b8   : > { %3607 = vst [vmem:[#allocation2 + $0xe8] sm:$0xff] %v6853_v29  ;;  %3608 = vst [vmem:[#allocation2 + $0xf0] sm:$0xff] %v3541_v18 }
 0x2b9   : > { %3609 = vst [vmem:[#allocation2 + $0x108] sm:$0xff] %v3542_v46  ;;  %3610 = vst [vmem:[#allocation2 + $0x110] sm:$0xff] %v3543_v40 }
 0x2ba PF: > { %v3612_v1 = vld [vmem:[#allocation3 + $0x106] sm:$0xff]  ;;  %v3613_v18 = vld [vmem:[#allocation3 + $0x10e] sm:$0xff] }
 0x2bb   : > { %v3614_v35 = vld [vmem:[#allocation3 + $0x126] sm:$0xff]  ;;  %v3615_v2 = vld [vmem:[#allocation3 + $0x12e] sm:$0xff] }
 0x2bc   : > { %v3616_v37 = vld [vmem:[#allocation3 + $0x146] sm:$0xff]  ;;  %v3617_v34 = vld [vmem:[#allocation3 + $0x14e] sm:$0xff] }
 0x2bd   : > { %v3618_v0 = vld [vmem:[#allocation3 + $0x166] sm:$0xff]  ;;  %v3619_v41 = vld [vmem:[#allocation3 + $0x16e] sm:$0xff] }
 0x2be   : > { %v3620_v15 = vld [vmem:[#allocation3 + $0x186] sm:$0xff]  ;;  %v3621_v24 = vld [vmem:[#allocation3 + $0x18e] sm:$0xff] }
 0x2bf   : > { %v3636_v25 = vld [vmem:[#allocation3 + $0x107] sm:$0xff]  ;;  %v3637_v62 = vld [vmem:[#allocation3 + $0x10f] sm:$0xff] }
 0x2c0   : > { %v3638_v51 = vld [vmem:[#allocation3 + $0x127] sm:$0xff]  ;;  %v3660_v63 = vmax.f32 %v3612_v1, %v3636_v25  ;;  %v3639_v42 = vld [vmem:[#allocation3 + $0x12f] sm:$0xff]  ;;  %v3661_v61 = vmax.f32 %v3613_v18, %v3637_v62 }
 0x2c1   : > { %v3640_v50 = vld [vmem:[#allocation3 + $0x147] sm:$0xff]  ;;  %v3662_v38 = vmax.f32 %v3614_v35, %v3638_v51  ;;  %v3641_v57 = vld [vmem:[#allocation3 + $0x14f] sm:$0xff]  ;;  %v3663_v56 = vmax.f32 %v3615_v2, %v3639_v42 }
 0x2c2   : > { %v3642_v9 = vld [vmem:[#allocation3 + $0x167] sm:$0xff]  ;;  %v3664_v3 = vmax.f32 %v3616_v37, %v3640_v50  ;;  %v3643_v17 = vld [vmem:[#allocation3 + $0x16f] sm:$0xff]  ;;  %v3665_v26 = vmax.f32 %v3617_v34, %v3641_v57 }
 0x2c3   : > { %v3644_v60 = vld [vmem:[#allocation3 + $0x187] sm:$0xff]  ;;  %v3666_v19 = vmax.f32 %v3618_v0, %v3642_v9  ;;  %v3645_v28 = vld [vmem:[#allocation3 + $0x18f] sm:$0xff]  ;;  %v3667_v31 = vmax.f32 %v3619_v41, %v3643_v17 }
 0x2c4   : > { %v3684_v20 = vld [vmem:[#allocation3 + $0x108] sm:$0xff]  ;;  %v3668_v39 = vmax.f32 %v3620_v15, %v3644_v60  ;;  %v3669_v54 = vmax.f32 %v3621_v24, %v3645_v28  ;;  %v3685_v52 = vld [vmem:[#allocation3 + $0x110] sm:$0xff] }
 0x2c5   : > { %v3686_v43 = vld [vmem:[#allocation3 + $0x128] sm:$0xff]  ;;  %v3708_v29 = vmax.f32 %v3660_v63, %v3684_v20  ;;  %v3687_v48 = vld [vmem:[#allocation3 + $0x130] sm:$0xff]  ;;  %v3709_v0 = vmax.f32 %v3661_v61, %v3685_v52 }
 0x2c6   : > { %v3688_v55 = vld [vmem:[#allocation3 + $0x148] sm:$0xff]  ;;  %v3710_v8 = vmax.f32 %v3662_v38, %v3686_v43  ;;  %v3689_v45 = vld [vmem:[#allocation3 + $0x150] sm:$0xff]  ;;  %v3711_v15 = vmax.f32 %v3663_v56, %v3687_v48 }
 0x2c7   : > { %v3690_v21 = vld [vmem:[#allocation3 + $0x168] sm:$0xff]  ;;  %v3712_v12 = vmax.f32 %v3664_v3, %v3688_v55  ;;  %v3691_v35 = vld [vmem:[#allocation3 + $0x170] sm:$0xff]  ;;  %v3713_v51 = vmax.f32 %v3665_v26, %v3689_v45 }
 0x2c8   : > { %v3692_v49 = vld [vmem:[#allocation3 + $0x188] sm:$0xff]  ;;  %v3714_v6 = vmax.f32 %v3666_v19, %v3690_v21  ;;  %v3693_v37 = vld [vmem:[#allocation3 + $0x190] sm:$0xff]  ;;  %v3715_v50 = vmax.f32 %v3667_v31, %v3691_v35 }
 0x2c9   : > { %v3732_v47 = vld [vmem:[#allocation3 + $0x109] sm:$0xff]  ;;  %v3716_v4 = vmax.f32 %v3668_v39, %v3692_v49  ;;  %v3733_v25 = vld [vmem:[#allocation3 + $0x111] sm:$0xff]  ;;  %v3717_v9 = vmax.f32 %v3669_v54, %v3693_v37  ;;  %v4462_v49 = vld [vmem:[%s5824_s30 + $0x80] sm:$0xff] }
 0x2ca   : > { %v3734_v53 = vld [vmem:[#allocation3 + $0x129] sm:$0xff]  ;;  %v3756_v46 = vmax.f32 %v3708_v29, %v3732_v47  ;;  %v3735_v63 = vld [vmem:[#allocation3 + $0x131] sm:$0xff]  ;;  %v3757_v43 = vmax.f32 %v3709_v0, %v3733_v25 }
 0x2cb   : > { %v3736_v5 = vld [vmem:[#allocation3 + $0x149] sm:$0xff]  ;;  %v3758_v7 = vmax.f32 %v3710_v8, %v3734_v53  ;;  %v3737_v60 = vld [vmem:[#allocation3 + $0x151] sm:$0xff]  ;;  %v3759_v39 = vmax.f32 %v3711_v15, %v3735_v63 }
 0x2cc   : > { %v3738_v30 = vld [vmem:[#allocation3 + $0x169] sm:$0xff]  ;;  %v3760_v44 = vmax.f32 %v3712_v12, %v3736_v5  ;;  %v3739_v38 = vld [vmem:[#allocation3 + $0x171] sm:$0xff]  ;;  %v3761_v29 = vmax.f32 %v3713_v51, %v3737_v60 }
 0x2cd   : > { %v3780_v14 = vld [vmem:[#allocation3 + $0x10a] sm:$0xff]  ;;  %v3762_v11 = vmax.f32 %v3714_v6, %v3738_v30  ;;  %v3781_v55 = vld [vmem:[#allocation3 + $0x112] sm:$0xff]  ;;  %v3763_v8 = vmax.f32 %v3715_v50, %v3739_v38 }
 0x2ce   : > { %v3740_v59 = vld [vmem:[#allocation3 + $0x189] sm:$0xff]  ;;  %v3804_v16 = vmax.f32 %v3756_v46, %v3780_v14  ;;  %v3741_v20 = vld [vmem:[#allocation3 + $0x191] sm:$0xff]  ;;  %v3805_v30 = vmax.f32 %v3757_v43, %v3781_v55 }
 0x2cf   : > { %v3782_v22 = vld [vmem:[#allocation3 + $0x12a] sm:$0xff]  ;;  %v3764_v36 = vmax.f32 %v3716_v4, %v3740_v59  ;;  %v3783_v21 = vld [vmem:[#allocation3 + $0x132] sm:$0xff]  ;;  %v3765_v4 = vmax.f32 %v3717_v9, %v3741_v20 }
 0x2d0   : > { %v3784_v13 = vld [vmem:[#allocation3 + $0x14a] sm:$0xff]  ;;  %v3806_v33 = vmax.f32 %v3758_v7, %v3782_v22  ;;  %v3785_v12 = vld [vmem:[#allocation3 + $0x152] sm:$0xff]  ;;  %v3807_v46 = vmax.f32 %v3759_v39, %v3783_v21 }
 0x2d1   : > { %v3786_v10 = vld [vmem:[#allocation3 + $0x16a] sm:$0xff]  ;;  %v6894_v23 = vmax.f32 %v3760_v44, %v3784_v13  ;;  %v3787_v6 = vld [vmem:[#allocation3 + $0x172] sm:$0xff]  ;;  %v3809_v44 = vmax.f32 %v3761_v29, %v3785_v12 }
 0x2d2   : > { %v3788_v40 = vld [vmem:[#allocation3 + $0x18a] sm:$0xff]  ;;  %v6896_v32 = vmax.f32 %v3762_v11, %v3786_v10  ;;  %v3828_v58 = vmax.f32 %v3804_v16, %v3806_v33  ;;  %v3789_v7 = vld [vmem:[#allocation3 + $0x192] sm:$0xff]  ;;  %v6910_v11 = vmax.f32 %v3763_v8, %v3787_v6  ;;  %v3829_v16 = vmax.f32 %v3805_v30, %v3807_v46 }
 0x2d3   : > { %v3830_v27 = vmax.f32 %v3806_v33, %v6894_v23  ;;  %v6900_v3 = vmax.f32 %v3764_v36, %v3788_v40  ;;  %v3622_v14 = vld [vmem:[#allocation3 + $0x1a6] sm:$0xff]  ;;  %v3623_v33 = vld [vmem:[#allocation3 + $0x1ae] sm:$0xff]  ;;  %v3831_v40 = vmax.f32 %v3807_v46, %v3809_v44  ;;  %v6915_v62 = vmax.f32 %v3765_v4, %v3789_v7 }
 0x2d4   : > { %v3844_v1 = vmax.f32 %v3828_v58, %v6894_v23  ;;  %v3832_v53 = vmax.f32 %v6894_v23, %v6896_v32  ;;  %v3646_v59 = vld [vmem:[#allocation3 + $0x1a7] sm:$0xff]  ;;  %v3647_v23 = vld [vmem:[#allocation3 + $0x1af] sm:$0xff]  ;;  %v3833_v24 = vmax.f32 %v3809_v44, %v6910_v11  ;;  %v3845_v42 = vmax.f32 %v3829_v16, %v3809_v44 }
 0x2d5   : > { %v3846_v47 = vmax.f32 %v3830_v27, %v6896_v32  ;;  %v3670_v22 = vmax.f32 %v3622_v14, %v3646_v59  ;;  %v3694_v13 = vld [vmem:[#allocation3 + $0x1a8] sm:$0xff]  ;;  %v3671_v41 = vmax.f32 %v3623_v33, %v3647_v23  ;;  %v3695_v36 = vld [vmem:[#allocation3 + $0x1b0] sm:$0xff]  ;;  %v3847_v54 = vmax.f32 %v3831_v40, %v6910_v11  ;;  %v4466_v16 = vld [vmem:[%s5824_s30 + $0xa0] sm:$0xff] }
 0x2d6   : > { %v3860_v19 = vmax.f32 %v3844_v1, %v6896_v32  ;;  %v3742_v18 = vld [vmem:[#allocation3 + $0x1a9] sm:$0xff]  ;;  %v3743_v57 = vld [vmem:[#allocation3 + $0x1b1] sm:$0xff]  ;;  %v3848_v61 = vmax.f32 %v3832_v53, %v6900_v3  ;;  %v3861_v45 = vmax.f32 %v3845_v42, %v6910_v11  ;;  %v6922_v37 = vmax.f32 %v3833_v24, %v6915_v62 }
 0x2d7   : > { %v3718_v2 = vmax.f32 %v3670_v22, %v3694_v13  ;;  %v3790_v34 = vld [vmem:[#allocation3 + $0x1aa] sm:$0xff]  ;;  %v3862_v58 = vmax.f32 %v3846_v47, %v6900_v3  ;;  %v3719_v26 = vmax.f32 %v3671_v41, %v3695_v36  ;;  %v3791_v31 = vld [vmem:[#allocation3 + $0x1b2] sm:$0xff]  ;;  %v3834_v0 = vmax.f32 %v6896_v32, %v6900_v3 }
 0x2d8   : > { %v6908_v5 = vmax.f32 %v3860_v19, %v6900_v3  ;;  %v3624_v17 = vld [vmem:[#allocation3 + $0x1c6] sm:$0xff]  ;;  %v3625_v1 = vld [vmem:[#allocation3 + $0x1ce] sm:$0xff]  ;;  %v3863_v9 = vmax.f32 %v3847_v54, %v6915_v62  ;;  %v6932_v38 = vmax.f32 %v3861_v45, %v6915_v62  ;;  %v3835_v32 = vmax.f32 %v6910_v11, %v6915_v62  ;;  %v4465_v47 = vld [vmem:[%s5824_s30 + $0x98] sm:$0xff] }
 0x2d9   : > { %v3648_v28 = vld [vmem:[#allocation3 + $0x1c7] sm:$0xff]  ;;  %v3766_v56 = vmax.f32 %v3718_v2, %v3742_v18  ;;  %v3649_v35 = vld [vmem:[#allocation3 + $0x1cf] sm:$0xff]  ;;  %v3767_v50 = vmax.f32 %v3719_v26, %v3743_v57 }
 0x2da   : > { %v3909_v10 = vadd.f32 %v4462_v49, %v6908_v5  ;;  %v3672_v52 = vmax.f32 %v3624_v17, %v3648_v28  ;;  %v3696_v48 = vld [vmem:[#allocation3 + $0x1c8] sm:$0xff]  ;;  %v4464_v51 = vld [vmem:[%s5824_s30 + $0x90] sm:$0xff]  ;;  %v3673_v20 = vmax.f32 %v3625_v1, %v3649_v35 }
 0x2db   : > { %v3744_v27 = vld [vmem:[#allocation3 + $0x1c9] sm:$0xff]  ;;  %v6927_v25 = vmax.f32 %v3766_v56, %v3790_v34  ;;  %v6939_v21 = vmax.f32 %v3767_v50, %v3791_v31  ;;  %v3745_v8 = vld [vmem:[#allocation3 + $0x1d1] sm:$0xff] }
 0x2dc   : > { %4478 = vst [vmem:[%s5824_s30 + $0x80] sm:$0xff] %v3909_v10  ;;  %v4463_v15 = vld [vmem:[%s5824_s30 + $0x88] sm:$0xff]  ;;  %v3720_v63 = vmax.f32 %v3672_v52, %v3696_v48  ;;  %v3697_v60 = vld [vmem:[#allocation3 + $0x1d0] sm:$0xff] }
 0x2dd   : > { %v3792_v19 = vld [vmem:[#allocation3 + $0x1ca] sm:$0xff]  ;;  %v6937_v55 = vmax.f32 %v3862_v58, %v6927_v25  ;;  %v3864_v29 = vmax.f32 %v3848_v61, %v6927_v25  ;;  %v3910_v6 = vadd.f32 %v4463_v15, %v6932_v38  ;;  %v3721_v53 = vmax.f32 %v3673_v20, %v3697_v60  ;;  %v3793_v11 = vld [vmem:[#allocation3 + $0x1d2] sm:$0xff] }
 0x2de   : > { %v3626_v43 = vld [vmem:[#allocation3 + $0x1e6] sm:$0xff]  ;;  %v3768_v49 = vmax.f32 %v3720_v63, %v3744_v27  ;;  %v3850_v30 = vmax.f32 %v3834_v0, %v6927_v25  ;;  %v3627_v46 = vld [vmem:[#allocation3 + $0x1ee] sm:$0xff]  ;;  %v6947_v7 = vmax.f32 %v3863_v9, %v6939_v21  ;;  %v3865_v22 = vmax.f32 %v6922_v37, %v6939_v21 }
 0x2df   : > { %v3650_v39 = vld [vmem:[#allocation3 + $0x1e7] sm:$0xff]  ;;  %v3651_v14 = vld [vmem:[#allocation3 + $0x1ef] sm:$0xff]  ;;  %v3911_v59 = vadd.f32 %v4464_v51, %v6937_v55  ;;  %4479 = vst [vmem:[%s5824_s30 + $0x88] sm:$0xff] %v3910_v6  ;;  %v3769_v18 = vmax.f32 %v3721_v53, %v3745_v8  ;;  %v3851_v2 = vmax.f32 %v3835_v32, %v6939_v21  ;;  %v3836_v54 = vmax.f32 %v6900_v3, %v6927_v25 }
 0x2e0   : > { %v3698_v12 = vld [vmem:[#allocation3 + $0x1e8] sm:$0xff]  ;;  %v3674_v4 = vmax.f32 %v3626_v43, %v3650_v39  ;;  %v6949_v44 = vmax.f32 %v3768_v49, %v3792_v19  ;;  %v3699_v10 = vld [vmem:[#allocation3 + $0x1f0] sm:$0xff]  ;;  %v3675_v23 = vmax.f32 %v3627_v46, %v3651_v14  ;;  %v3912_v36 = vadd.f32 %v4465_v47, %v6947_v7 }
 0x2e1   : > { %v3746_v13 = vld [vmem:[#allocation3 + $0x1e9] sm:$0xff]  ;;  %4480 = vst [vmem:[%s5824_s30 + $0x90] sm:$0xff] %v3911_v59  ;;  %v3747_v57 = vld [vmem:[#allocation3 + $0x1f1] sm:$0xff]  ;;  %v6963_v61 = vmax.f32 %v3769_v18, %v3793_v11  ;;  %v3837_v15 = vmax.f32 %v6915_v62, %v6939_v21  ;;  %v4470_v59 = vld [vmem:[%s5824_s30 + $0xc0] sm:$0xff] }
 0x2e2   : > { %v3722_v33 = vmax.f32 %v3674_v4, %v3698_v12  ;;  %v3628_v34 = vld [vmem:[#allocation3 + $0x206] sm:$0xff]  ;;  %v6959_v40 = vmax.f32 %v3864_v29, %v6949_v44  ;;  %v3866_v58 = vmax.f32 %v3850_v30, %v6949_v44  ;;  %v3723_v26 = vmax.f32 %v3675_v23, %v3699_v10  ;;  %v3629_v52 = vld [vmem:[#allocation3 + $0x20e] sm:$0xff]  ;;  %4481 = vst [vmem:[%s5824_s30 + $0x98] sm:$0xff] %v3912_v36  ;;  %v4469_v30 = vld [vmem:[%s5824_s30 + $0xb8] sm:$0xff] }
 0x2e3   : > { %v3652_v41 = vld [vmem:[#allocation3 + $0x207] sm:$0xff]  ;;  %v3653_v48 = vld [vmem:[#allocation3 + $0x20f] sm:$0xff]  ;;  %v6972_v51 = vmax.f32 %v3865_v22, %v6963_v61  ;;  %v3867_v9 = vmax.f32 %v3851_v2, %v6963_v61  ;;  %v3852_v39 = vmax.f32 %v3836_v54, %v6949_v44  ;;  %v3853_v62 = vmax.f32 %v3837_v15, %v6963_v61 }
 0x2e4   : > { %v4467_v24 = vld [vmem:[%s5824_s30 + $0xa8] sm:$0xff]  ;;  %v3676_v17 = vmax.f32 %v3628_v34, %v3652_v41  ;;  %v3770_v56 = vmax.f32 %v3722_v33, %v3746_v13  ;;  %v3913_v45 = vadd.f32 %v4466_v16, %v6959_v40  ;;  %v3795_v27 = vld [vmem:[#allocation3 + $0x1f2] sm:$0xff]  ;;  %v3677_v37 = vmax.f32 %v3629_v52, %v3653_v48 }
 0x2e5   : > { %v3794_v42 = vld [vmem:[#allocation3 + $0x1ea] sm:$0xff]  ;;  %v3771_v3 = vmax.f32 %v3723_v26, %v3747_v57  ;;  %v3914_v29 = vadd.f32 %v4467_v24, %v6972_v51  ;;  %v3797_v6 = vld [vmem:[#allocation3 + $0x212] sm:$0xff]  ;;  %v3838_v13 = vmax.f32 %v6927_v25, %v6949_v44  ;;  %v3839_v26 = vmax.f32 %v6939_v21, %v6963_v61 }
 0x2e6   : > { %v3700_v28 = vld [vmem:[#allocation3 + $0x208] sm:$0xff]  ;;  %v3701_v0 = vld [vmem:[#allocation3 + $0x210] sm:$0xff]  ;;  %v6974_v50 = vmax.f32 %v3770_v56, %v3794_v42  ;;  %4482 = vst [vmem:[%s5824_s30 + $0xa0] sm:$0xff] %v3913_v45 }
 0x2e7   : > { %v3748_v31 = vld [vmem:[#allocation3 + $0x209] sm:$0xff]  ;;  %v3724_v1 = vmax.f32 %v3676_v17, %v3700_v28  ;;  %v3749_v63 = vld [vmem:[#allocation3 + $0x211] sm:$0xff]  ;;  %v3725_v32 = vmax.f32 %v3677_v37, %v3701_v0  ;;  %v6985_v12 = vmax.f32 %v3771_v3, %v3795_v27  ;;  %4483 = vst [vmem:[%s5824_s30 + $0xa8] sm:$0xff] %v3914_v29 }
 0x2e8   : > { %v3796_v35 = vld [vmem:[#allocation3 + $0x20a] sm:$0xff]  ;;  %v6983_v8 = vmax.f32 %v3866_v58, %v6974_v50  ;;  %v3868_v14 = vmax.f32 %v3852_v39, %v6974_v50  ;;  %v3854_v42 = vmax.f32 %v3838_v13, %v6974_v50  ;;  %v3840_v3 = vmax.f32 %v6949_v44, %v6974_v50  ;;  %v4473_v13 = vld [vmem:[%s5824_s30 + $0xd8] sm:$0xff] }
 0x2e9   : > { %v3630_v60 = vld [vmem:[#allocation3 + $0x226] sm:$0xff]  ;;  %v4468_v20 = vld [vmem:[%s5824_s30 + $0xb0] sm:$0xff]  ;;  %v3772_v43 = vmax.f32 %v3724_v1, %v3748_v31  ;;  %v3773_v11 = vmax.f32 %v3725_v32, %v3749_v63  ;;  %v6997_v16 = vmax.f32 %v3867_v9, %v6985_v12  ;;  %v3869_v18 = vmax.f32 %v3853_v62, %v6985_v12 }
 0x2ea   : > { %v3654_v19 = vld [vmem:[#allocation3 + $0x227] sm:$0xff]  ;;  %v3655_v4 = vld [vmem:[#allocation3 + $0x22f] sm:$0xff]  ;;  %v3915_v10 = vadd.f32 %v4468_v20, %v6983_v8  ;;  %v3855_v15 = vmax.f32 %v3839_v26, %v6985_v12  ;;  %v3841_v62 = vmax.f32 %v6963_v61, %v6985_v12 }
 0x2eb   : > { %v3702_v49 = vld [vmem:[#allocation3 + $0x228] sm:$0xff]  ;;  %v3678_v47 = vmax.f32 %v3630_v60, %v3654_v19  ;;  %v6988_v46 = vmax.f32 %v3772_v43, %v3796_v35  ;;  %v3703_v23 = vld [vmem:[#allocation3 + $0x230] sm:$0xff]  ;;  %v7003_v36 = vmax.f32 %v3773_v11, %v3797_v6  ;;  %v3916_v17 = vadd.f32 %v4469_v30, %v6997_v16 }
 0x2ec   : > { %v3631_v53 = vld [vmem:[#allocation3 + $0x22e] sm:$0xff]  ;;  %v3632_v2 = vld [vmem:[#allocation3 + $0x246] sm:$0xff]  ;;  %4484 = vst [vmem:[%s5824_s30 + $0xb0] sm:$0xff] %v3915_v10 }
 0x2ed   : > { %v3750_v22 = vld [vmem:[#allocation3 + $0x229] sm:$0xff]  ;;  %v3726_v33 = vmax.f32 %v3678_v47, %v3702_v49  ;;  %v7001_v41 = vmax.f32 %v3868_v14, %v6988_v46  ;;  %v3679_v58 = vmax.f32 %v3631_v53, %v3655_v4  ;;  %v3751_v56 = vld [vmem:[#allocation3 + $0x231] sm:$0xff]  ;;  %v7013_v45 = vmax.f32 %v3869_v18, %v7003_v36  ;;  %4485 = vst [vmem:[%s5824_s30 + $0xb8] sm:$0xff] %v3916_v17 }
 0x2ee   : > { %v3656_v34 = vld [vmem:[#allocation3 + $0x247] sm:$0xff]  ;;  %v3657_v52 = vld [vmem:[#allocation3 + $0x24f] sm:$0xff]  ;;  %v3870_v27 = vmax.f32 %v3854_v42, %v6988_v46  ;;  %v3871_v29 = vmax.f32 %v3855_v15, %v7003_v36  ;;  %v3856_v6 = vmax.f32 %v3840_v3, %v6988_v46  ;;  %v3857_v14 = vmax.f32 %v3841_v62, %v7003_v36 }
 0x2ef   : > { %v4471_v24 = vld [vmem:[%s5824_s30 + $0xc8] sm:$0xff]  ;;  %v3774_v28 = vmax.f32 %v3726_v33, %v3750_v22  ;;  %v3680_v31 = vmax.f32 %v3632_v2, %v3656_v34  ;;  %v3917_v48 = vadd.f32 %v4470_v59, %v7001_v41  ;;  %v3727_v1 = vmax.f32 %v3679_v58, %v3703_v23  ;;  %v3799_v35 = vld [vmem:[#allocation3 + $0x232] sm:$0xff] }
 0x2f0   : > { %v3798_v25 = vld [vmem:[#allocation3 + $0x22a] sm:$0xff]  ;;  %v3918_v19 = vadd.f32 %v4471_v24, %v7013_v45  ;;  %v3801_v33 = vld [vmem:[#allocation3 + $0x252] sm:$0xff]  ;;  %v3842_v2 = vmax.f32 %v6974_v50, %v6988_v46  ;;  %v4474_v24 = vld [vmem:[%s5824_s30 + $0xe0] sm:$0xff] }
 0x2f1   : > { %v3704_v57 = vld [vmem:[#allocation3 + $0x248] sm:$0xff]  ;;  %v3822_v0 = vmax.f32 %v3774_v28, %v3798_v25  ;;  %v3705_v9 = vld [vmem:[#allocation3 + $0x250] sm:$0xff]  ;;  %4486 = vst [vmem:[%s5824_s30 + $0xc0] sm:$0xff] %v3917_v48  ;;  %v3775_v43 = vmax.f32 %v3727_v1, %v3751_v56 }
 0x2f2   : > { %v3633_v54 = vld [vmem:[#allocation3 + $0x24e] sm:$0xff]  ;;  %v3728_v21 = vmax.f32 %v3680_v31, %v3704_v57  ;;  %v3634_v63 = vld [vmem:[#allocation3 + $0x266] sm:$0xff]  ;;  %4487 = vst [vmem:[%s5824_s30 + $0xc8] sm:$0xff] %v3918_v19  ;;  %v3843_v31 = vmax.f32 %v6985_v12, %v7003_v36 }
 0x2f3   : > { %v3752_v37 = vld [vmem:[#allocation3 + $0x249] sm:$0xff]  ;;  %v3681_v32 = vmax.f32 %v3633_v54, %v3657_v52  ;;  %v7025_v49 = vmax.f32 %v3870_v27, %v3822_v0  ;;  %v3753_v47 = vld [vmem:[#allocation3 + $0x251] sm:$0xff]  ;;  %v3823_v4 = vmax.f32 %v3775_v43, %v3799_v35  ;;  %v3872_v18 = vmax.f32 %v3856_v6, %v3822_v0 }
 0x2f4   : > { %v3658_v60 = vld [vmem:[#allocation3 + $0x267] sm:$0xff]  ;;  %v4472_v20 = vld [vmem:[%s5824_s30 + $0xd0] sm:$0xff]  ;;  %v3776_v44 = vmax.f32 %v3728_v21, %v3752_v37  ;;  %v3858_v56 = vmax.f32 %v3842_v2, %v3822_v0 }
 0x2f5   : > { %v3800_v39 = vld [vmem:[#allocation3 + $0x24a] sm:$0xff]  ;;  %v3729_v30 = vmax.f32 %v3681_v32, %v3705_v9  ;;  %v3682_v59 = vmax.f32 %v3634_v63, %v3658_v60  ;;  %v3919_v61 = vadd.f32 %v4472_v20, %v7025_v49  ;;  %v3887_v34 = vmax.f32 %v3871_v29, %v3823_v4  ;;  %v3803_v21 = vld [vmem:[#allocation3 + $0x272] sm:$0xff] }
 0x2f6   : > { %v3706_v53 = vld [vmem:[#allocation3 + $0x268] sm:$0xff]  ;;  %v3824_v10 = vmax.f32 %v3776_v44, %v3800_v39  ;;  %v3873_v42 = vmax.f32 %v3857_v14, %v3823_v4  ;;  %v3707_v57 = vld [vmem:[#allocation3 + $0x270] sm:$0xff]  ;;  %v3859_v37 = vmax.f32 %v3843_v31, %v3823_v4  ;;  %v4477_v20 = vld [vmem:[%s5824_s30 + $0xf8] sm:$0xff] }
 0x2f7   : > { %v3635_v11 = vld [vmem:[#allocation3 + $0x26e] sm:$0xff]  ;;  %v3777_v25 = vmax.f32 %v3729_v30, %v3753_v47  ;;  %v3730_v58 = vmax.f32 %v3682_v59, %v3706_v53  ;;  %4488 = vst [vmem:[%s5824_s30 + $0xd0] sm:$0xff] %v3919_v61  ;;  %v3920_v54 = vadd.f32 %v4473_v13, %v3887_v34 }
 0x2f8   : > { %v3659_v22 = vld [vmem:[#allocation3 + $0x26f] sm:$0xff]  ;;  %v3888_v17 = vmax.f32 %v3872_v18, %v3824_v10  ;;  %v3874_v1 = vmax.f32 %v3858_v56, %v3824_v10 }
 0x2f9   : > { %v3754_v23 = vld [vmem:[#allocation3 + $0x269] sm:$0xff]  ;;  %v3683_v26 = vmax.f32 %v3635_v11, %v3659_v22  ;;  %v3825_v50 = vmax.f32 %v3777_v25, %v3801_v33  ;;  %v3755_v52 = vld [vmem:[#allocation3 + $0x271] sm:$0xff]  ;;  %4489 = vst [vmem:[%s5824_s30 + $0xd8] sm:$0xff] %v3920_v54 }
 0x2fa   : > { %v3802_v28 = vld [vmem:[#allocation3 + $0x26a] sm:$0xff]  ;;  %v3778_v46 = vmax.f32 %v3730_v58, %v3754_v23  ;;  %v3921_v48 = vadd.f32 %v4474_v24, %v3888_v17 }
 0x2fb   : > { %v4475_v27 = vld [vmem:[%s5824_s30 + $0xe8] sm:$0xff]  ;;  %v3731_v35 = vmax.f32 %v3683_v26, %v3707_v57  ;;  %v3889_v0 = vmax.f32 %v3873_v42, %v3825_v50  ;;  %v4476_v3 = vld [vmem:[%s5824_s30 + $0xf0] sm:$0xff]  ;;  %v3875_v36 = vmax.f32 %v3859_v37, %v3825_v50 }
 0x2fc   : > { %v3826_v15 = vmax.f32 %v3778_v46, %v3802_v28  ;;  %4490 = vst [vmem:[%s5824_s30 + $0xe0] sm:$0xff] %v3921_v48 }
 0x2fd   : > { %v3779_v12 = vmax.f32 %v3731_v35, %v3755_v52  ;;  %v3922_v9 = vadd.f32 %v4475_v27, %v3889_v0 }
 0x2fe   : > { %v3890_v63 = vmax.f32 %v3874_v1, %v3826_v15 }
 0x2ff   : > { %v3827_v60 = vmax.f32 %v3779_v12, %v3803_v21  ;;  %4491 = vst [vmem:[%s5824_s30 + $0xe8] sm:$0xff] %v3922_v9 }
 0x300   : > { %v3923_v19 = vadd.f32 %v4476_v3, %v3890_v63 }
 0x301   : > { %v3891_v43 = vmax.f32 %v3875_v36, %v3827_v60  ;;  %3943 = sbr.rel (%p6875_p6) target bundleno = 782 (0x30e), region = 48 }
 0x302   : > { %4492 = vst [vmem:[%s5824_s30 + $0xf0] sm:$0xff] %v3923_v19 }
 0x303   : > { %v3924_v39 = vadd.f32 %v4477_v20, %v3891_v43 }
 0x305   : > { %4493 = vst [vmem:[%s5824_s30 + $0xf8] sm:$0xff] %v3924_v39 }
 0x306   : > { %3944 = vst [vmem:[#allocation2 + $0x128] sm:$0xff] %v6908_v5  ;;  %3945 = vst [vmem:[#allocation2 + $0x130] sm:$0xff] %v6932_v38 }
 0x307   : > { %3946 = vst [vmem:[#allocation2 + $0x148] sm:$0xff] %v6937_v55  ;;  %3947 = vst [vmem:[#allocation2 + $0x150] sm:$0xff] %v6947_v7 }
 0x308   : > { %3948 = vst [vmem:[#allocation2 + $0x168] sm:$0xff] %v6959_v40  ;;  %3949 = vst [vmem:[#allocation2 + $0x170] sm:$0xff] %v6972_v51 }
 0x309   : > { %3950 = vst [vmem:[#allocation2 + $0x188] sm:$0xff] %v6983_v8  ;;  %3951 = vst [vmem:[#allocation2 + $0x190] sm:$0xff] %v6997_v16 }
 0x30a   : > { %3952 = vst [vmem:[#allocation2 + $0x1a8] sm:$0xff] %v7001_v41  ;;  %3953 = vst [vmem:[#allocation2 + $0x1b0] sm:$0xff] %v7013_v45 }
 0x30b   : > { %3954 = vst [vmem:[#allocation2 + $0x1c8] sm:$0xff] %v7025_v49  ;;  %3955 = vst [vmem:[#allocation2 + $0x1d0] sm:$0xff] %v3887_v34 }
 0x30c   : > { %3956 = vst [vmem:[#allocation2 + $0x1e8] sm:$0xff] %v3888_v17  ;;  %3957 = vst [vmem:[#allocation2 + $0x1f0] sm:$0xff] %v3889_v0 }
 0x30d   : > { %3958 = vst [vmem:[#allocation2 + $0x208] sm:$0xff] %v3890_v63  ;;  %3959 = vst [vmem:[#allocation2 + $0x210] sm:$0xff] %v3891_v43 }
 0x30e PF: > { %s4501_s15 = sshll.u32 %s5604_s16, 12  ;;  %s3974_s3 = sshll.u32 %s5824_s30, 4  ;;  %s7067_s3 = int_to_ptr.vmem [resolvable:$true] %s3974_s3 }
 0x30f   : > { %s7064_s6 = scalar_lea.hbm %s7131_s2, %s4501_s15  ;;  %s3961_s20 = scalar_lea.sflag [#allocation6], %s5807_s8 }
 0x310   : > { %s5492_s4 = scalar_lea.vmem %s7067_s3, 4096  ;;  %s5626_s29 = smov [#allocation9]  }
 0x311   : > { %p5493_p13 = scmp.ne.s32.totalorder %s7067_s3, %s5492_s4  ;;  %s5496_s18 = sshll.u32 %s5626_s29, 4  ;;  %s5497_s18 = int_to_ptr.vmem [resolvable:$false] %s5496_s18 }
 0x312   : > { %s5498_s16 = scalar_lea.vmem %s5497_s18, 8192  ;;  %p5499_p3 = scmp.lt.s32.totalorder %s7067_s3, %s5497_s18 }
 0x313   : > { %p5494_p12 = pnand %p5493_p13, %p5724_p8  ;;  %p5500_p2 = scmp.lt.s32.totalorder %s5498_s16, %s5492_s4 }
 0x315   : > { %p5495_p0 = pneg %p5494_p12  ;;  %p5501_p5 = por %p5500_p2, %p5499_p3 }
 0x317   : > { %p5502_p11 = pnand %p5501_p5, %p5495_p0 }
 0x319   : > { %5505 = shalt.err (!%p5502_p11)
}
 0x31a   : > { %s5506_s17 = scalar_lea.hbm %s7064_s6, 4096  ;;  %s5510_s23 = scalar_lea.hbm %s7131_s2, 8192 }
 0x31b   : > { %p5507_p10 = scmp.ne.s32.totalorder %s7064_s6, %s5506_s17  ;;  %p5511_p1 = scmp.lt.s32.totalorder %s7064_s6, %s7131_s2 }
 0x31c   : > { %p5512_p9 = scmp.lt.s32.totalorder %s5510_s23, %s5506_s17 }
 0x31d   : > { %p5508_p7 = pnand %p5507_p10, %p5724_p8 }
 0x31e   : > { %p5513_p6 = por %p5512_p9, %p5511_p1 }
 0x31f   : > { %p5509_p4 = pneg %p5508_p7 }
 0x321   : > { %p5514_p13 = pnand %p5513_p6, %p5509_p4 }
 0x323   : > { %5517 = shalt.err (!%p5514_p13)
}
 0x324   : > { %s5627_s30 = smov 128   ;;  %s5628_s26 = smov 8  }
 0x325   : > { %5181 = dma.vmem_to_hbm [thread:$0]  (%p5724_p8), %s7067_s3, 4096, %s7064_s6, %s3961_s20, %s5627_s30, %s5627_s30, %s5628_s26  }
 0x326 PF: > { %p5195_p12 = scmp.ge.s32.totalorder %s5616_s19, 2  ;;  %s3989_s7 = sand.u32 1, %s5588_s12  }
 0x327   : > { %p7173_p0 = scmp.ne.s32.totalorder %s7149_s28, 0  ;;  %s3990_s15 = scalar_lea.sflag [#allocation6], %s3989_s7 }
 0x329   : > { %p5191_p3 = pnand %p5195_p12, %p7173_p0 }
 0x32b   : > { %p5192_p2 = pneg %p5191_p3 }
 0x32d   : > { %5571 = dma.done.wait (%p5192_p2), %s3990_s15, 4096  }
 0x32e   : > { %5573 = vsyncadd (%p5192_p2), %s3990_s15, 4294963200  ;;  %s21_s19 = sadd.s32 1, %s5616_s19   ;;  %s7174_s27 = sld [smem:[#allocation17_spill]] }
 0x32f   : > { %p18_p5 = scmp.ge.s32.totalorder %s21_s19, 10   ;;  %s7175_s15 = sld [smem:[#allocation13_spill]] }
 0x330   : > { %s7176_s16 = sld [smem:[#allocation14_spill]]  ;;  %s7179_s9 = smov %s5580_s10 }
 0x331   : > { %s7177_s17 = sld [smem:[#allocation15_spill]]  ;;  %s7180_s10 = smov %s5584_s11 }
 0x332   : > { %s7178_s18 = sld [smem:[#allocation16_spill]]  ;;  %s7182_s12 = smov %s5592_s13 }
 0x333   : > { %s7183_s13 = smov %s5596_s14  ;;  %s7184_s14 = smov %s5795_s25 }
 0x334   : > { %s7181_s11 = smov %s7174_s27  ;;  %20 = sbr.rel (!%p18_p5) target bundleno = 13 (0xd), region = 115 }
 0x339   :  { %3995 = vsyncpa [#allocation5], 1 }
 0x33a   :  { %3997 = vsyncpa [#allocation5 + $0x1], 1 }
 0x33b   :  { %3998 = vsyncpa [#allocation8], 1 }
 0x33c   :  { %4000 = vsyncpa [#allocation8 + $0x1], 1 }
 0x33d   :  { %4001 = vsyncpa [#allocation6], 1 }
 0x33e   :  { %4003 = vsyncpa [#allocation6 + $0x1], 1 }

</bundles_post_ra>
